<compile_context>
chip_gen: v7x
topology: tpu7x:2x2x1
jax: 0.10.0
libtpu: 0.0.40
codegen_flags: <defaults>
</compile_context>

<pallas_src>
import math
from functools import partial

import jax
import jax.numpy as jnp
from jax.experimental import pallas as pl
from jax.experimental.pallas import tpu as pltpu


def _round_up(x, m):
    return ((x + m - 1) // m) * m


def _vmem_limit_bytes():
    """Chip-aware scoped-VMEM budget (96 MiB on 128-MiB chips, ~48 MiB on v7x)."""
    cap = 0
    try:
        cap = int(getattr(pltpu.get_tpu_info(), "vmem_capacity_bytes", 0) or 0)
    except Exception:
        cap = 0
    if cap <= 0:
        cap = 128 * 1024 * 1024
    return int(min(96 * 1024 * 1024, cap * 3 // 4))


# ---------------------------------------------------------------------------
# Fused kernel: STFT (in-kernel framing) -> mask nets -> normalize -> apply
# ---------------------------------------------------------------------------
def _fused_kernel(chunks_ref, basis_ref, w1c_ref, b1c_ref, w2_ref, b2_ref,
                  ore_ref, oim_ref, acc_ref, msq_ref,
                  *, ft, groups, k, n_stems, fp, hp, rpad):
    t0 = pl.multiple_of(pl.program_id(1) * ft, 128)          # frame-tile start

    # Overlapping hop-chunk window for this tile, loaded ONCE (f32, row=sublane).
    win = chunks_ref[0, pl.ds(t0, ft + rpad), :]              # (ft+rpad, hop)

    # STFT: frame t uses chunks [t, t+r); k adjacent chunks are lane-concatenated
    # so each matmul has K = k*hop and N = 2*Fp (combined cos|sin basis).
    for g in range(groups):
        if k == 1:
            c = win[g:g + ft, :]
        else:
            c = jnp.concatenate(
                [win[g * k + u: g * k + u + ft, :] for u in range(k)], axis=1)
        p = jnp.dot(c.astype(jnp.bfloat16), basis_ref[g],
                    preferred_element_type=jnp.float32)       # (ft, 2*fp)
        if g == 0:
            acc_ref[...] = p
        else:
            acc_ref[...] += p
    # re = acc[:, :fp],  im = -acc[:, fp:]

    # Magnitude, cast once to bf16 for the mask-net MXU matmuls.
    xr = acc_ref[:, :fp]
    xi = acc_ref[:, fp:]
    mag = jnp.sqrt(xr * xr + xi * xi).astype(jnp.bfloat16)    # (ft, fp)

    # Mask nets (stand-in for UNet): layer 1 of ALL stems as one wide matmul.
    h = jnp.dot(mag, w1c_ref[...], preferred_element_type=jnp.float32) + b1c_ref[...]
    h = jnp.maximum(h, 0.0).astype(jnp.bfloat16)              # (ft, NS*hp)

    total = None
    for s in range(n_stems):                                  # per-stem layer 2
        y = jnp.dot(h[:, s * hp:(s + 1) * hp], w2_ref[s],
                    preferred_element_type=jnp.float32) + b2_ref[s]
        m = pl.reciprocal(1.0 + jnp.exp(-y), approx=True)     # sigmoid via EUP
        m2 = m * m
        msq_ref[s] = m2                                       # keep in VMEM, not vregs
        total = m2 if total is None else total + m2

    inv = pl.reciprocal(total + 1e-10, approx=True)           # Wiener denominator

    # Apply: mag*mask*exp(i*phase) == mask*(re + i*im)  (magnitude/phase cancel).
    # Write (freq, frames) tiles so the wrapper needs no post-kernel transpose.
    for s in range(n_stems):
        nm = (msq_ref[s] + 5e-11) * inv                       # (m^2 + eps/2) / (sum + eps)
        ore_ref[0, s] = jnp.transpose(nm * acc_ref[:, :fp])
        oim_ref[0, s] = jnp.transpose(-(nm * acc_ref[:, fp:]))


def fused_stft_mask_pallas(chunks, basis, w1c, b1c, w2, b2, *, ft, n_frames,
                           n_stems, hp, fp, groups, k, hop, rpad):
    B, NC, _ = chunks.shape
    nt = n_frames // ft
    kernel = partial(_fused_kernel, ft=ft, groups=groups, k=k,
                     n_stems=n_stems, fp=fp, hp=hp, rpad=rpad)
    return pl.pallas_call(
        kernel,
        out_shape=tuple(jax.ShapeDtypeStruct((B, n_stems, fp, n_frames), jnp.float32)
                        for _ in range(2)),
        grid=(B, nt),
        in_specs=[
            # whole per-batch chunked waveform (constant over frame tiles -> one fetch per b)
            pl.BlockSpec((1, NC, hop), lambda b, t: (b, 0, 0)),
            # combined window-folded (cos|sin) DFT basis, bf16, K-grouped
            pl.BlockSpec((groups, k * hop, 2 * fp), lambda b, t: (0, 0, 0)),
            # mask-net weights (bf16) / biases (f32), constant
            pl.BlockSpec((fp, n_stems * hp), lambda b, t: (0, 0)),
            pl.BlockSpec((1, n_stems * hp), lambda b, t: (0, 0)),
            pl.BlockSpec((n_stems, hp, fp), lambda b, t: (0, 0, 0)),
            pl.BlockSpec((n_stems, 1, fp), lambda b, t: (0, 0, 0)),
        ],
        out_specs=tuple(
            pl.BlockSpec((1, n_stems, fp, ft), lambda b, t: (b, 0, 0, t))
            for _ in range(2)
        ),
        scratch_shapes=[
            pltpu.VMEM((ft, 2 * fp), jnp.float32),            # STFT accumulator (re|im)
            pltpu.VMEM((n_stems, ft, fp), jnp.float32),       # per-stem mask^2
        ],
        compiler_params=pltpu.CompilerParams(
            dimension_semantics=("parallel", "parallel"),
            vmem_limit_bytes=_vmem_limit_bytes(),
        ),
    )(chunks, basis, w1c, b1c, w2, b2)


# ---------------------------------------------------------------------------
# Splitter forward (glue + the fused Pallas kernel)
# ---------------------------------------------------------------------------
def splitter_forward(wav, stem_params, *, F=64, T=8, win_length=256, hop_length=64,
                     frame_tile=512):
    """wav: (2, L) float32.  Returns dict name -> complex64 (2, F, n_frames)."""
    wav = jnp.squeeze(wav)
    B, L = wav.shape
    W, hop = win_length, hop_length
    assert W % hop == 0, "win_length must be a multiple of hop_length"
    r = W // hop
    assert F <= W // 2 + 1

    Fp = _round_up(F, 128)                        # lane-dense freq padding
    NF = 1 + L // hop                             # torch.stft(center=True) frame count
    NF_T = math.ceil(NF / T) * T                  # batchify() zero-pad length (dropped later)
    NFp = _round_up(NF_T, 128)                    # frames padded to a lane multiple
    FT = min(_round_up(frame_tile, 128), NFp)     # frame tile (multiple of 128)
    NFp = _round_up(NFp, FT)
    # NOTE: for F=64 half of Fp=128 lanes are pad that is computed/stored then
    # sliced off; production should use F as a multiple of 128 (real F=1024 is).

    # MXU-K grouping: k adjacent hop-chunks per matmul (K = k*hop, up to 256).
    k = max(1, min(r, 256 // max(hop, 1)))
    while r % k:
        k -= 1
    groups = r // k
    rpad = _round_up(r - 1, 8) if r > 1 else 0

    # --- torch.stft(center=True, pad_mode='reflect') framing prep (glue) ---
    padded = jnp.pad(wav.astype(jnp.float32), ((0, 0), (W // 2, W // 2)), mode="reflect")
    n_chunks = NFp + rpad                         # frame t needs hop-chunks [t, t+r)
    total = n_chunks * hop
    cur = padded.shape[1]
    if total > cur:
        padded = jnp.pad(padded, ((0, 0), (0, total - cur)))
    else:
        padded = padded[:, :total]
    chunks = padded.reshape(B, n_chunks, hop)     # (B, n_chunks, hop) f32; no rx frame copy

    # periodic Hann window folded into a combined (cos|sin) DFT basis, bf16 for the MXU
    n = jnp.arange(W, dtype=jnp.float32)
    f = jnp.arange(F, dtype=jnp.float32)
    hann = 0.5 - 0.5 * jnp.cos(2.0 * jnp.pi * n / W)
    ang = 2.0 * jnp.pi * n[:, None] * f[None, :] / W
    cosw = jnp.pad(hann[:, None] * jnp.cos(ang), ((0, 0), (0, Fp - F)))      # (W, Fp)
    sinw = jnp.pad(hann[:, None] * jnp.sin(ang), ((0, 0), (0, Fp - F)))
    basis = jnp.concatenate([cosw, sinw], axis=1)                            # (W, 2*Fp)
    basis = basis.reshape(groups, k * hop, 2 * Fp).astype(jnp.bfloat16)

    # --- stack + lane-pad per-stem mask-net weights (stand-in for UNet), bf16 ---
    names = list(stem_params.keys())
    NS = len(names)
    H = stem_params[names[0]][0].shape[1]
    Hp = _round_up(H, 128)
    w1c = jnp.concatenate(
        [jnp.pad(stem_params[nm][0], ((0, Fp - F), (0, Hp - H))) for nm in names],
        axis=1).astype(jnp.bfloat16)                                         # (Fp, NS*Hp)
    b1c = jnp.concatenate(
        [jnp.pad(stem_params[nm][1], ((0, 0), (0, Hp - H))) for nm in names],
        axis=1)                                                              # (1, NS*Hp)
    w2 = jnp.stack(
        [jnp.pad(stem_params[nm][2], ((0, Hp - H), (0, Fp - F))) for nm in names]
    ).astype(jnp.bfloat16)                                                   # (NS, Hp, Fp)
    b2 = jnp.stack(
        [jnp.pad(stem_params[nm][3], ((0, 0), (0, Fp - F))) for nm in names]
    )                                                                        # (NS, 1, Fp)

    # --- fused STFT + masks + normalize + apply (single HBM pass) ---
    ore, oim = fused_stft_mask_pallas(
        chunks, basis, w1c, b1c, w2, b2,
        ft=FT, n_frames=NFp, n_stems=NS, hp=Hp, fp=Fp,
        groups=groups, k=k, hop=hop, rpad=rpad)              # (B, NS, Fp, NFp)

    # --- back to PyTorch layout: outputs already (freq, frames); just slice ---
    masked = jax.lax.complex(ore, oim)[:, :, :F, :NF]         # (B, NS, F, NF)
    return {nm: masked[:, si] for si, nm in enumerate(names)}


def init_stem_params(key, F, H):
    k1, k2 = jax.random.split(key)
    w1 = 0.1 * jax.random.normal(k1, (F, H), dtype=jnp.float32)
    b1 = jnp.zeros((1, H), dtype=jnp.float32)
    w2 = 0.1 * jax.random.normal(k2, (H, F), dtype=jnp.float32)
    b2 = jnp.zeros((1, F), dtype=jnp.float32)
    return (w1, b1, w2, b2)


if __name__ == "__main__":
    # Small, module-consistent configuration (original: F=1024, T=512, win=4096, hop=1024)
    F_BINS, T_SEG, WIN, HOP = 64, 8, 256, 64
    HIDDEN = 32
    STEMS = ["vocals", "accompaniment"]

    key = jax.random.PRNGKey(0)
    k_wav, k_p = jax.random.split(key)
    wav = jax.random.normal(k_wav, (2, 1024), dtype=jnp.float32)         # stereo waveform

    stem_keys = jax.random.split(k_p, len(STEMS))
    stem_params = {name: init_stem_params(k, F_BINS, HIDDEN)
                   for name, k in zip(STEMS, stem_keys)}

    fwd = jax.jit(partial(splitter_forward, F=F_BINS, T=T_SEG,
                          win_length=WIN, hop_length=HOP))
    outputs = fwd(wav, stem_params)
    for v in outputs.values():
        jax.block_until_ready(v)

    n_frames = 1 + wav.shape[1] // HOP
    for name, v in outputs.items():
        assert v.shape == (2, F_BINS, n_frames), (name, v.shape)
        assert v.dtype == jnp.complex64

    print("KERNEL_OK")
</pallas_src>

<mosaic_0001>
module attributes {stable_mosaic.version = 11 : i64} {
  func.func @_fused_kernel(%arg0: i32, %arg1: i32, %arg2: memref<1x136x64xf32, #tpu.memory_space<vmem>>, %arg3: memref<1x256x256xbf16, #tpu.memory_space<vmem>>, %arg4: memref<128x256xbf16, #tpu.memory_space<vmem>>, %arg5: memref<1x256xf32, #tpu.memory_space<vmem>>, %arg6: memref<2x128x128xbf16, #tpu.memory_space<vmem>>, %arg7: memref<2x1x128xf32, #tpu.memory_space<vmem>>, %arg8: memref<1x2x128x128xf32, #tpu.memory_space<vmem>>, %arg9: memref<1x2x128x128xf32, #tpu.memory_space<vmem>>, %arg10: memref<128x256xf32, #tpu.memory_space<vmem>>, %arg11: memref<2x128x128xf32, #tpu.memory_space<vmem>>) attributes {dimension_semantics = [#tpu.dimension_semantics<parallel>, #tpu.dimension_semantics<parallel>], iteration_bounds = array<i64: 2, 1>, scalar_prefetch = 0 : i64, scratch_operands = 2 : i64, tpu.core_type = #tpu.core_type<tc>, window_params = [{transform_indices = @transform_0, window_bounds = array<i64: 1, 136, 64>}, {pipeline_mode = #tpu.pipeline_mode<synchronous>, transform_indices = @transform_1, window_bounds = array<i64: 1, 256, 256>}, {pipeline_mode = #tpu.pipeline_mode<synchronous>, transform_indices = @transform_2, window_bounds = array<i64: 128, 256>}, {pipeline_mode = #tpu.pipeline_mode<synchronous>, transform_indices = @transform_3, window_bounds = array<i64: 1, 256>}, {pipeline_mode = #tpu.pipeline_mode<synchronous>, transform_indices = @transform_4, window_bounds = array<i64: 2, 128, 128>}, {pipeline_mode = #tpu.pipeline_mode<synchronous>, transform_indices = @transform_5, window_bounds = array<i64: 2, 1, 128>}, {transform_indices = @transform_6, window_bounds = array<i64: 1, 2, 128, 128>}, {transform_indices = @transform_7, window_bounds = array<i64: 1, 2, 128, 128>}]} {
    %c128_i32 = arith.constant 128 : i32
    %0 = arith.muli %arg1, %c128_i32 : i32
    %1 = tpu.assume_multiple %0, 128 : i32
    %c0 = arith.constant 0 : index
    %2 = arith.index_cast %1 : i32 to index
    %c0_0 = arith.constant 0 : index
    %3 = vector.load %arg2[%c0, %2, %c0_0] : memref<1x136x64xf32, #tpu.memory_space<vmem>>, vector<1x136x64xf32>
    %4 = vector.shape_cast %3 : vector<1x136x64xf32> to vector<136x64xf32>
    %5 = vector.extract_strided_slice %4 {offsets = [0, 0], sizes = [128, 64], strides = [1, 1]} : vector<136x64xf32> to vector<128x64xf32>
    %6 = vector.extract_strided_slice %4 {offsets = [1, 0], sizes = [128, 64], strides = [1, 1]} : vector<136x64xf32> to vector<128x64xf32>
    %7 = vector.extract_strided_slice %4 {offsets = [2, 0], sizes = [128, 64], strides = [1, 1]} : vector<136x64xf32> to vector<128x64xf32>
    %8 = vector.extract_strided_slice %4 {offsets = [3, 0], sizes = [128, 64], strides = [1, 1]} : vector<136x64xf32> to vector<128x64xf32>
    %9 = tpu.concatenate %5, %6, %7, %8 in 1 : vector<128x64xf32>, vector<128x64xf32>, vector<128x64xf32>, vector<128x64xf32> -> vector<128x256xf32>
    %10 = arith.truncf %9 : vector<128x256xf32> to vector<128x256xbf16>
    %c0_1 = arith.constant 0 : index
    %c0_2 = arith.constant 0 : index
    %c0_3 = arith.constant 0 : index
    %11 = vector.load %arg3[%c0_1, %c0_2, %c0_3] : memref<1x256x256xbf16, #tpu.memory_space<vmem>>, vector<1x256x256xbf16>
    %12 = vector.shape_cast %11 : vector<1x256x256xbf16> to vector<256x256xbf16>
    %cst = arith.constant dense<0.000000e+00> : vector<128x256xf32>
    %13 = tpu.matmul %10, %12, %cst {dimension_numbers = #tpu.dot_dimension_numbers<[1], [0], [0], [1], [0, 0, 1, 1], [], []>} : vector<128x256xbf16>, vector<256x256xbf16>, vector<128x256xf32> -> vector<128x256xf32>
    %c0_4 = arith.constant 0 : index
    %c0_5 = arith.constant 0 : index
    %14 = vector.load %arg10[%c0_4, %c0_5] : memref<128x256xf32, #tpu.memory_space<vmem>>, vector<128x256xf32>
    tpu.vector_store %arg10[%c0_4, %c0_5], %13 {strides = array<i32>} : memref<128x256xf32, #tpu.memory_space<vmem>>, vector<128x256xf32>,
    %c0_6 = arith.constant 0 : index
    %c0_7 = arith.constant 0 : index
    %15 = vector.load %arg10[%c0_6, %c0_7] : memref<128x256xf32, #tpu.memory_space<vmem>>, vector<128x128xf32>
    %c0_8 = arith.constant 0 : index
    %c128 = arith.constant 128 : index
    %16 = vector.load %arg10[%c0_8, %c128] : memref<128x256xf32, #tpu.memory_space<vmem>>, vector<128x128xf32>
    %17 = arith.mulf %15, %15 : vector<128x128xf32>
    %18 = arith.mulf %16, %16 : vector<128x128xf32>
    %19 = arith.addf %17, %18 : vector<128x128xf32>
    %20 = math.sqrt %19 : vector<128x128xf32>
    %21 = arith.truncf %20 : vector<128x128xf32> to vector<128x128xbf16>
    %c0_9 = arith.constant 0 : index
    %c0_10 = arith.constant 0 : index
    %22 = vector.load %arg4[%c0_9, %c0_10] : memref<128x256xbf16, #tpu.memory_space<vmem>>, vector<128x256xbf16>
    %cst_11 = arith.constant dense<0.000000e+00> : vector<128x256xf32>
    %23 = tpu.matmul %21, %22, %cst_11 {dimension_numbers = #tpu.dot_dimension_numbers<[1], [0], [0], [1], [0, 0, 1, 1], [], []>} : vector<128x128xbf16>, vector<128x256xbf16>, vector<128x256xf32> -> vector<128x256xf32>
    %c0_12 = arith.constant 0 : index
    %c0_13 = arith.constant 0 : index
    %24 = vector.load %arg5[%c0_12, %c0_13] : memref<1x256xf32, #tpu.memory_space<vmem>>, vector<1x256xf32>
    %25 = vector.broadcast %24 : vector<1x256xf32> to vector<128x256xf32>
    %26 = arith.addf %23, %25 : vector<128x256xf32>
    %cst_14 = arith.constant 0.000000e+00 : f32
    %27 = vector.broadcast %cst_14 : f32 to vector<128x256xf32>
    %28 = arith.maximumf %26, %27 : vector<128x256xf32>
    %29 = arith.truncf %28 : vector<128x256xf32> to vector<128x256xbf16>
    %30 = vector.extract_strided_slice %29 {offsets = [0, 0], sizes = [128, 128], strides = [1, 1]} : vector<128x256xbf16> to vector<128x128xbf16>
    %c0_15 = arith.constant 0 : index
    %c0_16 = arith.constant 0 : index
    %c0_17 = arith.constant 0 : index
    %31 = vector.load %arg6[%c0_15, %c0_16, %c0_17] : memref<2x128x128xbf16, #tpu.memory_space<vmem>>, vector<1x128x128xbf16>
    %32 = vector.shape_cast %31 : vector<1x128x128xbf16> to vector<128x128xbf16>
    %cst_18 = arith.constant dense<0.000000e+00> : vector<128x128xf32>
    %33 = tpu.matmul %30, %32, %cst_18 {dimension_numbers = #tpu.dot_dimension_numbers<[1], [0], [0], [1], [0, 0, 1, 1], [], []>} : vector<128x128xbf16>, vector<128x128xbf16>, vector<128x128xf32> -> vector<128x128xf32>
    %c0_19 = arith.constant 0 : index
    %c0_20 = arith.constant 0 : index
    %c0_21 = arith.constant 0 : index
    %34 = vector.load %arg7[%c0_19, %c0_20, %c0_21] : memref<2x1x128xf32, #tpu.memory_space<vmem>>, vector<1x1x128xf32>
    %35 = vector.shape_cast %34 : vector<1x1x128xf32> to vector<1x128xf32>
    %36 = vector.broadcast %35 : vector<1x128xf32> to vector<128x128xf32>
    %37 = arith.addf %33, %36 : vector<128x128xf32>
    %cst_22 = arith.constant 0.000000e+00 : f32
    %38 = vector.broadcast %cst_22 : f32 to vector<128x128xf32>
    %39 = arith.subf %38, %37 : vector<128x128xf32>
    %40 = math.exp %39 : vector<128x128xf32>
    %cst_23 = arith.constant 1.000000e+00 : f32
    %41 = vector.broadcast %cst_23 : f32 to vector<128x128xf32>
    %42 = arith.addf %41, %40 : vector<128x128xf32>
    %43 = tpu.reciprocal %42 {approx = true} : vector<128x128xf32> -> vector<128x128xf32>
    %44 = arith.mulf %43, %43 : vector<128x128xf32>
    %c0_24 = arith.constant 0 : index
    %c0_25 = arith.constant 0 : index
    %c0_26 = arith.constant 0 : index
    %45 = vector.load %arg11[%c0_24, %c0_25, %c0_26] : memref<2x128x128xf32, #tpu.memory_space<vmem>>, vector<1x128x128xf32>
    %46 = vector.shape_cast %45 : vector<1x128x128xf32> to vector<128x128xf32>
    %47 = vector.shape_cast %44 : vector<128x128xf32> to vector<1x128x128xf32>
    tpu.vector_store %arg11[%c0_24, %c0_25, %c0_26], %47 {strides = array<i32>} : memref<2x128x128xf32, #tpu.memory_space<vmem>>, vector<1x128x128xf32>,
    %48 = vector.extract_strided_slice %29 {offsets = [0, 128], sizes = [128, 128], strides = [1, 1]} : vector<128x256xbf16> to vector<128x128xbf16>
    %c1 = arith.constant 1 : index
    %c0_27 = arith.constant 0 : index
    %c0_28 = arith.constant 0 : index
    %49 = vector.load %arg6[%c1, %c0_27, %c0_28] : memref<2x128x128xbf16, #tpu.memory_space<vmem>>, vector<1x128x128xbf16>
    %50 = vector.shape_cast %49 : vector<1x128x128xbf16> to vector<128x128xbf16>
    %cst_29 = arith.constant dense<0.000000e+00> : vector<128x128xf32>
    %51 = tpu.matmul %48, %50, %cst_29 {dimension_numbers = #tpu.dot_dimension_numbers<[1], [0], [0], [1], [0, 0, 1, 1], [], []>} : vector<128x128xbf16>, vector<128x128xbf16>, vector<128x128xf32> -> vector<128x128xf32>
    %c1_30 = arith.constant 1 : index
    %c0_31 = arith.constant 0 : index
    %c0_32 = arith.constant 0 : index
    %52 = vector.load %arg7[%c1_30, %c0_31, %c0_32] : memref<2x1x128xf32, #tpu.memory_space<vmem>>, vector<1x1x128xf32>
    %53 = vector.shape_cast %52 : vector<1x1x128xf32> to vector<1x128xf32>
    %54 = vector.broadcast %53 : vector<1x128xf32> to vector<128x128xf32>
    %55 = arith.addf %51, %54 : vector<128x128xf32>
    %cst_33 = arith.constant 0.000000e+00 : f32
    %56 = vector.broadcast %cst_33 : f32 to vector<128x128xf32>
    %57 = arith.subf %56, %55 : vector<128x128xf32>
    %58 = math.exp %57 : vector<128x128xf32>
    %cst_34 = arith.constant 1.000000e+00 : f32
    %59 = vector.broadcast %cst_34 : f32 to vector<128x128xf32>
    %60 = arith.addf %59, %58 : vector<128x128xf32>
    %61 = tpu.reciprocal %60 {approx = true} : vector<128x128xf32> -> vector<128x128xf32>
    %62 = arith.mulf %61, %61 : vector<128x128xf32>
    %c1_35 = arith.constant 1 : index
    %c0_36 = arith.constant 0 : index
    %c0_37 = arith.constant 0 : index
    %63 = vector.load %arg11[%c1_35, %c0_36, %c0_37] : memref<2x128x128xf32, #tpu.memory_space<vmem>>, vector<1x128x128xf32>
    %64 = vector.shape_cast %63 : vector<1x128x128xf32> to vector<128x128xf32>
    %65 = vector.shape_cast %62 : vector<128x128xf32> to vector<1x128x128xf32>
    tpu.vector_store %arg11[%c1_35, %c0_36, %c0_37], %65 {strides = array<i32>} : memref<2x128x128xf32, #tpu.memory_space<vmem>>, vector<1x128x128xf32>,
    %66 = arith.addf %44, %62 : vector<128x128xf32>
    %cst_38 = arith.constant 1.000000e-10 : f32
    %67 = vector.broadcast %cst_38 : f32 to vector<128x128xf32>
    %68 = arith.addf %66, %67 : vector<128x128xf32>
    %69 = tpu.reciprocal %68 {approx = true} : vector<128x128xf32> -> vector<128x128xf32>
    %c0_39 = arith.constant 0 : index
    %c0_40 = arith.constant 0 : index
    %c0_41 = arith.constant 0 : index
    %70 = vector.load %arg11[%c0_39, %c0_40, %c0_41] : memref<2x128x128xf32, #tpu.memory_space<vmem>>, vector<1x128x128xf32>
    %71 = vector.shape_cast %70 : vector<1x128x128xf32> to vector<128x128xf32>
    %cst_42 = arith.constant 5.000000e-11 : f32
    %72 = vector.broadcast %cst_42 : f32 to vector<128x128xf32>
    %73 = arith.addf %71, %72 : vector<128x128xf32>
    %74 = arith.mulf %73, %69 : vector<128x128xf32>
    %c0_43 = arith.constant 0 : index
    %c0_44 = arith.constant 0 : index
    %75 = vector.load %arg10[%c0_43, %c0_44] : memref<128x256xf32, #tpu.memory_space<vmem>>, vector<128x128xf32>
    %76 = arith.mulf %74, %75 : vector<128x128xf32>
    %77 = tpu.transpose %76, [1, 0] : vector<128x128xf32> -> vector<128x128xf32>
    %c0_45 = arith.constant 0 : index
    %c0_46 = arith.constant 0 : index
    %c0_47 = arith.constant 0 : index
    %c0_48 = arith.constant 0 : index
    %78 = vector.load %arg8[%c0_45, %c0_46, %c0_47, %c0_48] : memref<1x2x128x128xf32, #tpu.memory_space<vmem>>, vector<1x1x128x128xf32>
    %79 = vector.shape_cast %78 : vector<1x1x128x128xf32> to vector<128x128xf32>
    %80 = vector.shape_cast %77 : vector<128x128xf32> to vector<1x1x128x128xf32>
    tpu.vector_store %arg8[%c0_45, %c0_46, %c0_47, %c0_48], %80 {strides = array<i32>} : memref<1x2x128x128xf32, #tpu.memory_space<vmem>>, vector<1x1x128x128xf32>,
    %c0_49 = arith.constant 0 : index
    %c128_50 = arith.constant 128 : index
    %81 = vector.load %arg10[%c0_49, %c128_50] : memref<128x256xf32, #tpu.memory_space<vmem>>, vector<128x128xf32>
    %82 = arith.mulf %74, %81 : vector<128x128xf32>
    %cst_51 = arith.constant 0.000000e+00 : f32
    %83 = vector.broadcast %cst_51 : f32 to vector<128x128xf32>
    %84 = arith.subf %83, %82 : vector<128x128xf32>
    %85 = tpu.transpose %84, [1, 0] : vector<128x128xf32> -> vector<128x128xf32>
    %c0_52 = arith.constant 0 : index
    %c0_53 = arith.constant 0 : index
    %c0_54 = arith.constant 0 : index
    %c0_55 = arith.constant 0 : index
    %86 = vector.load %arg9[%c0_52, %c0_53, %c0_54, %c0_55] : memref<1x2x128x128xf32, #tpu.memory_space<vmem>>, vector<1x1x128x128xf32>
    %87 = vector.shape_cast %86 : vector<1x1x128x128xf32> to vector<128x128xf32>
    %88 = vector.shape_cast %85 : vector<128x128xf32> to vector<1x1x128x128xf32>
    tpu.vector_store %arg9[%c0_52, %c0_53, %c0_54, %c0_55], %88 {strides = array<i32>} : memref<1x2x128x128xf32, #tpu.memory_space<vmem>>, vector<1x1x128x128xf32>,
    %c1_56 = arith.constant 1 : index
    %c0_57 = arith.constant 0 : index
    %c0_58 = arith.constant 0 : index
    %89 = vector.load %arg11[%c1_56, %c0_57, %c0_58] : memref<2x128x128xf32, #tpu.memory_space<vmem>>, vector<1x128x128xf32>
    %90 = vector.shape_cast %89 : vector<1x128x128xf32> to vector<128x128xf32>
    %cst_59 = arith.constant 5.000000e-11 : f32
    %91 = vector.broadcast %cst_59 : f32 to vector<128x128xf32>
    %92 = arith.addf %90, %91 : vector<128x128xf32>
    %93 = arith.mulf %92, %69 : vector<128x128xf32>
    %c0_60 = arith.constant 0 : index
    %c0_61 = arith.constant 0 : index
    %94 = vector.load %arg10[%c0_60, %c0_61] : memref<128x256xf32, #tpu.memory_space<vmem>>, vector<128x128xf32>
    %95 = arith.mulf %93, %94 : vector<128x128xf32>
    %96 = tpu.transpose %95, [1, 0] : vector<128x128xf32> -> vector<128x128xf32>
    %c0_62 = arith.constant 0 : index
    %c1_63 = arith.constant 1 : index
    %c0_64 = arith.constant 0 : index
    %c0_65 = arith.constant 0 : index
    %97 = vector.load %arg8[%c0_62, %c1_63, %c0_64, %c0_65] : memref<1x2x128x128xf32, #tpu.memory_space<vmem>>, vector<1x1x128x128xf32>
    %98 = vector.shape_cast %97 : vector<1x1x128x128xf32> to vector<128x128xf32>
    %99 = vector.shape_cast %96 : vector<128x128xf32> to vector<1x1x128x128xf32>
    tpu.vector_store %arg8[%c0_62, %c1_63, %c0_64, %c0_65], %99 {strides = array<i32>} : memref<1x2x128x128xf32, #tpu.memory_space<vmem>>, vector<1x1x128x128xf32>,
    %c0_66 = arith.constant 0 : index
    %c128_67 = arith.constant 128 : index
    %100 = vector.load %arg10[%c0_66, %c128_67] : memref<128x256xf32, #tpu.memory_space<vmem>>, vector<128x128xf32>
    %101 = arith.mulf %93, %100 : vector<128x128xf32>
    %cst_68 = arith.constant 0.000000e+00 : f32
    %102 = vector.broadcast %cst_68 : f32 to vector<128x128xf32>
    %103 = arith.subf %102, %101 : vector<128x128xf32>
    %104 = tpu.transpose %103, [1, 0] : vector<128x128xf32> -> vector<128x128xf32>
    %c0_69 = arith.constant 0 : index
    %c1_70 = arith.constant 1 : index
    %c0_71 = arith.constant 0 : index
    %c0_72 = arith.constant 0 : index
    %105 = vector.load %arg9[%c0_69, %c1_70, %c0_71, %c0_72] : memref<1x2x128x128xf32, #tpu.memory_space<vmem>>, vector<1x1x128x128xf32>
    %106 = vector.shape_cast %105 : vector<1x1x128x128xf32> to vector<128x128xf32>
    %107 = vector.shape_cast %104 : vector<128x128xf32> to vector<1x1x128x128xf32>
    tpu.vector_store %arg9[%c0_69, %c1_70, %c0_71, %c0_72], %107 {strides = array<i32>} : memref<1x2x128x128xf32, #tpu.memory_space<vmem>>, vector<1x1x128x128xf32>,
    return
  }
  func.func @transform_0(%arg0: i32, %arg1: i32) -> (i32, i32, i32) {
    %c0_i32 = arith.constant 0 : i32
    %c0_i32_0 = arith.constant 0 : i32
    %c0_i32_1 = arith.constant 0 : i32
    return %arg0, %c0_i32, %c0_i32_0 : i32, i32, i32
  }
  func.func @transform_1(%arg0: i32, %arg1: i32) -> (i32, i32, i32) {
    %c0_i32 = arith.constant 0 : i32
    %c0_i32_0 = arith.constant 0 : i32
    %c0_i32_1 = arith.constant 0 : i32
    %c0_i32_2 = arith.constant 0 : i32
    return %c0_i32, %c0_i32_0, %c0_i32_1 : i32, i32, i32
  }
  func.func @transform_2(%arg0: i32, %arg1: i32) -> (i32, i32) {
    %c0_i32 = arith.constant 0 : i32
    %c0_i32_0 = arith.constant 0 : i32
    %c0_i32_1 = arith.constant 0 : i32
    return %c0_i32, %c0_i32_0 : i32, i32
  }
  func.func @transform_3(%arg0: i32, %arg1: i32) -> (i32, i32) {
    %c0_i32 = arith.constant 0 : i32
    %c0_i32_0 = arith.constant 0 : i32
    %c0_i32_1 = arith.constant 0 : i32
    return %c0_i32, %c0_i32_0 : i32, i32
  }
  func.func @transform_4(%arg0: i32, %arg1: i32) -> (i32, i32, i32) {
    %c0_i32 = arith.constant 0 : i32
    %c0_i32_0 = arith.constant 0 : i32
    %c0_i32_1 = arith.constant 0 : i32
    %c0_i32_2 = arith.constant 0 : i32
    return %c0_i32, %c0_i32_0, %c0_i32_1 : i32, i32, i32
  }
  func.func @transform_5(%arg0: i32, %arg1: i32) -> (i32, i32, i32) {
    %c0_i32 = arith.constant 0 : i32
    %c0_i32_0 = arith.constant 0 : i32
    %c0_i32_1 = arith.constant 0 : i32
    %c0_i32_2 = arith.constant 0 : i32
    return %c0_i32, %c0_i32_0, %c0_i32_1 : i32, i32, i32
  }
  func.func @transform_6(%arg0: i32, %arg1: i32) -> (i32, i32, i32, i32) {
    %c0_i32 = arith.constant 0 : i32
    %c0_i32_0 = arith.constant 0 : i32
    %c0_i32_1 = arith.constant 0 : i32
    return %arg0, %c0_i32, %c0_i32_0, %arg1 : i32, i32, i32, i32
  }
  func.func @transform_7(%arg0: i32, %arg1: i32) -> (i32, i32, i32, i32) {
    %c0_i32 = arith.constant 0 : i32
    %c0_i32_0 = arith.constant 0 : i32
    %c0_i32_1 = arith.constant 0 : i32
    return %arg0, %c0_i32, %c0_i32_0, %arg1 : i32, i32, i32, i32
  }
}

</mosaic_0001>

<bundles_post_ra>
// kernel: custom-call.1
= control target key start
LH: loop header
LB: loop body
LE: loop exit
PB: predicated region body
PF: predicated region fallthrough
CT: control target
= control target key end

     0   :  { %s412_s0 = inlined_call_operand.vmem [shape: f32[2,64,17], index: 0, kind: input, shape index: {}]   ;;  %s413_s2 = inlined_call_operand.vmem [shape: c64[2,64,17], index: 2, kind: output, shape index: {}]   ;;  %s414_s1 = inlined_call_operand.vmem [shape: f32[2,64,17], index: 1, kind: input, shape index: {}]  }
   0x1   :  { %v5_v0 = vld [vmem:[%s412_s0] sm:$0xff]  ;;  %v144_v1 = vld [vmem:[%s412_s0 + $0x8] sm:$0xff]  ;;  %v146_v2 = vld [vmem:[%s412_s0 + $0x10] sm:$0xff] }
   0x2   :  { %6 = vst [vmem:[%s413_s2] sm:$0xff] %v5_v0  ;;  %145 = vst [vmem:[%s413_s2 + $0x8] sm:$0xff] %v144_v1  ;;  %v148_v3 = vld [vmem:[%s412_s0 + $0x18] sm:$0xff]  ;;  %v150_v4 = vld [vmem:[%s412_s0 + $0x20] sm:$0xff] }
   0x3   :  { %147 = vst [vmem:[%s413_s2 + $0x10] sm:$0xff] %v146_v2  ;;  %v152_v5 = vld [vmem:[%s412_s0 + $0x28] sm:$0xff]  ;;  %149 = vst [vmem:[%s413_s2 + $0x18] sm:$0xff] %v148_v3  ;;  %v154_v6 = vld [vmem:[%s412_s0 + $0x30] sm:$0xff] }
   0x4   :  { %151 = vst [vmem:[%s413_s2 + $0x20] sm:$0xff] %v150_v4  ;;  %153 = vst [vmem:[%s413_s2 + $0x28] sm:$0xff] %v152_v5  ;;  %v156_v7 = vld [vmem:[%s412_s0 + $0x38] sm:$0xff]  ;;  %v158_v8 = vld [vmem:[%s412_s0 + $0x40] sm:$0xff] }
   0x5   :  { %155 = vst [vmem:[%s413_s2 + $0x30] sm:$0xff] %v154_v6  ;;  %157 = vst [vmem:[%s413_s2 + $0x38] sm:$0xff] %v156_v7  ;;  %v160_v9 = vld [vmem:[%s412_s0 + $0x48] sm:$0xff]  ;;  %v162_v10 = vld [vmem:[%s412_s0 + $0x50] sm:$0xff] }
   0x6   :  { %159 = vst [vmem:[%s413_s2 + $0x40] sm:$0xff] %v158_v8  ;;  %v164_v11 = vld [vmem:[%s412_s0 + $0x58] sm:$0xff]  ;;  %161 = vst [vmem:[%s413_s2 + $0x48] sm:$0xff] %v160_v9  ;;  %v166_v12 = vld [vmem:[%s412_s0 + $0x60] sm:$0xff] }
   0x7   :  { %163 = vst [vmem:[%s413_s2 + $0x50] sm:$0xff] %v162_v10  ;;  %165 = vst [vmem:[%s413_s2 + $0x58] sm:$0xff] %v164_v11  ;;  %v168_v13 = vld [vmem:[%s412_s0 + $0x68] sm:$0xff]  ;;  %v170_v14 = vld [vmem:[%s412_s0 + $0x70] sm:$0xff] }
   0x8   :  { %167 = vst [vmem:[%s413_s2 + $0x60] sm:$0xff] %v166_v12  ;;  %169 = vst [vmem:[%s413_s2 + $0x68] sm:$0xff] %v168_v13  ;;  %v172_v15 = vld [vmem:[%s412_s0 + $0x78] sm:$0xff]  ;;  %v67_v16 = vld [vmem:[%s414_s1] sm:$0xff] }
   0x9   :  { %171 = vst [vmem:[%s413_s2 + $0x70] sm:$0xff] %v170_v14  ;;  %v175_v17 = vld [vmem:[%s414_s1 + $0x8] sm:$0xff]  ;;  %173 = vst [vmem:[%s413_s2 + $0x78] sm:$0xff] %v172_v15  ;;  %v177_v18 = vld [vmem:[%s414_s1 + $0x10] sm:$0xff] }
   0xa   :  { %174 = vst [vmem:[%s413_s2 + $0x80] sm:$0xff] %v67_v16  ;;  %176 = vst [vmem:[%s413_s2 + $0x88] sm:$0xff] %v175_v17  ;;  %v179_v19 = vld [vmem:[%s414_s1 + $0x18] sm:$0xff]  ;;  %v181_v20 = vld [vmem:[%s414_s1 + $0x20] sm:$0xff] }
   0xb   :  { %178 = vst [vmem:[%s413_s2 + $0x90] sm:$0xff] %v177_v18  ;;  %180 = vst [vmem:[%s413_s2 + $0x98] sm:$0xff] %v179_v19  ;;  %v183_v21 = vld [vmem:[%s414_s1 + $0x28] sm:$0xff]  ;;  %v185_v22 = vld [vmem:[%s414_s1 + $0x30] sm:$0xff] }
   0xc   :  { %182 = vst [vmem:[%s413_s2 + $0xa0] sm:$0xff] %v181_v20  ;;  %v187_v23 = vld [vmem:[%s414_s1 + $0x38] sm:$0xff]  ;;  %184 = vst [vmem:[%s413_s2 + $0xa8] sm:$0xff] %v183_v21  ;;  %v189_v24 = vld [vmem:[%s414_s1 + $0x40] sm:$0xff] }
   0xd   :  { %186 = vst [vmem:[%s413_s2 + $0xb0] sm:$0xff] %v185_v22  ;;  %188 = vst [vmem:[%s413_s2 + $0xb8] sm:$0xff] %v187_v23  ;;  %v191_v25 = vld [vmem:[%s414_s1 + $0x48] sm:$0xff]  ;;  %v193_v26 = vld [vmem:[%s414_s1 + $0x50] sm:$0xff] }
   0xe   :  { %190 = vst [vmem:[%s413_s2 + $0xc0] sm:$0xff] %v189_v24  ;;  %192 = vst [vmem:[%s413_s2 + $0xc8] sm:$0xff] %v191_v25  ;;  %v195_v27 = vld [vmem:[%s414_s1 + $0x58] sm:$0xff]  ;;  %v197_v28 = vld [vmem:[%s414_s1 + $0x60] sm:$0xff] }
   0xf   :  { %194 = vst [vmem:[%s413_s2 + $0xd0] sm:$0xff] %v193_v26  ;;  %v199_v29 = vld [vmem:[%s414_s1 + $0x68] sm:$0xff]  ;;  %196 = vst [vmem:[%s413_s2 + $0xd8] sm:$0xff] %v195_v27  ;;  %v201_v30 = vld [vmem:[%s414_s1 + $0x70] sm:$0xff] }
  0x10   :  { %198 = vst [vmem:[%s413_s2 + $0xe0] sm:$0xff] %v197_v28  ;;  %200 = vst [vmem:[%s413_s2 + $0xe8] sm:$0xff] %v199_v29  ;;  %v203_v31 = vld [vmem:[%s414_s1 + $0x78] sm:$0xff] }
  0x11   :  { %202 = vst [vmem:[%s413_s2 + $0xf0] sm:$0xff] %v201_v30  ;;  %204 = vst [vmem:[%s413_s2 + $0xf8] sm:$0xff] %v203_v31 }

// kernel: splitter_forward.1
= control target key start
LH: loop header
LB: loop body
LE: loop exit
PB: predicated region body
PF: predicated region fallthrough
CT: control target
= control target key end

     0   :  { %s5164_s0 = inlined_call_operand.hbm [shape: f32[2,136,64], index: 0, kind: input, shape index: {}]   ;;  %s5165_s1 = inlined_call_operand.hbm [shape: bf16[1,256,256], index: 1, kind: input, shape index: {}]   ;;  %s5166_s2 = inlined_call_operand.hbm [shape: bf16[128,256], index: 2, kind: input, shape index: {}]   ;;  %s5167_s3 = inlined_call_operand.hbm [shape: f32[1,256], index: 3, kind: input, shape index: {}]   ;;  %s5168_s4 = inlined_call_operand.hbm [shape: bf16[2,128,128], index: 4, kind: input, shape index: {}]   ;;  %s5169_s5 = inlined_call_operand.hbm [shape: f32[2,1,128], index: 5, kind: input, shape index: {}]   ;;  %s5170_s6 = inlined_call_operand.hbm [shape: f32[2,2,128,128], index: 6, kind: output, shape index: {0}]   ;;  %s5171_s7 = inlined_call_operand.hbm [shape: f32[2,2,128,128], index: 7, kind: output, shape index: {1}]  }
   0x1   :  { %5210 = sst [smem:[#allocation39_spill]] %s5165_s1 }
   0x2   :  { %5211 = sst [smem:[#allocation40_spill]] %s5166_s2 }
   0x3   :  { %5212 = sst [smem:[#allocation41_spill]] %s5171_s7 }
   0x4   :  { %13 = vsyncpa [#allocation5], 0 }
   0x5   :  { %15 = vsyncpa [#allocation5 + $0x1], 0 }
   0x6   :  { %16 = vsyncpa [#allocation8], 0 }
   0x7   :  { %17 = vsyncpa [#allocation11], 0 }
   0x8   :  { %18 = vsyncpa [#allocation14], 0 }
   0x9   :  { %19 = vsyncpa [#allocation6], 0 }
   0xa   :  { %21 = vsyncpa [#allocation6 + $0x1], 0 }
   0xb   :  { %22 = vsyncpa [#allocation17], 0 }
   0xc   :  { %24 = vsyncpa [#allocation17 + $0x1], 0  ;;  %s3851_s24 = smov 0   ;;  %s3853_s25 = smov 0  }
   0xd   :  { %s3855_s26 = smov 0   ;;  %s3857_s27 = smov 0  }
   0xe   :  { %s3859_s28 = smov 0   ;;  %s3861_s29 = smov 0  }
   0xf LB: > { %s5172_s30 = sadd.s32 4294967295, %s3791_s29   ;;  %p2768_p0 = scmp.ge.s32.totalorder %s3791_s29, 1  ;;  %s3791_s29 = sphi %s3861_s29, %s30_s29   ;;  %s3787_s28 = sphi %s3859_s28, %s5268_s28   ;;  %s3783_s27 = sphi %s3857_s27, %s5267_s27   ;;  %s3779_s26 = sphi %s3855_s26, %s5266_s26   ;;  %s3775_s25 = sphi %s3853_s25, %s5265_s25   ;;  %s3771_s24 = sphi %s3851_s24, %s5264_s24  }
  0x10   : > { %p3885_p1 = scmp.eq.s32.totalorder %s5172_s30, 0  ;;  %p234_p2 = scmp.lt.s32.totalorder %s3791_s29, 3 }
  0x11   : > { %s3793_s10 = smov [#allocation7]   ;;  %s3794_s13 = smov [#allocation10]  }
  0x12   : > { %s5213_s8 = scalar_select %p3885_p1, 1, 0 }
  0x13   : > { %p3890_p3 = pnand %p2768_p0, %p234_p2  ;;  %s246_s11 = sshll.u32 %s3793_s10, 4  ;;  %s3894_s11 = int_to_ptr.vmem [resolvable:$true] %s246_s11 }
  0x14   : > { %s273_s14 = sshll.u32 %s3794_s13, 4  ;;  %s3795_s15 = smov [#allocation9]   ;;  %s3905_s14 = int_to_ptr.vmem [resolvable:$true] %s273_s14 }
  0x15   : > { %s5214_s9 = scalar_select %p3890_p3, 1, 0 }
  0x16   : > { %p3033_p4 = pneg %p3890_p3  ;;  %s3907_s16 = sshll.u32 %s3795_s15, 4  ;;  %s260_s16 = int_to_ptr.vmem [resolvable:$true] %s3907_s16 }
  0x17   : > { %s5216_s1 = sld [smem:[#allocation39_spill]] }
  0x18   : > { %p3901_p6 = pnand %p3033_p4, %p3885_p1 }
  0x1a   : > { %p3917_p8 = pneg %p3901_p6 }
  0x1d   : > { %s3495_s19 = scalar_lea.hbm %s5216_s1, 4096 }
  0x1e   : > { %p3496_p7 = scmp.ne.s32.totalorder %s5216_s1, %s3495_s19  ;;  %p3502_p11 = scmp.lt.u32.totalorder %s3495_s19, %s5216_s1 }
  0x20   : > { %p3498_p9 = pnand %p3917_p8, %p3496_p7 }
  0x22   : > { %p3499_p10 = pneg %p3498_p9 }
  0x24   : > { %p3504_p12 = pnand %p3502_p11, %p3499_p10 }
  0x26   : > { %3507 = shalt.err (!%p3504_p12)
}
  0x27   : > { %s3508_s13 = scalar_lea.vmem %s3894_s11, 4096  ;;  %p3516_p4 = scmp.lt.s32.totalorder %s3894_s11, %s3894_s11 }
  0x28   : > { %p3509_p13 = scmp.ne.s32.totalorder %s3894_s11, %s3508_s13  ;;  %p3517_p5 = scmp.lt.s32.totalorder %s3508_s13, %s3508_s13 }
  0x2a   : > { %p3511_p0 = pnand %p3509_p13, %p3917_p8  ;;  %p3518_p7 = por %p3517_p5, %p3516_p4 }
  0x2c   : > { %p3512_p2 = pneg %p3511_p0 }
  0x2e   : > { %p3519_p9 = pnand %p3518_p7, %p3512_p2 }
  0x30   : > { %3522 = shalt.err (!%p3519_p9)
}
  0x31   : > { %s5177_s15 = smov 128   ;;  %s5178_s17 = smov 8  }
  0x32   : > { %3036 = dma.hbm_to_vmem [thread:$0]  (!%p3901_p6), %s5216_s1, 4096, %s3894_s11, [#allocation8], %s5177_s15, %s5177_s15, %s5178_s17  }
  0x33   : > { %s3523_s23 = scalar_lea.hbm %s5167_s3, 32 }
  0x34   : > { %p3524_p5 = scmp.ne.s32.totalorder %s5167_s3, %s3523_s23  ;;  %p3530_p12 = scmp.lt.u32.totalorder %s3523_s23, %s5167_s3 }
  0x36   : > { %p3526_p10 = pnand %p3524_p5, %p3917_p8 }
  0x38   : > { %p3527_p11 = pneg %p3526_p10 }
  0x3a   : > { %p3532_p13 = pnand %p3530_p12, %p3527_p11 }
  0x3c   : > { %3535 = shalt.err (!%p3532_p13)
}
  0x3d   : > { %s3536_s11 = scalar_lea.vmem %s3905_s14, 32  ;;  %p3544_p7 = scmp.lt.s32.totalorder %s3905_s14, %s3905_s14 }
  0x3e   : > { %p3537_p0 = scmp.ne.s32.totalorder %s3905_s14, %s3536_s11  ;;  %p3545_p9 = scmp.lt.s32.totalorder %s3536_s11, %s3536_s11 }
  0x40   : > { %p3539_p2 = pnand %p3537_p0, %p3917_p8  ;;  %p3546_p5 = por %p3545_p9, %p3544_p7 }
  0x42   : > { %p3540_p4 = pneg %p3539_p2 }
  0x44   : > { %p3547_p10 = pnand %p3546_p5, %p3540_p4 }
  0x46   : > { %3550 = shalt.err (!%p3547_p10)
}
  0x47   : > { %3042 = dma.hbm_to_vmem [thread:$0]  (!%p3901_p6), %s5167_s3, 32, %s3905_s14, [#allocation11]  }
  0x48   : > { %s5218_s2 = sld [smem:[#allocation40_spill]] }
  0x4e   : > { %s3551_s20 = scalar_lea.hbm %s5218_s2, 2048 }
  0x4f   : > { %p3552_p11 = scmp.ne.s32.totalorder %s5218_s2, %s3551_s20  ;;  %p3558_p0 = scmp.lt.u32.totalorder %s3551_s20, %s5218_s2 }
  0x51   : > { %p3554_p12 = pnand %p3552_p11, %p3917_p8 }
  0x53   : > { %p3555_p13 = pneg %p3554_p12 }
  0x55   : > { %p3560_p2 = pnand %p3558_p0, %p3555_p13 }
  0x57   : > { %3563 = shalt.err (!%p3560_p2)
}
  0x58   : > { %s3564_s11 = scalar_lea.vmem %s260_s16, 2048  ;;  %p3572_p5 = scmp.lt.s32.totalorder %s260_s16, %s260_s16 }
  0x59   : > { %p3565_p4 = scmp.ne.s32.totalorder %s260_s16, %s3564_s11  ;;  %p3573_p10 = scmp.lt.s32.totalorder %s3564_s11, %s3564_s11 }
  0x5b   : > { %p3567_p7 = pnand %p3565_p4, %p3917_p8  ;;  %p3574_p3 = por %p3573_p10, %p3572_p5 }
  0x5d   : > { %p3568_p9 = pneg %p3567_p7 }
  0x5f   : > { %p3575_p1 = pnand %p3574_p3, %p3568_p9 }
  0x61   : > { %3578 = shalt.err (!%p3575_p1)
}
  0x62   : > { %3039 = dma.hbm_to_vmem [thread:$0]  (!%p3901_p6), %s5218_s2, 2048, %s260_s16, [#allocation8], %s5177_s15, %s5177_s15, %s5178_s17  }
  0x63   : > { %s3798_s30 = smov [#allocation12]   ;;  %s3579_s21 = scalar_lea.hbm %s5168_s4, 2048 }
  0x64   : > { %s283_s18 = sshll.u32 %s3798_s30, 4  ;;  %p3580_p1 = scmp.ne.s32.totalorder %s5168_s4, %s3579_s21  ;;  %s284_s18 = int_to_ptr.vmem [resolvable:$true] %s283_s18 }
  0x65   : > { %p3586_p12 = scmp.lt.u32.totalorder %s3579_s21, %s5168_s4 }
  0x66   : > { %p3582_p3 = pnand %p3580_p1, %p3917_p8 }
  0x68   : > { %p3583_p11 = pneg %p3582_p3 }
  0x6a   : > { %p3588_p13 = pnand %p3586_p12, %p3583_p11 }
  0x6c   : > { %3591 = shalt.err (!%p3588_p13)
}
  0x6d   : > { %s3592_s16 = scalar_lea.vmem %s284_s18, 2048  ;;  %p3600_p7 = scmp.lt.s32.totalorder %s284_s18, %s284_s18 }
  0x6e   : > { %p3593_p0 = scmp.ne.s32.totalorder %s284_s18, %s3592_s16  ;;  %p3601_p9 = scmp.lt.s32.totalorder %s3592_s16, %s3592_s16 }
  0x70   : > { %p3595_p2 = pnand %p3593_p0, %p3917_p8  ;;  %p3602_p5 = por %p3601_p9, %p3600_p7 }
  0x72   : > { %p3596_p4 = pneg %p3595_p2 }
  0x74   : > { %p3603_p10 = pnand %p3602_p5, %p3596_p4 }
  0x76   : > { %3606 = shalt.err (!%p3603_p10)
}
  0x77   : > { %s3799_s14 = smov 64   ;;  %s3800_s7 = smov 4  }
  0x78   : > { %3045 = dma.hbm_to_vmem [thread:$0]  (!%p3901_p6), %s5168_s4, 2048, %s284_s18, [#allocation11], %s3799_s14, %s3799_s14, %s3800_s7  }
  0x79   : > { %s3801_s20 = smov [#allocation13]   ;;  %s3607_s13 = scalar_lea.hbm %s5169_s5, 32 }
  0x7a   : > { %s296_s21 = sshll.u32 %s3801_s20, 4  ;;  %p3608_p1 = scmp.ne.s32.totalorder %s5169_s5, %s3607_s13  ;;  %s297_s21 = int_to_ptr.vmem [resolvable:$true] %s296_s21 }
  0x7b   : > { %p3614_p12 = scmp.lt.u32.totalorder %s3607_s13, %s5169_s5 }
  0x7c   : > { %p3610_p3 = pnand %p3608_p1, %p3917_p8 }
  0x7e   : > { %p3611_p11 = pneg %p3610_p3 }
  0x80   : > { %p3616_p13 = pnand %p3614_p12, %p3611_p11 }
  0x82   : > { %3619 = shalt.err (!%p3616_p13)
}
  0x83   : > { %s3620_s18 = scalar_lea.vmem %s297_s21, 32  ;;  %p3628_p7 = scmp.lt.s32.totalorder %s297_s21, %s297_s21 }
  0x84   : > { %p3621_p0 = scmp.ne.s32.totalorder %s297_s21, %s3620_s18  ;;  %p3629_p9 = scmp.lt.s32.totalorder %s3620_s18, %s3620_s18 }
  0x86   : > { %p3623_p2 = pnand %p3621_p0, %p3917_p8  ;;  %p3630_p5 = por %p3629_p9, %p3628_p7 }
  0x88   : > { %p3624_p4 = pneg %p3623_p2 }
  0x8a   : > { %p3631_p10 = pnand %p3630_p5, %p3624_p4 }
  0x8c   : > { %3634 = shalt.err (!%p3631_p10)
}
  0x8d   : > { %s3802_s14 = smov 16   ;;  %s3803_s22 = smov 1  }
  0x8e   : > { %3048 = dma.hbm_to_vmem [thread:$0]  (!%p3901_p6), %s5169_s5, 32, %s297_s21, [#allocation14], %s3802_s14, %s3802_s14, %s3803_s22  }
  0x8f   : > { %s2767_s7 = sadd.s32 4294967294, %s3791_s29   ;;  %s42_s30 = sadd.s32 1, %s3787_s28 }
  0x90   : > { %s49_s19 = sadd.s32 1, %s3779_s26  ;;  %p44_p8 = scmp.ge.s32.totalorder %s42_s30, 2 }
  0x91   : > { %p56_p1 = scmp.ne.s32.totalorder %s3779_s26, %s3775_s25  ;;  %p57_p3 = scmp.eq.s32.totalorder %s3791_s29, 0 }
  0x92   : > { %p62_p11 = scmp.ne.s32.totalorder %s3775_s25, %s3771_s24  ;;  %s5270_s30 = smov (%p44_p8, %s42_s30), 0 }
  0x93   : > { %p4032_p12 = por %p57_p3, %p56_p1  ;;  %p5220_p13 = scmp.ne.s32.totalorder %s5213_s8, 0 }
  0x94   : > { %s46_s21 = ssub.s32 %s3787_s28, %s5270_s30  ;;  %s5222_s23 = sadd.s32 4294967295, %s3791_s29  }
  0x95   : > { %p4038_p6 = por %p5220_p13, %p62_p11  ;;  %p193_p0 = scmp.eq.s32.totalorder %s5222_s23, 1 }
  0x96   : > { %p47_p2 = scmp.eq.s32.totalorder %s46_s21, 0  ;;  %p199_p4 = scmp.eq.s32.totalorder %s2767_s7, 1 }
  0x97   : > { %p4046_p7 = por %p193_p0, %p56_p1  ;;  %p3065_p9 = scmp.lt.s32.totalorder %s3791_s29, 2 }
  0x98   : > { %s4052_s13 = scalar_select %p47_p2, %s3779_s26, %s49_s19  }
  0x99   : > { %s5223_s10 = scalar_select %p4046_p7, 1, 0 }
  0x9a   : > { %p4054_p5 = por %p199_p4, %p62_p11  ;;  %s310_s16 = sand.u32 1, %s3779_s26  }
  0x9b   : > { %s3004_s18 = smul.u32 136, %s310_s16  ;;  %p4062_p10 = pnand %p3065_p9, %p4032_p12 }
  0x9c   : > { %s5224_s11 = scalar_select %p4054_p5, 1, 0 }
  0x9d   : > { %s3005_s14 = smul.u32 2176, %s3787_s28  ;;  %s314_s19 = scalar_lea.vmem [#allocation4], %s3004_s18 }
  0x9e   : > { %s321_s21 = sshll.u32 %s314_s19, 4  ;;  %s4073_s12 = scalar_lea.sflag [#allocation5], %s310_s16  ;;  %s4071_s21 = int_to_ptr.vmem [resolvable:$true] %s321_s21 }
  0x9f   : > { %s4069_s7 = scalar_lea.hbm %s5164_s0, %s3005_s14  ;;  %p3637_p1 = pneg %p4062_p10 }
  0xa0   : > { %s3635_s23 = scalar_lea.hbm %s4069_s7, 2176  ;;  %s3640_s17 = scalar_lea.hbm %s5164_s0, 4352 }
  0xa1   : > { %p3636_p8 = scmp.ne.s32.totalorder %s4069_s7, %s3635_s23  ;;  %p3641_p12 = scmp.lt.u32.totalorder %s4069_s7, %s5164_s0 }
  0xa2   : > { %p3642_p13 = scmp.lt.u32.totalorder %s3640_s17, %s3635_s23  ;;  %p3644_p2 = scmp.lt.u32.totalorder %s3635_s23, %s4069_s7 }
  0xa3   : > { %p3638_p3 = pnand %p3637_p1, %p3636_p8 }
  0xa4   : > { %p3643_p0 = por %p3642_p13, %p3641_p12 }
  0xa5   : > { %p3639_p11 = pneg %p3638_p3 }
  0xa6   : > { %p3645_p4 = por %p3644_p2, %p3643_p0 }
  0xa8   : > { %p3646_p9 = pnand %p3645_p4, %p3639_p11 }
  0xaa   : > { %3649 = shalt.err (!%p3646_p9)
}
  0xab   : > { %s3650_s16 = scalar_lea.vmem %s4071_s21, 2176  ;;  %s3804_s18 = smov [#allocation4]  }
  0xac   : > { %p3651_p8 = scmp.ne.s32.totalorder %s4071_s21, %s3650_s16  ;;  %s3655_s19 = sshll.u32 %s3804_s18, 4  ;;  %s3656_s19 = int_to_ptr.vmem [resolvable:$false] %s3655_s19 }
  0xad   : > { %s3657_s1 = scalar_lea.vmem %s3656_s19, 4352  ;;  %p3658_p7 = scmp.lt.s32.totalorder %s4071_s21, %s3656_s19 }
  0xae   : > { %p3653_p3 = pnand %p3651_p8, %p3637_p1  ;;  %p3659_p12 = scmp.lt.s32.totalorder %s3657_s1, %s3650_s16 }
  0xb0   : > { %p3654_p5 = pneg %p3653_p3  ;;  %p3660_p13 = por %p3659_p12, %p3658_p7 }
  0xb2   : > { %p3661_p0 = pnand %p3660_p13, %p3654_p5 }
  0xb4   : > { %3664 = shalt.err (!%p3661_p0)
}
  0xb5   : > { %s5226_s2 = smov 8   ;;  %s5227_s23 = smov 128  }
  0xb6   : > { %3052 = dma.hbm_to_vmem [thread:$0]  (!%p4062_p10), %s4069_s7, 2176, %s4071_s21, %s4073_s12, %s5227_s23, %s5227_s23, %s5226_s2  }
  0xb7   : > { %p5228_p1 = scmp.ne.s32.totalorder %s5214_s9, 0 }
  0xb9   : > { %333 = sbr.rel (%p5228_p1) target bundleno = 1389 (0x56d), region = 44 }
  0xc0   : > { %s4107_s14 = sand.u32 1, %s3775_s25  }
  0xc1   : > { %s3006_s15 = smul.u32 136, %s4107_s14  ;;  %s336_s17 = scalar_lea.sflag [#allocation5], %s4107_s14 }
  0xc3   : > { %s4111_s16 = scalar_lea.vmem [#allocation4], %s3006_s15 }
  0xc4   : > { %3746 = dma.done.wait (%p4038_p6), %s336_s17, 2176  }
  0xc5   : > { %3748 = vsyncadd (%p4038_p6), %s336_s17, 4294965120  ;;  %p5229_p7 = scmp.ne.s32.totalorder %s5213_s8, 0 }
  0xc7   : > { %3750 = dma.done.wait (%p5229_p7), [#allocation8], 6144  }
  0xc8   : > { %3752 = vsyncadd (%p5229_p7), [#allocation8], 4294961152 }
  0xc9   : > { %3754 = dma.done.wait (%p5229_p7), [#allocation11], 2080  }
  0xca   : > { %3756 = vsyncadd (%p5229_p7), [#allocation11], 4294965216 }
  0xcb   : > { %3758 = dma.done.wait (%p5229_p7), [#allocation14], 32  }
  0xcc   : > { %3760 = vsyncadd (%p5229_p7), [#allocation14], 4294967264  ;;  %v4130_v0 = vld [vmem:[%s4111_s16] sm:$0xff]  ;;  %v4133_v1 = vld [vmem:[%s4111_s16 + $0x8] sm:$0xff]  ;;  %vm564_vm0 = vcmask 1044480   ;;  %vm432_vm1 = vcmask 1046528  }
  0xcd   : > { %v4136_v2 = vld [vmem:[%s4111_s16 + $0x10] sm:$0xff]  ;;  %v565_v3 = vrot.slane %v4130_v0, 3  ;;  %v566_v4 = vrot.slane %v4133_v1, 3  ;;  %v433_v6 = vrot.slane %v4130_v0, 1  ;;  %v4143_v7 = vld [vmem:[%s4111_s16 + $0x18] sm:$0xff]  ;;  %v4146_v8 = vld [vmem:[%s4111_s16 + $0x20] sm:$0xff] }
  0xce   : > { %v568_v5 = vrot.slane %v4136_v2, 3  ;;  %v434_v9 = vrot.slane %v4133_v1, 1  ;;  %v436_v10 = vrot.slane %v4136_v2, 1  ;;  %v570_v11 = vrot.slane %v4143_v7, 3  ;;  %v4157_v17 = vld [vmem:[%s4111_s16 + $0x28] sm:$0xff]  ;;  %v4160_v18 = vld [vmem:[%s4111_s16 + $0x30] sm:$0xff] }
  0xcf   : > { %v572_v12 = vrot.slane %v4146_v8, 3  ;;  %v567_v13 = vsel %vm564_vm0, %v565_v3, %v566_v4  ;;  %v438_v15 = vrot.slane %v4143_v7, 1  ;;  %v440_v16 = vrot.slane %v4146_v8, 1  ;;  %v4166_v23 = vld [vmem:[%s4111_s16 + $0x38] sm:$0xff]  ;;  %v4169_v24 = vld [vmem:[%s4111_s16 + $0x40] sm:$0xff]  ;;  %s3805_s8 = smov 64  }
  0xd0   : > { %v569_v14 = vsel %vm564_vm0, %v566_v4, %v568_v5  ;;  %v435_v20 = vsel %vm432_vm1, %v433_v6, %v434_v9  ;;  %v437_v21 = vsel %vm432_vm1, %v434_v9, %v436_v10  ;;  %v571_v22 = vsel %vm564_vm0, %v568_v5, %v570_v11  ;;  %v4178_v32 = vld [vmem:[%s4111_s16 + $0x48] sm:$0xff]  ;;  %v4181_v33 = vld [vmem:[%s4111_s16 + $0x50] sm:$0xff]  ;;  %v4201_v55 = vld [vmem:[%s4111_s16 + $0x58] sm:$0xff]  ;;  %s2782_s9 = sshll.u32 %s4107_s14, 8  ;;  %s2890_s7 = sshll.u32 %s3783_s27, 12 }
  0xd1   : > { %v3135_v19 = vpack.i.bf16 %v569_v14, %v567_v13  ;;  %v573_v25 = vsel %vm564_vm0, %v570_v11, %v572_v12  ;;  %v439_v26 = vsel %vm432_vm1, %v436_v10, %v438_v15  ;;  %v441_v27 = vsel %vm432_vm1, %v438_v15, %v440_v16  ;;  %v3215_v38 = vld [vmem:[#allocation7 + $0x4] ss:$8 sps:$4 sm:$0xff]   ;;  %v3217_v42 = vld [vmem:[#allocation7] ss:$8 sps:$4 sm:$0xff]   ;;  %v3218_v47 = vld [vmem:[#allocation7 + $0x14] ss:$8 sps:$4 sm:$0xff]   ;;  %s5072_s19 = scalar_lea.hbm %s5170_s6, %s2890_s7 }
  0xd2   : > { %v3140_v28 = vpack.i.bf16 %v437_v21, %v435_v20  ;;  %v3145_v29 = vpack.i.bf16 %v573_v25, %v571_v22  ;;  %v574_v30 = vrot.slane %v4157_v17, 3  ;;  %v576_v31 = vrot.slane %v4160_v18, 3  ;;  %887 = vmatprep.subr.bf16.mxu0 %v3215_v38  ;;  %v3220_v53 = vld [vmem:[#allocation7 + $0x10] ss:$8 sps:$4 sm:$0xff]   ;;  %v3221_v57 = vld [vmem:[#allocation7 + $0x24] ss:$8 sps:$4 sm:$0xff]  }
  0xd3   : > { %3136 = vrot.lane.b32.xlu0 %v3135_v19, %s3805_s8  ;;  %v442_v34 = vrot.slane %v4157_v17, 1  ;;  %v444_v35 = vrot.slane %v4160_v18, 1  ;;  %v578_v36 = vrot.slane %v4166_v23, 3  ;;  %v580_v37 = vrot.slane %v4169_v24, 3  ;;  %888 = vmatpush1.bf16.msra.mxu0 %v3217_v42  ;;  %v4204_v56 = vld [vmem:[%s4111_s16 + $0x60] sm:$0xff]  ;;  %v4216_v6 = vld [vmem:[%s4111_s16 + $0x68] sm:$0xff] }
  0xd4   : > { %3146 = vrot.lane.b32.xlu1 %v3145_v29, %s3805_s8  ;;  %v3150_v39 = vpack.i.bf16 %v441_v27, %v439_v26  ;;  %v575_v40 = vsel %vm564_vm0, %v572_v12, %v574_v30  ;;  %v577_v41 = vsel %vm564_vm0, %v574_v30, %v576_v31  ;;  %v446_v45 = vrot.slane %v4166_v23, 1  ;;  %889 = vmatprep.subr.bf16.mxu0 %v3218_v47  ;;  %v3223_v9 = vld [vmem:[#allocation7 + $0x20] ss:$8 sps:$4 sm:$0xff]   ;;  %v4235_v27 = vld [vmem:[%s4111_s16 + $0x80] sm:$0xff]  ;;  %v3227_v30 = vld [vmem:[#allocation7 + $0x44] ss:$8 sps:$4 sm:$0xff]  }
  0xd5   : > { %v443_v43 = vsel %vm432_vm1, %v440_v16, %v442_v34  ;;  %v445_v44 = vsel %vm432_vm1, %v442_v34, %v444_v35  ;;  %v448_v46 = vrot.slane %v4169_v24, 1  ;;  %v3155_v48 = vpack.i.bf16 %v577_v41, %v575_v40  ;;  %v4220_v11 = vld [vmem:[%s4111_s16 + $0x70] sm:$0xff]  ;;  %v3224_v16 = vld [vmem:[#allocation7 + $0x34] ss:$8 sps:$4 sm:$0xff]   ;;  %s5002_s20 = scalar_lea.vmem [#allocation15], %s2782_s9  ;;  %s5005_s22 = scalar_lea.vmem [#allocation16], %s2782_s9 }
  0xd6   : > { %v579_v49 = vsel %vm564_vm0, %v576_v31, %v578_v36  ;;  %v581_v50 = vsel %vm564_vm0, %v578_v36, %v580_v37  ;;  %v582_v51 = vrot.slane %v4178_v32, 3  ;;  %v584_v52 = vrot.slane %v4181_v33, 3  ;;  %v4228_v20 = vld [vmem:[%s4111_s16 + $0x78] sm:$0xff]  ;;  %s2582_s21 = sshll.u32 %s5002_s20, 4  ;;  %s2599_s1 = sshll.u32 %s5005_s22, 4  ;;  %s5074_s21 = int_to_ptr.vmem [resolvable:$true] %s2582_s21  ;;  %s5084_s1 = int_to_ptr.vmem [resolvable:$true] %s2599_s1 }
  0xd7   : > { %3141 = vrot.lane.b32.xlu0 %v3140_v28, %s3805_s8  ;;  %v3160_v54 = vpack.i.bf16 %v445_v44, %v443_v43  ;;  %v447_v58 = vsel %vm432_vm1, %v444_v35, %v446_v45  ;;  %v449_v59 = vsel %vm432_vm1, %v446_v45, %v448_v46  ;;  %v450_v60 = vrot.slane %v4178_v32, 1  ;;  %890 = vmatpush1.bf16.msra.mxu0 %v3220_v53  ;;  %v3226_v28 = vld [vmem:[#allocation7 + $0x30] ss:$8 sps:$4 sm:$0xff]   ;;  %v3229_v42 = vld [vmem:[#allocation7 + $0x40] ss:$8 sps:$4 sm:$0xff]   ;;  %s5260_s23 = sld [smem:[#allocation41_spill]] }
  0xd8   : > { %3151 = vrot.lane.b32.xlu1 %v3150_v39, %s3805_s8  ;;  %v452_v61 = vrot.slane %v4181_v33, 1  ;;  %v3165_v62 = vpack.i.bf16 %v581_v50, %v579_v49  ;;  %v583_v63 = vsel %vm564_vm0, %v580_v37, %v582_v51  ;;  %v585_v3 = vsel %vm564_vm0, %v582_v51, %v584_v52  ;;  %891 = vmatprep.subr.bf16.mxu0 %v3221_v57  ;;  %v3230_v44 = vld [vmem:[#allocation7 + $0x54] ss:$8 sps:$4 sm:$0xff]   ;;  %s2563_s17 = scalar_lea.sflag [#allocation6], %s4107_s14  ;;  %s3665_s16 = scalar_lea.vmem %s5074_s21, 4096 }
  0xd9   : > { %v586_v4 = vrot.slane %v4201_v55, 3  ;;  %v588_v5 = vrot.slane %v4204_v56, 3  ;;  %v3170_v10 = vpack.i.bf16 %v449_v59, %v447_v58  ;;  %v451_v12 = vsel %vm432_vm1, %v448_v46, %v450_v60  ;;  %v3235_v59 = vld [vmem:[#allocation7 + $0x60] ss:$8 sps:$4 sm:$0xff]   ;;  %p3666_p6 = scmp.ne.s32.totalorder %s5074_s21, %s3665_s16  ;;  %p5261_p5 = scmp.ne.s32.totalorder %s5223_s10, 0 }
  0xda   : > { %v453_v13 = vsel %vm432_vm1, %v450_v60, %v452_v61  ;;  %v454_v14 = vrot.slane %v4201_v55, 1  ;;  %v456_v15 = vrot.slane %v4204_v56, 1  ;;  %v3175_v19 = vpack.i.bf16 %v585_v3, %v583_v63  ;;  %v3238_v63 = vld [vmem:[#allocation7 + $0x70] ss:$8 sps:$4 sm:$0xff]   ;;  %v3239_v3 = vld [vmem:[#allocation7 + $0x84] ss:$8 sps:$4 sm:$0xff]  }
  0xdb   : > { %3156 = vrot.lane.b32.xlu0 %v3155_v48, %s3805_s8  ;;  %v587_v21 = vsel %vm564_vm0, %v584_v52, %v586_v4  ;;  %v589_v22 = vsel %vm564_vm0, %v586_v4, %v588_v5  ;;  %v590_v25 = vrot.slane %v4216_v6, 3  ;;  %v592_v26 = vrot.slane %v4220_v11, 3  ;;  %892 = vmatpush1.bf16.msra.mxu0 %v3223_v9  ;;  %v3232_v52 = vld [vmem:[#allocation7 + $0x50] ss:$8 sps:$4 sm:$0xff]   ;;  %v3241_v4 = vld [vmem:[#allocation7 + $0x80] ss:$8 sps:$4 sm:$0xff]   ;;  %p3667_p10 = pnand %p3666_p6, %p5261_p5 }
  0xdc   : > { %3161 = vrot.lane.b32.xlu1 %v3160_v54, %s3805_s8  ;;  %v3180_v29 = vpack.i.bf16 %v453_v13, %v451_v12  ;;  %v455_v31 = vsel %vm432_vm1, %v452_v61, %v454_v14  ;;  %v457_v34 = vsel %vm432_vm1, %v454_v14, %v456_v15  ;;  %v458_v35 = vrot.slane %v4216_v6, 1  ;;  %893 = vmatprep.subr.bf16.mxu0 %v3224_v16  ;;  %v3233_v54 = vld [vmem:[#allocation7 + $0x64] ss:$8 sps:$4 sm:$0xff]   ;;  %v3236_v61 = vld [vmem:[#allocation7 + $0x74] ss:$8 sps:$4 sm:$0xff]  }
  0xdd   : > { %v460_v36 = vrot.slane %v4220_v11, 1  ;;  %v3185_v37 = vpack.i.bf16 %v589_v22, %v587_v21  ;;  %v591_v38 = vsel %vm564_vm0, %v588_v5, %v590_v25  ;;  %v593_v39 = vsel %vm564_vm0, %v590_v25, %v592_v26  ;;  %v3242_v5 = vld [vmem:[#allocation7 + $0x94] ss:$8 sps:$4 sm:$0xff]   ;;  %v3244_v9 = vld [vmem:[#allocation7 + $0x90] ss:$8 sps:$4 sm:$0xff]   ;;  %s5082_s15 = scalar_lea.hbm %s5260_s23, %s2890_s7  ;;  %p3668_p11 = pneg %p3667_p10 }
  0xde   : > { %v594_v40 = vrot.slane %v4228_v20, 3  ;;  %v596_v41 = vrot.slane %v4235_v27, 3  ;;  %v3190_v43 = vpack.i.bf16 %v457_v34, %v455_v31  ;;  %v459_v45 = vsel %vm432_vm1, %v456_v15, %v458_v35  ;;  %v3247_v12 = vld [vmem:[#allocation7 + $0xa0] ss:$8 sps:$4 sm:$0xff]   ;;  %v3248_v13 = vld [vmem:[#allocation7 + $0xb4] ss:$8 sps:$4 sm:$0xff]  }
  0xdf   : > { %3166 = vrot.lane.b32.xlu0 %v3165_v62, %s3805_s8  ;;  %894 = vmatpush1.bf16.msra.mxu0 %v3226_v28  ;;  %v461_v46 = vsel %vm432_vm1, %v458_v35, %v460_v36  ;;  %v462_v47 = vrot.slane %v4228_v20, 1  ;;  %v464_v48 = vrot.slane %v4235_v27, 1  ;;  %v3195_v49 = vpack.i.bf16 %v593_v39, %v591_v38  ;;  %v3250_v14 = vld [vmem:[#allocation7 + $0xb0] ss:$8 sps:$4 sm:$0xff]   ;;  %v3251_v15 = vld [vmem:[#allocation7 + $0xc4] ss:$8 sps:$4 sm:$0xff]  }
  0xe0   : > { %3171 = vrot.lane.b32.xlu1 %v3170_v10, %s3805_s8  ;;  %895 = vmatprep.subr.bf16.mxu0 %v3227_v30  ;;  %v595_v50 = vsel %vm564_vm0, %v592_v26, %v594_v40  ;;  %v597_v51 = vsel %vm564_vm0, %v594_v40, %v596_v41  ;;  %v3200_v53 = vpack.i.bf16 %v461_v46, %v459_v45  ;;  %v3245_v10 = vld [vmem:[#allocation7 + $0xa4] ss:$8 sps:$4 sm:$0xff]   ;;  %v3253_v16 = vld [vmem:[#allocation7 + $0xc0] ss:$8 sps:$4 sm:$0xff]   ;;  %v3266_v25 = vld [vmem:[#allocation9 + $0x14] ss:$8 sps:$4 sm:$0xff]  }
  0xe1   : > { %v463_v57 = vsel %vm432_vm1, %v460_v36, %v462_v47  ;;  %v465_v58 = vsel %vm432_vm1, %v462_v47, %v464_v48  ;;  %v3205_v60 = vpack.i.bf16 %v597_v51, %v595_v50  ;;  %v3263_v21 = vld [vmem:[#allocation9 + $0x4] ss:$8 sps:$4 sm:$0xff]   ;;  %v3265_v22 = vld [vmem:[#allocation9] ss:$8 sps:$4 sm:$0xff]   ;;  %v3256_v26 = vld [vmem:[#allocation7 + $0xd0] ss:$8 sps:$4 sm:$0xff]  }
  0xe2   : > { %v3210_v62 = vpack.i.bf16 %v465_v58, %v463_v57  ;;  %v3257_v28 = vld [vmem:[#allocation7 + $0xe4] ss:$8 sps:$4 sm:$0xff]   ;;  %1340 = vmatprep.subr.bf16.mxu1 %v3263_v21  ;;  %v3259_v30 = vld [vmem:[#allocation7 + $0xe0] ss:$8 sps:$4 sm:$0xff]   ;;  %v3260_v31 = vld [vmem:[#allocation7 + $0xf4] ss:$8 sps:$4 sm:$0xff]  }
  0xe3   : > { %3176 = vrot.lane.b32.xlu0 %v3175_v19, %s3805_s8  ;;  %896 = vmatpush1.bf16.msra.mxu0 %v3229_v42  ;;  %v3254_v19 = vld [vmem:[#allocation7 + $0xd4] ss:$8 sps:$4 sm:$0xff]   ;;  %v3262_v34 = vld [vmem:[#allocation7 + $0xf0] ss:$8 sps:$4 sm:$0xff]   ;;  %v515_v35 = vrot.slane %v4130_v0, 2  ;;  %v516_v36 = vrot.slane %v4133_v1, 2 }
  0xe4   : > { %3181 = vrot.lane.b32.xlu1 %v3180_v29, %s3805_s8  ;;  %897 = vmatprep.subr.bf16.mxu0 %v3230_v44  ;;  %v3268_v29 = vld [vmem:[#allocation9 + $0x10] ss:$8 sps:$4 sm:$0xff]   ;;  %vm514_vm2 = vcmask 1045504   ;;  %v520_v38 = vrot.slane %v4143_v7, 2  ;;  %v522_v39 = vrot.slane %v4146_v8, 2  ;;  %vm646_vm3 = vcmask 523264  }
  0xe5   : > { %1341 = vmatpush1.bf16.msra.mxu1 %v3265_v22  ;;  %v517_v41 = vsel %vm514_vm2, %v515_v35, %v516_v36  ;;  %v526_v57 = vrot.slane %v4160_v18, 2 }
  0xe6   : > { %1342 = vmatprep.subr.bf16.mxu1 %v3266_v25  ;;  %v523_v47 = vsel %vm514_vm2, %v520_v38, %v522_v39 }
  0xe7   : > { %3186 = vrot.lane.b32.xlu0 %v3185_v37, %s3805_s8  ;;  %898 = vmatpush1.bf16.msra.mxu0 %v3232_v52  ;;  %v518_v37 = vrot.slane %v4136_v2, 2 }
  0xe8   : > { %3191 = vrot.lane.b32.xlu1 %v3190_v43, %s3805_s8  ;;  %899 = vmatprep.subr.bf16.mxu0 %v3233_v54  ;;  %v524_v54 = vrot.slane %v4157_v17, 2 }
  0xe9   : > { %1343 = vmatpush1.bf16.msra.mxu1 %v3268_v29  ;;  %v519_v42 = vsel %vm514_vm2, %v516_v36, %v518_v37  ;;  %v521_v46 = vsel %vm514_vm2, %v518_v37, %v520_v38 }
  0xeb   : > { %3196 = vrot.lane.b32.xlu0 %v3195_v49, %s3805_s8  ;;  %900 = vmatpush1.bf16.msra.mxu0 %v3235_v59 }
  0xec   : > { %3201 = vrot.lane.b32.xlu1 %v3200_v53, %s3805_s8  ;;  %901 = vmatprep.subr.bf16.mxu0 %v3236_v61 }
  0xef   : > { %3206 = vrot.lane.b32.xlu0 %v3205_v60, %s3805_s8  ;;  %902 = vmatpush1.bf16.msra.mxu0 %v3238_v63 }
  0xf0   : > { %3211 = vrot.lane.b32.xlu1 %v3210_v62, %s3805_s8  ;;  %903 = vmatprep.subr.bf16.mxu0 %v3239_v3  ;;  %s3807_s8 = smov [#allocation15]  }
  0xf1   : > { %s3669_s9 = sshll.u32 %s3807_s8, 4  ;;  %s3670_s9 = int_to_ptr.vmem [resolvable:$false] %s3669_s9 }
  0xf2   : > { %s3671_s12 = scalar_lea.vmem %s3670_s9, 8192  ;;  %p3672_p2 = scmp.lt.s32.totalorder %s5074_s21, %s3670_s9 }
  0xf3   : > { %904 = vmatpush1.bf16.msra.mxu0 %v3241_v4  ;;  %p3673_p4 = scmp.lt.s32.totalorder %s3671_s12, %s3665_s16 }
  0xf4   : > { %905 = vmatprep.subr.bf16.mxu0 %v3242_v5 }
  0xf5   : > { %p3674_p9 = por %p3673_p4, %p3672_p2 }
  0xf7   : > { %906 = vmatpush1.bf16.msra.mxu0 %v3244_v9  ;;  %p3675_p8 = pnand %p3674_p9, %p3668_p11 }
  0xf8   : > { %907 = vmatprep.subr.bf16.mxu0 %v3245_v10 }
  0xfb   : > { %908 = vmatpush1.bf16.msra.mxu0 %v3247_v12 }
  0xfc   : > { %909 = vmatprep.subr.bf16.mxu0 %v3248_v13 }
  0xff   : > { %910 = vmatpush1.bf16.msra.mxu0 %v3250_v14 }
 0x100   : > { %911 = vmatprep.subr.bf16.mxu0 %v3251_v15  ;;  %v525_v15 = vsel %vm514_vm2, %v522_v39, %v524_v54 }
 0x103   : > { %912 = vmatpush1.bf16.msra.mxu0 %v3253_v16  ;;  %v527_v16 = vsel %vm514_vm2, %v524_v54, %v526_v57 }
 0x104   : > { %913 = vmatprep.subr.bf16.mxu0 %v3254_v19 }
 0x107   : > { %914 = vmatpush1.bf16.msra.mxu0 %v3256_v26  ;;  %v528_v26 = vrot.slane %v4166_v23, 2 }
 0x108   : > { %915 = vmatprep.subr.bf16.mxu0 %v3257_v28  ;;  %v530_v28 = vrot.slane %v4169_v24, 2 }
 0x10b   : > { %916 = vmatpush1.bf16.msra.mxu0 %v3259_v30 }
 0x10c   : > { %917 = vmatprep.subr.bf16.mxu0 %v3260_v31 }
 0x10f   : > { %918 = vmatpush1.bf16.msra.mxu0 %v3262_v34 }
 0x145   : > { %v3137_v40 = vpop.permute.xlu0 %3136 }
 0x146   : > { %v3139_v43 = vunpack.i.h.bf16 %v3137_v40  ;;  %v3138_v44 = vunpack.i.l.bf16 %v3137_v40  ;;  %v3147_v45 = vpop.permute.xlu1 %3146 }
 0x147   : > { %v3149_v50 = vunpack.i.h.bf16 %v3147_v45  ;;  %v3148_v51 = vunpack.i.l.bf16 %v3147_v45 }
 0x148   : > { %v663_v48 = vsel %vm646_vm3, %v517_v41, %v3138_v44  ;;  %v664_v49 = vsel %vm646_vm3, %v519_v42, %v3139_v43  ;;  %v532_v43 = vrot.slane %v4178_v32, 2  ;;  %v534_v44 = vrot.slane %v4181_v33, 2 }
 0x149   : > { %v3142_v52 = vpop.permute.xlu0 %3141  ;;  %v680_v53 = vpack.c.bf16 %v664_v49, %v663_v48  ;;  %v665_v60 = vsel %vm646_vm3, %v521_v46, %v3148_v51  ;;  %v666_v61 = vsel %vm646_vm3, %v523_v47, %v3149_v50 }
 0x14a   : > { %v3144_v58 = vunpack.i.h.bf16 %v3142_v52  ;;  %v3143_v59 = vunpack.i.l.bf16 %v3142_v52  ;;  %v3152_v62 = vpop.permute.xlu1 %3151  ;;  %v682_v63 = vpack.c.bf16 %v666_v61, %v665_v60  ;;  %v538_v60 = vrot.slane %v4204_v56, 2 }
 0x14b   : > { %919 = vmatprep.mubr.bf16.mxu0 %v680_v53  ;;  %v3154_v5 = vunpack.i.h.bf16 %v3152_v62  ;;  %v3153_v9 = vunpack.i.l.bf16 %v3152_v62 }
 0x14c   : > { %v647_v3 = vsel %vm646_vm3, %v4130_v0, %v3143_v59  ;;  %v648_v4 = vsel %vm646_vm3, %v4133_v1, %v3144_v58  ;;  %v536_v59 = vrot.slane %v4201_v55, 2 }
 0x14d   : > { %v679_v10 = vpack.c.bf16 %v648_v4, %v647_v3  ;;  %v3157_v12 = vpop.permute.xlu0 %3156  ;;  %v649_v19 = vsel %vm646_vm3, %v4136_v2, %v3153_v9  ;;  %v650_v0 = vsel %vm646_vm3, %v4143_v7, %v3154_v5  ;;  %v529_v2 = vsel %vm514_vm2, %v526_v57, %v528_v26 }
 0x14e   : > { %v3159_v13 = vunpack.i.h.bf16 %v3157_v12  ;;  %v3158_v14 = vunpack.i.l.bf16 %v3157_v12  ;;  %v3162_v21 = vpop.permute.xlu1 %3161  ;;  %v681_v29 = vpack.c.bf16 %v650_v0, %v649_v19  ;;  %v531_v7 = vsel %vm514_vm2, %v528_v26, %v530_v28 }
 0x14f   : > { %920 = vmatmul.mubr.bf16.vlgmr.msra.gmra.mrb[0].mxu0 %v679_v10  ;;  %v3164_v30 = vunpack.i.h.bf16 %v3162_v21  ;;  %v3163_v31 = vunpack.i.l.bf16 %v3162_v21  ;;  %v542_v19 = vrot.slane %v4220_v11, 2 }
 0x150   : > { %929 = vmatprep.mubr.bf16.mxu0 %v682_v63  ;;  %v667_v1 = vsel %vm646_vm3, %v525_v15, %v3158_v14  ;;  %v668_v22 = vsel %vm646_vm3, %v527_v16, %v3159_v13  ;;  %v540_v16 = vrot.slane %v4216_v6, 2 }
 0x151   : > { %v3167_v25 = vpop.permute.xlu0 %3166  ;;  %v684_v34 = vpack.c.bf16 %v668_v22, %v667_v1  ;;  %v651_v37 = vsel %vm646_vm3, %v4146_v8, %v3163_v31  ;;  %v652_v38 = vsel %vm646_vm3, %v4157_v17, %v3164_v30  ;;  %v533_v8 = vsel %vm514_vm2, %v530_v28, %v532_v43 }
 0x152   : > { %v3169_v35 = vunpack.i.h.bf16 %v3167_v25  ;;  %v3168_v36 = vunpack.i.l.bf16 %v3167_v25  ;;  %v3172_v39 = vpop.permute.xlu1 %3171  ;;  %v683_v45 = vpack.c.bf16 %v652_v38, %v651_v37  ;;  %v535_v17 = vsel %vm514_vm2, %v532_v43, %v534_v44 }
 0x153   : > { %v3174_v46 = vunpack.i.h.bf16 %v3172_v39  ;;  %v3173_v47 = vunpack.i.l.bf16 %v3172_v39 }
 0x154   : > { %v669_v40 = vsel %vm646_vm3, %v529_v2, %v3168_v36  ;;  %v670_v41 = vsel %vm646_vm3, %v531_v7, %v3169_v35  ;;  %v544_v36 = vrot.slane %v4228_v20, 2  ;;  %v546_v2 = vrot.slane %v4235_v27, 2 }
 0x155   : > { %v3177_v42 = vpop.permute.xlu0 %3176  ;;  %v686_v48 = vpack.c.bf16 %v670_v41, %v669_v40  ;;  %v653_v51 = vsel %vm646_vm3, %v4160_v18, %v3173_v47  ;;  %v654_v52 = vsel %vm646_vm3, %v4166_v23, %v3174_v46  ;;  %v537_v18 = vsel %vm514_vm2, %v534_v44, %v536_v59 }
 0x156   : > { %v3179_v49 = vunpack.i.h.bf16 %v3177_v42  ;;  %v3178_v50 = vunpack.i.l.bf16 %v3177_v42  ;;  %v3182_v53 = vpop.permute.xlu1 %3181  ;;  %v685_v61 = vpack.c.bf16 %v654_v52, %v653_v51  ;;  %v539_v23 = vsel %vm514_vm2, %v536_v59, %v538_v60  ;;  %v3272_v51 = vld [vmem:[#allocation9 + $0x34] ss:$8 sps:$4 sm:$0xff]   ;;  %v3274_v52 = vld [vmem:[#allocation9 + $0x30] ss:$8 sps:$4 sm:$0xff]  }
 0x157   : > { %930 = vmatmul.mubr.bf16.gmra.mrb[4].mxu0 %v681_v29  ;;  %v3184_v62 = vunpack.i.h.bf16 %v3182_v53  ;;  %v3183_v63 = vunpack.i.l.bf16 %v3182_v53  ;;  %v3275_v53 = vld [vmem:[#allocation9 + $0x44] ss:$8 sps:$4 sm:$0xff]   ;;  %v3284_v59 = vld [vmem:[#allocation9 + $0x74] ss:$8 sps:$4 sm:$0xff]  }
 0x158   : > { %939 = vmatprep.mubr.bf16.mxu0 %v684_v34  ;;  %v671_v54 = vsel %vm646_vm3, %v533_v8, %v3178_v50  ;;  %v672_v57 = vsel %vm646_vm3, %v535_v17, %v3179_v49  ;;  %v3271_v17 = vld [vmem:[#allocation9 + $0x20] ss:$8 sps:$4 sm:$0xff]  }
 0x159   : > { %v3187_v58 = vpop.permute.xlu0 %3186  ;;  %v688_v3 = vpack.c.bf16 %v672_v57, %v671_v54  ;;  %v655_v9 = vsel %vm646_vm3, %v4169_v24, %v3183_v63  ;;  %v656_v10 = vsel %vm646_vm3, %v4178_v32, %v3184_v62  ;;  %v541_v24 = vsel %vm514_vm2, %v538_v60, %v540_v16  ;;  %v3277_v54 = vld [vmem:[#allocation9 + $0x40] ss:$8 sps:$4 sm:$0xff]   ;;  %v3278_v57 = vld [vmem:[#allocation9 + $0x54] ss:$8 sps:$4 sm:$0xff]   ;;  %v3286_v60 = vld [vmem:[#allocation9 + $0x70] ss:$8 sps:$4 sm:$0xff]  }
 0x15a   : > { %v3189_v4 = vunpack.i.h.bf16 %v3187_v58  ;;  %v3188_v5 = vunpack.i.l.bf16 %v3187_v58  ;;  %v3192_v12 = vpop.permute.xlu1 %3191  ;;  %v687_v0 = vpack.c.bf16 %v656_v10, %v655_v9  ;;  %v543_v32 = vsel %vm514_vm2, %v540_v16, %v542_v19  ;;  %v3280_v58 = vld [vmem:[#allocation9 + $0x50] ss:$8 sps:$4 sm:$0xff]   ;;  %v4344_v62 = vld [vmem:[#allocation12] sm:$0xff]  }
 0x15b   : > { %v3194_v21 = vunpack.i.h.bf16 %v3192_v12  ;;  %v3193_v1 = vunpack.i.l.bf16 %v3192_v12  ;;  %v4346_v63 = vld [vmem:[#allocation12 + $0x40] sm:$0xff]  }
 0x15c   : > { %v673_v13 = vsel %vm646_vm3, %v537_v18, %v3188_v5  ;;  %v674_v14 = vsel %vm646_vm3, %v539_v23, %v3189_v4  ;;  %2956 = vmatprep.subr.bf16.mxu0 %v4346_v63  ;;  %v4354_v4 = vld [vmem:[#allocation12 + $0x50] sm:$0xff]   ;;  %v4358_v5 = vld [vmem:[#allocation12 + $0x58] sm:$0xff]  }
 0x15d   : > { %v3197_v15 = vpop.permute.xlu0 %3196  ;;  %v690_v22 = vpack.c.bf16 %v674_v14, %v673_v13  ;;  %v657_v28 = vsel %vm646_vm3, %v4181_v33, %v3193_v1  ;;  %v658_v29 = vsel %vm646_vm3, %v4201_v55, %v3194_v21  ;;  %v545_v33 = vsel %vm514_vm2, %v542_v19, %v544_v36  ;;  %2957 = vmatpush3.bf16.msra.mxu0 %v4346_v63 }
 0x15e   : > { %v3199_v25 = vunpack.i.h.bf16 %v3197_v15  ;;  %v3198_v26 = vunpack.i.l.bf16 %v3197_v15  ;;  %v3202_v30 = vpop.permute.xlu1 %3201  ;;  %v689_v7 = vpack.c.bf16 %v658_v29, %v657_v28  ;;  %v547_v55 = vsel %vm514_vm2, %v544_v36, %v546_v2 }
 0x15f   : > { %940 = vmatmul.mubr.bf16.gmra.mrb[8].mxu0 %v683_v45  ;;  %v3204_v37 = vunpack.i.h.bf16 %v3202_v30  ;;  %v3203_v38 = vunpack.i.l.bf16 %v3202_v30 }
 0x160   : > { %949 = vmatprep.mubr.bf16.mxu0 %v686_v48  ;;  %v675_v31 = vsel %vm646_vm3, %v541_v24, %v3198_v26  ;;  %v676_v34 = vsel %vm646_vm3, %v543_v32, %v3199_v25 }
 0x161   : > { %v3207_v35 = vpop.permute.xlu0 %3206  ;;  %v692_v39 = vpack.c.bf16 %v676_v34, %v675_v31  ;;  %v659_v42 = vsel %vm646_vm3, %v4204_v56, %v3203_v38  ;;  %v660_v43 = vsel %vm646_vm3, %v4216_v6, %v3204_v37  ;;  %v3269_v6 = vld [vmem:[#allocation9 + $0x24] ss:$8 sps:$4 sm:$0xff]  }
 0x162   : > { %v3209_v40 = vunpack.i.h.bf16 %v3207_v35  ;;  %v3208_v41 = vunpack.i.l.bf16 %v3207_v35  ;;  %v3212_v44 = vpop.permute.xlu1 %3211  ;;  %v691_v46 = vpack.c.bf16 %v660_v43, %v659_v42  ;;  %1344 = vmatprep.subr.bf16.mxu1 %v3269_v6 }
 0x163   : > { %v3214_v47 = vunpack.i.h.bf16 %v3212_v44  ;;  %v3213_v48 = vunpack.i.l.bf16 %v3212_v44  ;;  %1345 = vmatpush1.bf16.msra.mxu1 %v3271_v17 }
 0x164   : > { %v677_v27 = vsel %vm646_vm3, %v545_v33, %v3208_v41  ;;  %v678_v45 = vsel %vm646_vm3, %v547_v55, %v3209_v40  ;;  %1346 = vmatprep.subr.bf16.mxu1 %v3272_v51 }
 0x165   : > { %v694_v49 = vpack.c.bf16 %v678_v45, %v677_v27  ;;  %v661_v50 = vsel %vm646_vm3, %v4220_v11, %v3213_v48  ;;  %v662_v56 = vsel %vm646_vm3, %v4228_v20, %v3214_v47  ;;  %v3281_v11 = vld [vmem:[#allocation9 + $0x64] ss:$8 sps:$4 sm:$0xff]   ;;  %v3283_v20 = vld [vmem:[#allocation9 + $0x60] ss:$8 sps:$4 sm:$0xff]  }
 0x166   : > { %v693_v8 = vpack.c.bf16 %v662_v56, %v661_v50  ;;  %v3289_v48 = vld [vmem:[#allocation12 + $0x8] sm:$0xff]  }
 0x167   : > { %950 = vmatmul.mubr.bf16.gmra.mrb[12].mxu0 %v685_v61  ;;  %1347 = vmatpush1.bf16.msra.mxu1 %v3274_v52  ;;  %v3806_v61 = vmov 0  }
 0x168   : > { %959 = vmatprep.mubr.bf16.mxu0 %v688_v3  ;;  %1348 = vmatprep.subr.bf16.mxu1 %v3275_v53  ;;  %v4348_v3 = vld [vmem:[#allocation12 + $0x48] sm:$0xff]  }
 0x169   : > { %1372 = vmatprep.mubr.bf16.mxu1 %v3806_v61  ;;  %2958 = vmatprep.subr.bf16.mxu0 %v4348_v3 }
 0x16a   : > { %2959 = vmatpush3.bf16.msra.mxu0 %v4348_v3 }
 0x16b   : > { %1349 = vmatpush1.bf16.msra.mxu1 %v3277_v54  ;;  %2960 = vmatprep.subr.bf16.mxu0 %v4354_v4 }
 0x16c   : > { %1350 = vmatprep.subr.bf16.mxu1 %v3278_v57 }
 0x16e   : > { %2961 = vmatpush3.bf16.msra.mxu0 %v4354_v4 }
 0x16f   : > { %960 = vmatmul.mubr.bf16.gmra.mrb[16].mxu0 %v687_v0  ;;  %1351 = vmatpush1.bf16.msra.mxu1 %v3280_v58 }
 0x170   : > { %969 = vmatprep.mubr.bf16.mxu0 %v690_v22  ;;  %1352 = vmatprep.subr.bf16.mxu1 %v3281_v11 }
 0x171   : > { %2962 = vmatprep.subr.bf16.mxu0 %v4358_v5 }
 0x172   : > { %2963 = vmatpush3.bf16.msra.mxu0 %v4358_v5 }
 0x173   : > { %1353 = vmatpush1.bf16.msra.mxu1 %v3283_v20  ;;  %v3291_v20 = vld [vmem:[#allocation12 + $0x10] sm:$0xff]  }
 0x174   : > { %1354 = vmatprep.subr.bf16.mxu1 %v3284_v59 }
 0x177   : > { %970 = vmatmul.mubr.bf16.gmra.mrb[20].mxu0 %v689_v7  ;;  %1355 = vmatpush1.bf16.msra.mxu1 %v3286_v60 }
 0x178   : > { %979 = vmatprep.mubr.bf16.mxu0 %v692_v39  ;;  %2924 = vmatprep.subr.bf16.mxu1 %v4344_v62 }
 0x17f   : > { %980 = vmatmul.mubr.bf16.gmra.mrb[24].mxu0 %v691_v46 }
 0x180   : > { %989 = vmatprep.mubr.bf16.mxu0 %v694_v49 }
 0x187   : > { %990 = vmatmul.mubr.bf16.gmra.mrb[28].mxu0 %v693_v8 }
 0x222   : > { %v4363_v18 = vpop.f32.mrb[0].mxu0 }
 0x223   : > { %v1064_v23 = vmul.f32 %v4363_v18, %v4363_v18  ;;  %v4367_v9 = vpop.f32.mrb[1].mxu0 }
 0x224   : > { %v1080_v10 = vmul.f32 %v4367_v9, %v4367_v9  ;;  %v4371_v12 = vpop.f32.mrb[2].mxu0 }
 0x225   : > { %v1065_v13 = vmul.f32 %v4371_v12, %v4371_v12  ;;  %v4375_v14 = vpop.f32.mrb[3].mxu0 }
 0x226   : > { %v1096_v15 = vadd.f32 %v1080_v10, %v1064_v23  ;;  %v1081_v16 = vmul.f32 %v4375_v14, %v4375_v14 }
 0x228   : > { %v1097_v19 = vadd.f32 %v1081_v16, %v1065_v13  ;;  %3303 = vrsqrt.f32 %v1096_v15  ;;  %vm1114_vm4 = vcmp.eq.f32.partialorder %v1096_v15, inf  ;;  %v1117_v41 = vand.u32 2147483648, %v1096_v15 }
 0x229   : > { %vm1116_vm6 = vcmp.eq.f32.partialorder %v1096_v15, 0.0 }
 0x22a   : > { %v4379_v0 = vpop.f32.mrb[4].mxu0  ;;  %3305 = vrsqrt.f32 %v1097_v19  ;;  %vm1121_vm5 = vcmp.eq.f32.partialorder %v1097_v19, inf  ;;  %v1124_v43 = vand.u32 2147483648, %v1097_v19  ;;  %vm1123_vm7 = vcmp.eq.f32.partialorder %v1097_v19, 0.0 }
 0x22b   : > { %v1066_v21 = vmul.f32 %v4379_v0, %v4379_v0  ;;  %v4383_v1 = vpop.f32.mrb[5].mxu0 }
 0x22c   : > { %v1082_v22 = vmul.f32 %v4383_v1, %v4383_v1  ;;  %v4387_v25 = vpop.f32.mrb[6].mxu0 }
 0x22d   : > { %v1067_v26 = vmul.f32 %v4387_v25, %v4387_v25  ;;  %v4391_v24 = vpop.f32.mrb[7].mxu0 }
 0x22e   : > { %v1098_v32 = vadd.f32 %v1082_v22, %v1066_v21  ;;  %v1083_v28 = vmul.f32 %v4391_v24, %v4391_v24 }
 0x230   : > { %v1099_v29 = vadd.f32 %v1083_v28, %v1067_v26  ;;  %3307 = vrsqrt.f32 %v1098_v32  ;;  %vm1128_vm8 = vcmp.eq.f32.partialorder %v1098_v32, inf  ;;  %v1131_v58 = vand.u32 2147483648, %v1098_v32 }
 0x231   : > { %vm1130_vm10 = vcmp.eq.f32.partialorder %v1098_v32, 0.0 }
 0x232   : > { %v3304_v30 = vpop.eup %3303  ;;  %v4395_v31 = vpop.f32.mrb[8].mxu0  ;;  %3309 = vrsqrt.f32 %v1099_v29  ;;  %vm1135_vm9 = vcmp.eq.f32.partialorder %v1099_v29, inf  ;;  %v1138_v23 = vand.u32 2147483648, %v1099_v29  ;;  %vm1137_vm11 = vcmp.eq.f32.partialorder %v1099_v29, 0.0 }
 0x233   : > { %v1068_v34 = vmul.f32 %v4395_v31, %v4395_v31  ;;  %v4399_v35 = vpop.f32.mrb[9].mxu0  ;;  %v1113_v36 = vmul.f32 %v3304_v30, %v1096_v15 }
 0x234   : > { %v3306_v2 = vpop.eup %3305  ;;  %v1084_v7 = vmul.f32 %v4399_v35, %v4399_v35  ;;  %v4403_v37 = vpop.f32.mrb[10].mxu0 }
 0x235   : > { %v1069_v38 = vmul.f32 %v4403_v37, %v4403_v37  ;;  %v4407_v39 = vpop.f32.mrb[11].mxu0  ;;  %v1115_v40 = vsel %vm1114_vm4, %v1096_v15, %v1113_v36  ;;  %v1120_v33 = vmul.f32 %v3306_v2, %v1097_v19 }
 0x236   : > { %v4409_v55 = vadd.f32 %v1084_v7, %v1068_v34  ;;  %v1085_v42 = vmul.f32 %v4407_v39, %v4407_v39  ;;  %v1118_v45 = vsel %vm1116_vm6, %v1117_v41, %v1115_v40 }
 0x237   : > { %v1122_v44 = vsel %vm1121_vm5, %v1097_v19, %v1120_v33  ;;  %v3293_v19 = vld [vmem:[#allocation12 + $0x18] sm:$0xff]  }
 0x238   : > { %v4413_v27 = vadd.f32 %v1085_v42, %v1069_v38  ;;  %v1125_v46 = vsel %vm1123_vm7, %v1124_v43, %v1122_v44  ;;  %3311 = vrsqrt.f32 %v4409_v55  ;;  %vm1142_vm12 = vcmp.eq.f32.partialorder %v4409_v55, inf }
 0x239   : > { %v1224_v47 = vpack.c.bf16 %v1125_v46, %v1118_v45  ;;  %v1145_v38 = vand.u32 2147483648, %v4409_v55  ;;  %vm1144_vm14 = vcmp.eq.f32.partialorder %v4409_v55, 0.0 }
 0x23a   : > { %v3308_v49 = vpop.eup %3307  ;;  %v4416_v50 = vpop.f32.mrb[12].mxu0  ;;  %3313 = vrsqrt.f32 %v4413_v27  ;;  %vm1149_vm13 = vcmp.eq.f32.partialorder %v4413_v27, inf  ;;  %v1152_v42 = vand.u32 2147483648, %v4413_v27  ;;  %vm1151_vm15 = vcmp.eq.f32.partialorder %v4413_v27, 0.0 }
 0x23b   : > { %v1070_v56 = vmul.f32 %v4416_v50, %v4416_v50  ;;  %v4421_v8 = vpop.f32.mrb[13].mxu0  ;;  %1373 = vmatmul.mubr.bf16.vlgmr.msra.gmra.mrb[0].mxu1 %v1224_v47  ;;  %v1127_v6 = vmul.f32 %v3308_v49, %v1098_v32 }
 0x23c   : > { %v3310_v17 = vpop.eup %3309  ;;  %v1086_v51 = vmul.f32 %v4421_v8, %v4421_v8  ;;  %v4425_v52 = vpop.f32.mrb[14].mxu0  ;;  %1382 = vmatprep.mubr.bf16.mxu1 %v3806_v61  ;;  %2925 = vmatpush3.bf16.msra.mxu1 %v4344_v62 }
 0x23d   : > { %v1071_v53 = vmul.f32 %v4425_v52, %v4425_v52  ;;  %v4431_v54 = vpop.f32.mrb[15].mxu0  ;;  %v1129_v57 = vsel %vm1128_vm8, %v1098_v32, %v1127_v6  ;;  %v1134_v11 = vmul.f32 %v3310_v17, %v1099_v29  ;;  %2926 = vmatprep.subr.bf16.mxu1 %v3289_v48 }
 0x23e   : > { %v4433_v59 = vadd.f32 %v1086_v51, %v1070_v56  ;;  %v1087_v60 = vmul.f32 %v4431_v54, %v4431_v54  ;;  %v1132_v13 = vsel %vm1130_vm10, %v1131_v58, %v1129_v57 }
 0x23f   : > { %v1136_v10 = vsel %vm1135_vm9, %v1099_v29, %v1134_v11 }
 0x240   : > { %v4437_v62 = vadd.f32 %v1087_v60, %v1071_v53  ;;  %v1139_v15 = vsel %vm1137_vm11, %v1138_v23, %v1136_v10  ;;  %3315 = vrsqrt.f32 %v4433_v59  ;;  %2927 = vmatpush3.bf16.msra.mxu1 %v3289_v48  ;;  %vm1156_vm0 = vcmp.eq.f32.partialorder %v4433_v59, inf }
 0x241   : > { %v1225_v16 = vpack.c.bf16 %v1139_v15, %v1132_v13  ;;  %2928 = vmatprep.subr.bf16.mxu1 %v3291_v20  ;;  %v1159_v11 = vand.u32 2147483648, %v4433_v59  ;;  %vm1158_vm2 = vcmp.eq.f32.partialorder %v4433_v59, 0.0 }
 0x242   : > { %v3312_v21 = vpop.eup %3311  ;;  %v4440_v22 = vpop.f32.mrb[16].mxu0  ;;  %3317 = vrsqrt.f32 %v4437_v62  ;;  %vm1163_vm1 = vcmp.eq.f32.partialorder %v4437_v62, inf  ;;  %v1166_v10 = vand.u32 2147483648, %v4437_v62  ;;  %vm1165_vm3 = vcmp.eq.f32.partialorder %v4437_v62, 0.0 }
 0x243   : > { %5230 = vst [vmem:[#allocation24_spill] sm:$0xff] %v4440_v22  ;;  %v1072_v26 = vmul.f32 %v4440_v22, %v4440_v22  ;;  %v4445_v32 = vpop.f32.mrb[17].mxu0  ;;  %1383 = vmatmul.mubr.bf16.gmra.mrb[4].mxu1 %v1225_v16  ;;  %v1141_v28 = vmul.f32 %v3312_v21, %v4409_v55 }
 0x244   : > { %5231 = vst [vmem:[#allocation25_spill] sm:$0xff] %v4445_v32  ;;  %v3314_v29 = vpop.eup %3313  ;;  %v1088_v30 = vmul.f32 %v4445_v32, %v4445_v32  ;;  %v4450_v34 = vpop.f32.mrb[18].mxu0  ;;  %1392 = vmatprep.mubr.bf16.mxu1 %v3806_v61  ;;  %2929 = vmatpush3.bf16.msra.mxu1 %v3291_v20 }
 0x245   : > { %5232 = vst [vmem:[#allocation26_spill] sm:$0xff] %v4450_v34  ;;  %v1073_v36 = vmul.f32 %v4450_v34, %v4450_v34  ;;  %v4456_v2 = vpop.f32.mrb[19].mxu0  ;;  %v1143_v7 = vsel %vm1142_vm12, %v4409_v55, %v1141_v28  ;;  %v1148_v40 = vmul.f32 %v3314_v29, %v4413_v27  ;;  %2930 = vmatprep.subr.bf16.mxu1 %v3293_v19 }
 0x246   : > { %5233 = vst [vmem:[#allocation27_spill] sm:$0xff] %v4456_v2  ;;  %v4461_v41 = vadd.f32 %v1088_v30, %v1072_v26  ;;  %v1089_v33 = vmul.f32 %v4456_v2, %v4456_v2  ;;  %v1146_v45 = vsel %vm1144_vm14, %v1145_v38, %v1143_v7 }
 0x247   : > { %v1150_v43 = vsel %vm1149_vm13, %v4413_v27, %v1148_v40 }
 0x248   : > { %v4470_v44 = vadd.f32 %v1089_v33, %v1073_v36  ;;  %v1153_v46 = vsel %vm1151_vm15, %v1152_v42, %v1150_v43  ;;  %3319 = vrsqrt.f32 %v4461_v41  ;;  %2931 = vmatpush3.bf16.msra.mxu1 %v3293_v19  ;;  %vm1170_vm4 = vcmp.eq.f32.partialorder %v4461_v41, inf }
 0x249   : > { %v1226_v47 = vpack.c.bf16 %v1153_v46, %v1146_v45  ;;  %v1173_v42 = vand.u32 2147483648, %v4461_v41  ;;  %vm1172_vm6 = vcmp.eq.f32.partialorder %v4461_v41, 0.0 }
 0x24a   : > { %v3316_v48 = vpop.eup %3315  ;;  %v4473_v49 = vpop.f32.mrb[20].mxu0  ;;  %3321 = vrsqrt.f32 %v4470_v44  ;;  %vm1177_vm5 = vcmp.eq.f32.partialorder %v4470_v44, inf  ;;  %vm1179_vm7 = vcmp.eq.f32.partialorder %v4470_v44, 0.0 }
 0x24b   : > { %v1074_v55 = vmul.f32 %v4473_v49, %v4473_v49  ;;  %v4478_v56 = vpop.f32.mrb[21].mxu0  ;;  %1393 = vmatmul.mubr.bf16.gmra.mrb[8].mxu1 %v1226_v47  ;;  %v1155_v27 = vmul.f32 %v3316_v48, %v4433_v59  ;;  %v1180_v47 = vand.u32 2147483648, %v4470_v44 }
 0x24c   : > { %5234 = vst [vmem:[#allocation28_spill] sm:$0xff] %v4478_v56  ;;  %v3318_v6 = vpop.eup %3317  ;;  %v1090_v17 = vmul.f32 %v4478_v56, %v4478_v56  ;;  %v4483_v51 = vpop.f32.mrb[22].mxu0  ;;  %1402 = vmatprep.mubr.bf16.mxu1 %v3806_v61 }
 0x24d   : > { %5235 = vst [vmem:[#allocation29_spill] sm:$0xff] %v4483_v51  ;;  %v1075_v53 = vmul.f32 %v4483_v51, %v4483_v51  ;;  %v4489_v57 = vpop.f32.mrb[23].mxu0  ;;  %v1157_v58 = vsel %vm1156_vm0, %v4433_v59, %v1155_v27  ;;  %v1162_v20 = vmul.f32 %v3318_v6, %v4437_v62 }
 0x24e   : > { %5236 = vst [vmem:[#allocation30_spill] sm:$0xff] %v4489_v57  ;;  %v4494_v60 = vadd.f32 %v1090_v17, %v1074_v55  ;;  %v1091_v23 = vmul.f32 %v4489_v57, %v4489_v57  ;;  %v1160_v16 = vsel %vm1158_vm2, %v1159_v11, %v1157_v58 }
 0x24f   : > { %v1164_v13 = vsel %vm1163_vm1, %v4437_v62, %v1162_v20 }
 0x250   : > { %v1107_v15 = vadd.f32 %v1091_v23, %v1075_v53  ;;  %v1167_v19 = vsel %vm1165_vm3, %v1166_v10, %v1164_v13  ;;  %3323 = vrsqrt.f32 %v4494_v60  ;;  %vm1184_vm8 = vcmp.eq.f32.partialorder %v4494_v60, inf }
 0x251   : > { %v1227_v21 = vpack.c.bf16 %v1167_v19, %v1160_v16  ;;  %vm1186_vm10 = vcmp.eq.f32.partialorder %v4494_v60, 0.0 }
 0x252   : > { %v3320_v26 = vpop.eup %3319  ;;  %v4504_v28 = vpop.f32.mrb[24].mxu0  ;;  %3325 = vrsqrt.f32 %v1107_v15  ;;  %vm1191_vm9 = vcmp.eq.f32.partialorder %v1107_v15, inf  ;;  %vm1193_vm11 = vcmp.eq.f32.partialorder %v1107_v15, 0.0 }
 0x253   : > { %5237 = vst [vmem:[#allocation31_spill] sm:$0xff] %v4504_v28  ;;  %v1076_v29 = vmul.f32 %v4504_v28, %v4504_v28  ;;  %v4508_v30 = vpop.f32.mrb[25].mxu0  ;;  %1403 = vmatmul.mubr.bf16.gmra.mrb[12].mxu1 %v1227_v21  ;;  %v1169_v59 = vmul.f32 %v3320_v26, %v4461_v41  ;;  %v1187_v21 = vand.u32 2147483648, %v4494_v60 }
 0x254   : > { %5238 = vst [vmem:[#allocation32_spill] sm:$0xff] %v4508_v30  ;;  %v3322_v36 = vpop.eup %3321  ;;  %v1092_v62 = vmul.f32 %v4508_v30, %v4508_v30  ;;  %v4513_v7 = vpop.f32.mrb[26].mxu0  ;;  %1412 = vmatprep.mubr.bf16.mxu1 %v3806_v61 }
 0x255   : > { %5239 = vst [vmem:[#allocation33_spill] sm:$0xff] %v4513_v7  ;;  %v1077_v38 = vmul.f32 %v4513_v7, %v4513_v7  ;;  %v4519_v40 = vpop.f32.mrb[27].mxu0  ;;  %v1171_v33 = vsel %vm1170_vm4, %v4461_v41, %v1169_v59  ;;  %v1176_v43 = vmul.f32 %v3322_v36, %v4470_v44  ;;  %v1194_v36 = vand.u32 2147483648, %v1107_v15 }
 0x256   : > { %5240 = vst [vmem:[#allocation34_spill] sm:$0xff] %v4519_v40  ;;  %v1108_v45 = vadd.f32 %v1092_v62, %v1076_v29  ;;  %v1093_v46 = vmul.f32 %v4519_v40, %v4519_v40  ;;  %v1174_v27 = vsel %vm1172_vm6, %v1173_v42, %v1171_v33 }
 0x257   : > { %v1178_v48 = vsel %vm1177_vm5, %v4470_v44, %v1176_v43 }
 0x258   : > { %v1109_v55 = vadd.f32 %v1093_v46, %v1077_v38  ;;  %v1181_v6 = vsel %vm1179_vm7, %v1180_v47, %v1178_v48  ;;  %3327 = vrsqrt.f32 %v1108_v45  ;;  %vm1198_vm12 = vcmp.eq.f32.partialorder %v1108_v45, inf }
 0x259   : > { %v1228_v17 = vpack.c.bf16 %v1181_v6, %v1174_v27  ;;  %vm1200_vm14 = vcmp.eq.f32.partialorder %v1108_v45, 0.0 }
 0x25a   : > { %v3324_v53 = vpop.eup %3323  ;;  %v4531_v58 = vpop.f32.mrb[28].mxu0  ;;  %3329 = vrsqrt.f32 %v1109_v55  ;;  %vm1205_vm13 = vcmp.eq.f32.partialorder %v1109_v55, inf  ;;  %vm1207_vm15 = vcmp.eq.f32.partialorder %v1109_v55, 0.0 }
 0x25b   : > { %5241 = vst [vmem:[#allocation35_spill] sm:$0xff] %v4531_v58  ;;  %v1078_v11 = vmul.f32 %v4531_v58, %v4531_v58  ;;  %v4535_v20 = vpop.f32.mrb[29].mxu0  ;;  %1413 = vmatmul.mubr.bf16.gmra.mrb[16].mxu1 %v1228_v17  ;;  %v1183_v41 = vmul.f32 %v3324_v53, %v4494_v60  ;;  %v1201_v17 = vand.u32 2147483648, %v1108_v45 }
 0x25c   : > { %5242 = vst [vmem:[#allocation36_spill] sm:$0xff] %v4535_v20  ;;  %v3326_v23 = vpop.eup %3325  ;;  %v1094_v44 = vmul.f32 %v4535_v20, %v4535_v20  ;;  %v4540_v10 = vpop.f32.mrb[30].mxu0  ;;  %1422 = vmatprep.mubr.bf16.mxu1 %v3806_v61 }
 0x25d   : > { %5243 = vst [vmem:[#allocation37_spill] sm:$0xff] %v4540_v10  ;;  %v1079_v13 = vmul.f32 %v4540_v10, %v4540_v10  ;;  %v4546_v16 = vpop.f32.mrb[31].mxu0  ;;  %v1185_v19 = vsel %vm1184_vm8, %v4494_v60, %v1183_v41  ;;  %v1190_v26 = vmul.f32 %v3326_v23, %v1107_v15  ;;  %v1208_v60 = vand.u32 2147483648, %v1109_v55 }
 0x25e   : > { %5244 = vst [vmem:[#allocation38_spill] sm:$0xff] %v4546_v16  ;;  %v1110_v29 = vadd.f32 %v1094_v44, %v1078_v11  ;;  %v1095_v59 = vmul.f32 %v4546_v16, %v4546_v16  ;;  %v1188_v33 = vsel %vm1186_vm10, %v1187_v21, %v1185_v19 }
 0x25f   : > { %v1192_v62 = vsel %vm1191_vm9, %v1107_v15, %v1190_v26 }
 0x260   : > { %v1111_v38 = vadd.f32 %v1095_v59, %v1079_v13  ;;  %v1195_v42 = vsel %vm1193_vm11, %v1194_v36, %v1192_v62  ;;  %3331 = vrsqrt.f32 %v1110_v29  ;;  %vm1212_vm0 = vcmp.eq.f32.partialorder %v1110_v29, inf }
 0x261   : > { %v1229_v43 = vpack.c.bf16 %v1195_v42, %v1188_v33  ;;  %v1215_v26 = vand.u32 2147483648, %v1110_v29  ;;  %vm1214_vm2 = vcmp.eq.f32.partialorder %v1110_v29, 0.0  ;;  %v3295_v33 = vld [vmem:[#allocation12 + $0x20] sm:$0xff]  }
 0x262   : > { %v3328_v46 = vpop.eup %3327  ;;  %3333 = vrsqrt.f32 %v1111_v38  ;;  %vm1219_vm1 = vcmp.eq.f32.partialorder %v1111_v38, inf  ;;  %v1222_v59 = vand.u32 2147483648, %v1111_v38  ;;  %vm1221_vm3 = vcmp.eq.f32.partialorder %v1111_v38, 0.0  ;;  %v4555_v42 = vld [vmem:[#allocation12 + $0x60] sm:$0xff]   ;;  %2932 = vmatprep.subr.bf16.mxu1 %v3295_v33 }
 0x263   : > { %1423 = vmatmul.mubr.bf16.gmra.mrb[20].mxu1 %v1229_v43  ;;  %v1197_v47 = vmul.f32 %v3328_v46, %v1108_v45  ;;  %2964 = vmatprep.subr.bf16.mxu0 %v4555_v42  ;;  %v4559_v43 = vld [vmem:[#allocation12 + $0x68] sm:$0xff]   ;;  %v3301_v46 = vld [vmem:[#allocation12 + $0x38] sm:$0xff]  }
 0x264   : > { %v3330_v48 = vpop.eup %3329  ;;  %1432 = vmatprep.mubr.bf16.mxu1 %v3806_v61  ;;  %2933 = vmatpush3.bf16.msra.mxu1 %v3295_v33 }
 0x265   : > { %v1199_v27 = vsel %vm1198_vm12, %v1108_v45, %v1197_v47  ;;  %v1204_v6 = vmul.f32 %v3330_v48, %v1109_v55  ;;  %2965 = vmatpush3.bf16.msra.mxu0 %v4555_v42  ;;  %v4567_v47 = vld [vmem:[#allocation12 + $0x78] sm:$0xff]   ;;  %v1250_v48 = vlaneseq }
 0x266   : > { %v1202_v53 = vsel %vm1200_vm14, %v1201_v17, %v1199_v27  ;;  %2966 = vmatprep.subr.bf16.mxu0 %v4559_v43  ;;  %v1248_v17 = vld [vmem:[#allocation10] sm:$0x3] }
 0x267   : > { %v1206_v15 = vsel %vm1205_vm13, %v1109_v55, %v1204_v6  ;;  %v1251_v27 = vshrl.u32 %v1250_v48, 7 }
 0x268   : > { %v1209_v11 = vsel %vm1207_vm15, %v1208_v60, %v1206_v15 }
 0x269   : > { %v1230_v41 = vpack.c.bf16 %v1209_v11, %v1202_v53  ;;  %2967 = vmatpush3.bf16.msra.mxu0 %v4559_v43  ;;  %v1252_v6 = vsub.s32 0, %v1251_v27  ;;  %v1256_v60 = vsub.s32 1, %v1251_v27 }
 0x26a   : > { %v3332_v23 = vpop.eup %3331 }
 0x26b   : > { %1433 = vmatmul.mubr.bf16.gmra.mrb[24].mxu1 %v1230_v41  ;;  %v1211_v44 = vmul.f32 %v3332_v23, %v1110_v29  ;;  %v4572_v15 = vrot.slane %v1248_v17, %v1252_v6  ;;  %v4574_v53 = vrot.slane %v1248_v17, %v1256_v60 }
 0x26c   : > { %v3334_v13 = vpop.eup %3333  ;;  %1442 = vmatprep.mubr.bf16.mxu1 %v3806_v61  ;;  %v3297_v61 = vld [vmem:[#allocation12 + $0x28] sm:$0xff]  }
 0x26d   : > { %v1213_v19 = vsel %vm1212_vm0, %v1110_v29, %v1211_v44  ;;  %v1218_v21 = vmul.f32 %v3334_v13, %v1111_v38  ;;  %2934 = vmatprep.subr.bf16.mxu1 %v3297_v61  ;;  %v3299_v29 = vld [vmem:[#allocation12 + $0x30] sm:$0xff]  }
 0x26e   : > { %v1216_v45 = vsel %vm1214_vm2, %v1215_v26, %v1213_v19  ;;  %2935 = vmatpush3.bf16.msra.mxu1 %v3297_v61 }
 0x26f   : > { %v1220_v36 = vsel %vm1219_vm1, %v1111_v38, %v1218_v21  ;;  %v4563_v38 = vld [vmem:[#allocation12 + $0x70] sm:$0xff]   ;;  %2936 = vmatprep.subr.bf16.mxu1 %v3299_v29 }
 0x270   : > { %v1223_v55 = vsel %vm1221_vm3, %v1222_v59, %v1220_v36  ;;  %2968 = vmatprep.subr.bf16.mxu0 %v4563_v38 }
 0x271   : > { %v1231_v62 = vpack.c.bf16 %v1223_v55, %v1216_v45  ;;  %2969 = vmatpush3.bf16.msra.mxu0 %v4563_v38 }
 0x272   : > { %2937 = vmatpush3.bf16.msra.mxu1 %v3299_v29  ;;  %2970 = vmatprep.subr.bf16.mxu0 %v4567_v47 }
 0x273   : > { %1443 = vmatmul.mubr.bf16.gmra.mrb[28].mxu1 %v1231_v62  ;;  %2938 = vmatprep.subr.bf16.mxu1 %v3301_v46 }
 0x275   : > { %2971 = vmatpush3.bf16.msra.mxu0 %v4567_v47 }
 0x276   : > { %2939 = vmatpush3.bf16.msra.mxu1 %v3301_v46 }
 0x277   : > { %2988 = vmatprep.subr.bf16.mxu1 %v4346_v63 }
 0x30e   : > { %v1374_v11 = vpop.f32.mrb[0].mxu1 }
 0x30f   : > { %v1375_v41 = vadd.f32 %v1374_v11, %v4572_v15  ;;  %v1376_v23 = vpop.f32.mrb[1].mxu1 }
 0x310   : > { %v1377_v44 = vadd.f32 %v1376_v23, %v4574_v53  ;;  %v1378_v13 = vpop.f32.mrb[2].mxu1 }
 0x311   : > { %v1379_v19 = vadd.f32 %v1378_v13, %v4572_v15  ;;  %v1380_v21 = vpop.f32.mrb[3].mxu1  ;;  %v1453_v59 = vmax.f32 %v1375_v41, 0.0 }
 0x312   : > { %v1381_v26 = vadd.f32 %v1380_v21, %v4574_v53  ;;  %v1454_v45 = vmax.f32 %v1377_v44, 0.0 }
 0x313   : > { %v1455_v36 = vmax.f32 %v1379_v19, 0.0 }
 0x314   : > { %v1456_v55 = vmax.f32 %v1381_v26, 0.0 }
 0x315   : > { %v1485_v62 = vpack.c.bf16 %v1455_v36, %v1453_v59 }
 0x316   : > { %v1486_v33 = vpack.c.bf16 %v1456_v55, %v1454_v45  ;;  %v1384_v61 = vpop.f32.mrb[4].mxu1 }
 0x317   : > { %v1385_v29 = vadd.f32 %v1384_v61, %v4572_v15  ;;  %v1386_v46 = vpop.f32.mrb[5].mxu1  ;;  %2940 = vmatprep.mubr.bf16.mxu1 %v1485_v62 }
 0x318   : > { %v1387_v48 = vadd.f32 %v1386_v46, %v4574_v53  ;;  %v1388_v27 = vpop.f32.mrb[6].mxu1  ;;  %2972 = vmatprep.mubr.bf16.mxu0 %v1486_v33 }
 0x319   : > { %v1389_v6 = vadd.f32 %v1388_v27, %v4572_v15  ;;  %v1390_v17 = vpop.f32.mrb[7].mxu1  ;;  %v1457_v11 = vmax.f32 %v1385_v29, 0.0 }
 0x31a   : > { %v1391_v60 = vadd.f32 %v1390_v17, %v4574_v53  ;;  %v1458_v23 = vmax.f32 %v1387_v48, 0.0 }
 0x31b   : > { %v1459_v41 = vmax.f32 %v1389_v6, 0.0 }
 0x31c   : > { %v1460_v44 = vmax.f32 %v1391_v60, 0.0 }
 0x31d   : > { %v1487_v13 = vpack.c.bf16 %v1459_v41, %v1457_v11 }
 0x31e   : > { %v1488_v19 = vpack.c.bf16 %v1460_v44, %v1458_v23  ;;  %v1394_v21 = vpop.f32.mrb[8].mxu1 }
 0x31f   : > { %v1395_v26 = vadd.f32 %v1394_v21, %v4572_v15  ;;  %v1396_v59 = vpop.f32.mrb[9].mxu1  ;;  %2941 = vmatmul.mubr.bf16.vlgmr.msra.gmra.mrb[32].mxu1 %v1487_v13 }
 0x320   : > { %v1397_v36 = vadd.f32 %v1396_v59, %v4574_v53  ;;  %v1398_v45 = vpop.f32.mrb[10].mxu1  ;;  %2973 = vmatmul.mubr.bf16.vlgmr.msra.gmra.mrb[32].mxu0 %v1488_v19  ;;  %2996 = vmatpush3.bf16.msra.mxu1 %v4346_v63 }
 0x321   : > { %v1399_v55 = vadd.f32 %v1398_v45, %v4572_v15  ;;  %v1400_v62 = vpop.f32.mrb[11].mxu1  ;;  %2989 = vmatprep.subr.bf16.mxu1 %v4348_v3  ;;  %v1461_v61 = vmax.f32 %v1395_v26, 0.0 }
 0x322   : > { %v1401_v33 = vadd.f32 %v1400_v62, %v4574_v53  ;;  %v1462_v46 = vmax.f32 %v1397_v36, 0.0 }
 0x323   : > { %v1463_v29 = vmax.f32 %v1399_v55, 0.0 }
 0x324   : > { %v1464_v48 = vmax.f32 %v1401_v33, 0.0  ;;  %2997 = vmatpush3.bf16.msra.mxu1 %v4348_v3 }
 0x325   : > { %v1489_v27 = vpack.c.bf16 %v1463_v29, %v1461_v61  ;;  %2990 = vmatprep.subr.bf16.mxu1 %v4354_v4 }
 0x326   : > { %v1490_v6 = vpack.c.bf16 %v1464_v48, %v1462_v46  ;;  %v1404_v17 = vpop.f32.mrb[12].mxu1 }
 0x327   : > { %v1405_v63 = vadd.f32 %v1404_v17, %v4572_v15  ;;  %v1406_v60 = vpop.f32.mrb[13].mxu1  ;;  %2944 = vmatprep.mubr.bf16.mxu1 %v1489_v27 }
 0x328   : > { %v1407_v11 = vadd.f32 %v1406_v60, %v4574_v53  ;;  %v1408_v41 = vpop.f32.mrb[14].mxu1  ;;  %2976 = vmatprep.mubr.bf16.mxu0 %v1490_v6  ;;  %2998 = vmatpush3.bf16.msra.mxu1 %v4354_v4 }
 0x329   : > { %v1409_v23 = vadd.f32 %v1408_v41, %v4572_v15  ;;  %v1410_v44 = vpop.f32.mrb[15].mxu1  ;;  %2991 = vmatprep.subr.bf16.mxu1 %v4358_v5  ;;  %v1465_v13 = vmax.f32 %v1405_v63, 0.0 }
 0x32a   : > { %v1411_v3 = vadd.f32 %v1410_v44, %v4574_v53  ;;  %v1466_v21 = vmax.f32 %v1407_v11, 0.0 }
 0x32b   : > { %v1467_v19 = vmax.f32 %v1409_v23, 0.0 }
 0x32c   : > { %v1468_v26 = vmax.f32 %v1411_v3, 0.0  ;;  %2999 = vmatpush3.bf16.msra.mxu1 %v4358_v5 }
 0x32d   : > { %v1491_v59 = vpack.c.bf16 %v1467_v19, %v1465_v13  ;;  %2992 = vmatprep.subr.bf16.mxu1 %v4555_v42 }
 0x32e   : > { %v1492_v36 = vpack.c.bf16 %v1468_v26, %v1466_v21  ;;  %v1414_v45 = vpop.f32.mrb[16].mxu1 }
 0x32f   : > { %v1415_v4 = vadd.f32 %v1414_v45, %v4572_v15  ;;  %v1416_v55 = vpop.f32.mrb[17].mxu1  ;;  %2945 = vmatmul.mubr.bf16.gmra.mrb[36].mxu1 %v1491_v59 }
 0x330   : > { %v1417_v62 = vadd.f32 %v1416_v55, %v4574_v53  ;;  %v1418_v33 = vpop.f32.mrb[18].mxu1  ;;  %2977 = vmatmul.mubr.bf16.gmra.mrb[36].mxu0 %v1492_v36  ;;  %3000 = vmatpush3.bf16.msra.mxu1 %v4555_v42 }
 0x331   : > { %v1419_v61 = vadd.f32 %v1418_v33, %v4572_v15  ;;  %v1420_v29 = vpop.f32.mrb[19].mxu1  ;;  %2993 = vmatprep.subr.bf16.mxu1 %v4559_v43  ;;  %v1469_v46 = vmax.f32 %v1415_v4, 0.0 }
 0x332   : > { %v1421_v5 = vadd.f32 %v1420_v29, %v4574_v53  ;;  %v1470_v27 = vmax.f32 %v1417_v62, 0.0 }
 0x333   : > { %v1471_v48 = vmax.f32 %v1419_v61, 0.0 }
 0x334   : > { %v1472_v6 = vmax.f32 %v1421_v5, 0.0  ;;  %3001 = vmatpush3.bf16.msra.mxu1 %v4559_v43 }
 0x335   : > { %v1493_v17 = vpack.c.bf16 %v1471_v48, %v1469_v46  ;;  %2994 = vmatprep.subr.bf16.mxu1 %v4563_v38 }
 0x336   : > { %v1494_v63 = vpack.c.bf16 %v1472_v6, %v1470_v27  ;;  %v1424_v60 = vpop.f32.mrb[20].mxu1 }
 0x337   : > { %v1425_v42 = vadd.f32 %v1424_v60, %v4572_v15  ;;  %v1426_v11 = vpop.f32.mrb[21].mxu1  ;;  %2948 = vmatprep.mubr.bf16.mxu1 %v1493_v17 }
 0x338   : > { %v1427_v41 = vadd.f32 %v1426_v11, %v4574_v53  ;;  %v1428_v23 = vpop.f32.mrb[22].mxu1  ;;  %3002 = vmatpush3.bf16.msra.mxu1 %v4563_v38 }
 0x339   : > { %v1429_v44 = vadd.f32 %v1428_v23, %v4572_v15  ;;  %v1430_v3 = vpop.f32.mrb[23].mxu1  ;;  %2995 = vmatprep.subr.bf16.mxu1 %v4567_v47  ;;  %v1473_v13 = vmax.f32 %v1425_v42, 0.0 }
 0x33a   : > { %v1431_v43 = vadd.f32 %v1430_v3, %v4574_v53  ;;  %v1474_v21 = vmax.f32 %v1427_v41, 0.0 }
 0x33b   : > { %v1475_v19 = vmax.f32 %v1429_v44, 0.0 }
 0x33c   : > { %v1476_v26 = vmax.f32 %v1431_v43, 0.0  ;;  %3003 = vmatpush3.bf16.msra.mxu1 %v4567_v47 }
 0x33d   : > { %v1495_v59 = vpack.c.bf16 %v1475_v19, %v1473_v13 }
 0x33e   : > { %v1496_v36 = vpack.c.bf16 %v1476_v26, %v1474_v21  ;;  %v1434_v45 = vpop.f32.mrb[24].mxu1 }
 0x33f   : > { %v1435_v4 = vadd.f32 %v1434_v45, %v4572_v15  ;;  %v1436_v55 = vpop.f32.mrb[25].mxu1  ;;  %2949 = vmatmul.mubr.bf16.gmra.mrb[40].mxu1 %v1495_v59  ;;  %v4623_v45 = vld [vmem:[#allocation13] ss:$0 sm:$0xff] }
 0x340   : > { %v1437_v38 = vadd.f32 %v1436_v55, %v4574_v53  ;;  %v1438_v62 = vpop.f32.mrb[26].mxu1 }
 0x341   : > { %v1439_v33 = vadd.f32 %v1438_v62, %v4572_v15  ;;  %v1440_v61 = vpop.f32.mrb[27].mxu1  ;;  %v1477_v5 = vmax.f32 %v1435_v4, 0.0  ;;  %v4625_v4 = vld [vmem:[#allocation13 + $0x1] ss:$0 sm:$0xff] }
 0x342   : > { %v1441_v29 = vadd.f32 %v1440_v61, %v4574_v53  ;;  %v1478_v48 = vmax.f32 %v1437_v38, 0.0 }
 0x343   : > { %v1479_v46 = vmax.f32 %v1439_v33, 0.0 }
 0x344   : > { %v1480_v27 = vmax.f32 %v1441_v29, 0.0 }
 0x345   : > { %v1497_v47 = vpack.c.bf16 %v1479_v46, %v1477_v5 }
 0x346   : > { %v1498_v6 = vpack.c.bf16 %v1480_v27, %v1478_v48  ;;  %v1444_v17 = vpop.f32.mrb[28].mxu1 }
 0x347   : > { %v1445_v60 = vadd.f32 %v1444_v17, %v4572_v15  ;;  %v1446_v42 = vpop.f32.mrb[29].mxu1  ;;  %2952 = vmatprep.mubr.bf16.mxu1 %v1497_v47 }
 0x348   : > { %v1447_v11 = vadd.f32 %v1446_v42, %v4574_v53  ;;  %v1448_v41 = vpop.f32.mrb[30].mxu1 }
 0x349   : > { %v1449_v23 = vadd.f32 %v1448_v41, %v4572_v15  ;;  %v1450_v44 = vpop.f32.mrb[31].mxu1  ;;  %v1481_v43 = vmax.f32 %v1445_v60, 0.0 }
 0x34a   : > { %v1451_v3 = vadd.f32 %v1450_v44, %v4574_v53  ;;  %v1482_v19 = vmax.f32 %v1447_v11, 0.0 }
 0x34b   : > { %v1483_v13 = vmax.f32 %v1449_v23, 0.0 }
 0x34c   : > { %v1484_v21 = vmax.f32 %v1451_v3, 0.0 }
 0x34d   : > { %v1499_v26 = vpack.c.bf16 %v1483_v13, %v1481_v43 }
 0x34e   : > { %v1500_v59 = vpack.c.bf16 %v1484_v21, %v1482_v19 }
 0x34f   : > { %2953 = vmatmul.mubr.bf16.gmra.mrb[44].mxu1 %v1499_v26 }
 0x350   : > { %2980 = vmatprep.mubr.bf16.mxu1 %v1494_v63 }
 0x357   : > { %2981 = vmatmul.mubr.bf16.vlgmr.msra.gmra.mrb[48].mxu1 %v1496_v36 }
 0x358   : > { %2984 = vmatprep.mubr.bf16.mxu1 %v1498_v6 }
 0x35f   : > { %2985 = vmatmul.mubr.bf16.gmra.mrb[52].mxu1 %v1500_v59 }
 0x3f2   : > { %v2942_v55 = vpop.f32.mrb[32].mxu1 }
 0x3f3   : > { %v1615_v15 = vadd.f32 %v2942_v55, %v4623_v45  ;;  %v1606_v38 = vpop.f32.mrb[33].mxu1  ;;  %v2974_v53 = vpop.f32.mrb[32].mxu0 }
 0x3f4   : > { %v1607_v62 = vadd.f32 %v4623_v45, %v1606_v38  ;;  %v1897_v33 = vadd.f32 %v2974_v53, %v4625_v4  ;;  %v2943_v61 = vpop.f32.mrb[34].mxu1  ;;  %v1888_v29 = vpop.f32.mrb[33].mxu0 }
 0x3f5   : > { %v1671_v5 = vsub.f32 0.0, %v1615_v15  ;;  %v1618_v63 = vadd.f32 %v2943_v61, %v4623_v45  ;;  %v1889_v36 = vadd.f32 %v4625_v4, %v1888_v29  ;;  %v1609_v46 = vpop.f32.mrb[35].mxu1  ;;  %v2975_v48 = vpop.f32.mrb[34].mxu0 }
 0x3f6   : > { %v1669_v27 = vsub.f32 0.0, %v1607_v62  ;;  %v1953_v47 = vsub.f32 0.0, %v1897_v33  ;;  %v1610_v6 = vadd.f32 %v4623_v45, %v1609_v46  ;;  %v1900_v17 = vadd.f32 %v2975_v48, %v4625_v4  ;;  %v1891_v60 = vpop.f32.mrb[35].mxu0 }
 0x3f7   : > { %v1689_v42 = vmul.f32 1.442695, %v1671_v5  ;;  %v1672_v11 = vsub.f32 0.0, %v1618_v63  ;;  %v1951_v41 = vsub.f32 0.0, %v1889_v36  ;;  %v1892_v23 = vadd.f32 %v4625_v4, %v1891_v60 }
 0x3f8   : > { %v1685_v44 = vmul.f32 1.442695, %v1669_v27  ;;  %v1971_v3 = vmul.f32 1.442695, %v1953_v47  ;;  %v1670_v43 = vsub.f32 0.0, %v1610_v6  ;;  %v1954_v13 = vsub.f32 0.0, %v1900_v17 }
 0x3f9   : > { %3335 = vpow2.f32 %v1689_v42  ;;  %v1691_v19 = vmul.f32 1.442695, %v1672_v11  ;;  %v1967_v21 = vmul.f32 1.442695, %v1951_v41  ;;  %v1952_v26 = vsub.f32 0.0, %v1892_v23 }
 0x3fa   : > { %3337 = vpow2.f32 %v1685_v44  ;;  %v1687_v59 = vmul.f32 1.442695, %v1670_v43  ;;  %v1973_v55 = vmul.f32 1.442695, %v1954_v13 }
 0x3fb   : > { %3339 = vpow2.f32 %v1971_v3  ;;  %v1969_v15 = vmul.f32 1.442695, %v1952_v26 }
 0x3fc   : > { %3341 = vpow2.f32 %v1691_v19 }
 0x3fd   : > { %3343 = vpow2.f32 %v1967_v21 }
 0x3fe   : > { %3345 = vpow2.f32 %v1687_v59 }
 0x3ff   : > { %3347 = vpow2.f32 %v1973_v55 }
 0x400   : > { %3349 = vpow2.f32 %v1969_v15 }
 0x402   : > { %v2946_v38 = vpop.f32.mrb[36].mxu1 }
 0x403   : > { %v3336_v53 = vpop.eup %3335  ;;  %v1631_v62 = vadd.f32 %v2946_v38, %v4623_v45  ;;  %v1622_v33 = vpop.f32.mrb[37].mxu1 }
 0x404   : > { %v2978_v61 = vpop.f32.mrb[36].mxu0  ;;  %v3338_v29 = vpop.eup %3337  ;;  %v1719_v5 = vadd.f32 1.0, %v3336_v53  ;;  %v1623_v63 = vadd.f32 %v4623_v45, %v1622_v33 }
 0x405   : > { %v1913_v36 = vadd.f32 %v2978_v61, %v4625_v4  ;;  %v2947_v46 = vpop.f32.mrb[38].mxu1  ;;  %v1904_v48 = vpop.f32.mrb[37].mxu0  ;;  %v1717_v47 = vadd.f32 1.0, %v3338_v29  ;;  %v1675_v6 = vsub.f32 0.0, %v1631_v62 }
 0x406   : > { %v3340_v27 = vpop.eup %3339  ;;  %v1634_v17 = vadd.f32 %v2947_v46, %v4623_v45  ;;  %v1905_v60 = vadd.f32 %v4625_v4, %v1904_v48  ;;  %v1625_v42 = vpop.f32.mrb[39].mxu1  ;;  %3351 = vrcp.f32 %v1719_v5  ;;  %v1673_v13 = vsub.f32 0.0, %v1623_v63 }
 0x407   : > { %v2979_v11 = vpop.f32.mrb[38].mxu0  ;;  %v3342_v41 = vpop.eup %3341  ;;  %v2001_v23 = vadd.f32 1.0, %v3340_v27  ;;  %3353 = vrcp.f32 %v1717_v47  ;;  %v1697_v26 = vmul.f32 1.442695, %v1675_v6  ;;  %v1957_v59 = vsub.f32 0.0, %v1913_v36 }
 0x408   : > { %v1907_v44 = vpop.f32.mrb[39].mxu0  ;;  %v3344_v3 = vpop.eup %3343  ;;  %v1720_v43 = vadd.f32 1.0, %v3342_v41  ;;  %v1676_v38 = vsub.f32 0.0, %v1634_v17  ;;  %v1955_v53 = vsub.f32 0.0, %v1905_v60  ;;  %v1626_v61 = vadd.f32 %v4623_v45, %v1625_v42 }
 0x409   : > { %v3346_v19 = vpop.eup %3345  ;;  %3355 = vrcp.f32 %v2001_v23  ;;  %v1999_v21 = vadd.f32 1.0, %v3344_v3  ;;  %v1916_v29 = vadd.f32 %v2979_v11, %v4625_v4  ;;  %v1693_v63 = vmul.f32 1.442695, %v1673_v13 }
 0x40a   : > { %v3348_v55 = vpop.eup %3347  ;;  %3357 = vrcp.f32 %v1720_v43  ;;  %v1718_v15 = vadd.f32 1.0, %v3346_v19  ;;  %v1908_v46 = vadd.f32 %v4625_v4, %v1907_v44  ;;  %v1979_v48 = vmul.f32 1.442695, %v1957_v59 }
 0x40b   : > { %v3350_v62 = vpop.eup %3349  ;;  %3359 = vrcp.f32 %v1999_v21  ;;  %v2002_v33 = vadd.f32 1.0, %v3348_v55  ;;  %v1674_v36 = vsub.f32 0.0, %v1626_v61  ;;  %v1958_v27 = vsub.f32 0.0, %v1916_v29 }
 0x40c   : > { %3361 = vrcp.f32 %v1718_v15  ;;  %v2000_v5 = vadd.f32 1.0, %v3350_v62  ;;  %v1699_v47 = vmul.f32 1.442695, %v1676_v38  ;;  %v1956_v6 = vsub.f32 0.0, %v1908_v46 }
 0x40d   : > { %3363 = vrcp.f32 %v2002_v33  ;;  %v1975_v17 = vmul.f32 1.442695, %v1955_v53  ;;  %v1695_v60 = vmul.f32 1.442695, %v1674_v36  ;;  %v1981_v42 = vmul.f32 1.442695, %v1958_v27 }
 0x40e   : > { %3365 = vrcp.f32 %v2000_v5  ;;  %v1977_v3 = vmul.f32 1.442695, %v1956_v6 }
 0x40f   : > { %3367 = vpow2.f32 %v1697_v26 }
 0x410   : > { %3369 = vpow2.f32 %v1693_v63  ;;  %v3352_v41 = vpop.eup %3351 }
 0x411   : > { %3371 = vpow2.f32 %v1979_v48  ;;  %v3354_v11 = vpop.eup %3353  ;;  %v4643_v23 = vmul.f32 %v3352_v41, %v3352_v41 }
 0x412   : > { %3373 = vpow2.f32 %v1699_v47  ;;  %v2950_v43 = vpop.f32.mrb[40].mxu1  ;;  %v4646_v59 = vmul.f32 %v3354_v11, %v3354_v11 }
 0x413   : > { %v3356_v44 = vpop.eup %3355  ;;  %3375 = vpow2.f32 %v1975_v17  ;;  %v1647_v21 = vadd.f32 %v2950_v43, %v4623_v45  ;;  %v1638_v26 = vpop.f32.mrb[41].mxu1 }
 0x414   : > { %v3358_v13 = vpop.eup %3357  ;;  %v2033_v19 = vmul.f32 %v3356_v44, %v3356_v44  ;;  %3377 = vpow2.f32 %v1695_v60  ;;  %v2951_v38 = vpop.f32.mrb[42].mxu1 }
 0x415   : > { %v3360_v55 = vpop.eup %3359  ;;  %v4648_v15 = vmul.f32 %v3358_v13, %v3358_v13  ;;  %3379 = vpow2.f32 %v1981_v42  ;;  %v1679_v61 = vsub.f32 0.0, %v1647_v21  ;;  %v1641_v29 = vpop.f32.mrb[43].mxu1 }
 0x416   : > { %v3362_v53 = vpop.eup %3361  ;;  %v2066_v62 = vadd.f32 %v2033_v19, %v4643_v23  ;;  %v4651_v33 = vmul.f32 %v3360_v55, %v3360_v55  ;;  %3381 = vpow2.f32 %v1977_v3  ;;  %v1639_v55 = vadd.f32 %v4623_v45, %v1638_v26 }
 0x417   : > { %v3364_v5 = vpop.eup %3363  ;;  %v4653_v63 = vmul.f32 %v3362_v53, %v3362_v53  ;;  %v1705_v27 = vmul.f32 1.442695, %v1679_v61 }
 0x418   : > { %v3366_v46 = vpop.eup %3365  ;;  %v2082_v48 = vadd.f32 1e-10, %v2066_v62  ;;  %v4655_v36 = vmul.f32 %v3364_v5, %v3364_v5  ;;  %v2064_v47 = vadd.f32 %v4651_v33, %v4646_v59 }
 0x419   : > { %v3368_v6 = vpop.eup %3367  ;;  %v4659_v17 = vmul.f32 %v3366_v46, %v3366_v46 }
 0x41a   : > { %v3370_v60 = vpop.eup %3369  ;;  %3383 = vrcp.f32 %v2082_v48  ;;  %v2067_v41 = vadd.f32 %v4655_v36, %v4648_v15  ;;  %v1723_v42 = vadd.f32 1.0, %v3368_v6  ;;  %v1650_v48 = vadd.f32 %v2951_v38, %v4623_v45 }
 0x41b   : > { %v3372_v11 = vpop.eup %3371  ;;  %v2065_v3 = vadd.f32 %v4659_v17, %v4653_v63  ;;  %v1721_v44 = vadd.f32 1.0, %v3370_v60  ;;  %3385 = vpow2.f32 %v1705_v27  ;;  %v1642_v27 = vadd.f32 %v4623_v45, %v1641_v29 }
 0x41c   : > { %v3374_v43 = vpop.eup %3373  ;;  %v2083_v13 = vadd.f32 1e-10, %v2067_v41  ;;  %3387 = vrcp.f32 %v1723_v42  ;;  %v2005_v21 = vadd.f32 1.0, %v3372_v11  ;;  %v1677_v42 = vsub.f32 0.0, %v1639_v55 }
 0x41d   : > { %v3376_v53 = vpop.eup %3375  ;;  %v2081_v62 = vadd.f32 1e-10, %v2065_v3  ;;  %3389 = vrcp.f32 %v1721_v44  ;;  %v1724_v61 = vadd.f32 1.0, %v3374_v43  ;;  %v1680_v11 = vsub.f32 0.0, %v1650_v48 }
 0x41e   : > { %v3378_v5 = vpop.eup %3377  ;;  %3391 = vrcp.f32 %v2083_v13  ;;  %v2003_v46 = vadd.f32 1.0, %v3376_v53  ;;  %v1678_v3 = vsub.f32 0.0, %v1642_v27  ;;  %v2130_v43 = vadd.f32 5e-11, %v4643_v23 }
 0x41f   : > { %v3380_v6 = vpop.eup %3379  ;;  %3393 = vrcp.f32 %v2081_v62  ;;  %v1722_v40 = vadd.f32 1.0, %v3378_v5  ;;  %v2354_v13 = vadd.f32 5e-11, %v2033_v19  ;;  %v1701_v53 = vmul.f32 1.442695, %v1677_v42 }
 0x420   : > { %v3382_v60 = vpop.eup %3381  ;;  %3395 = vrcp.f32 %v2005_v21  ;;  %v2006_v41 = vadd.f32 1.0, %v3380_v6  ;;  %v1707_v48 = vmul.f32 1.442695, %v1680_v11  ;;  %v1703_v27 = vmul.f32 1.442695, %v1678_v3 }
 0x421   : > { %3397 = vrcp.f32 %v1724_v61  ;;  %v2004_v26 = vadd.f32 1.0, %v3382_v60  ;;  %v2080_v42 = vadd.f32 1e-10, %v2064_v47 }
 0x422   : > { %3399 = vrcp.f32 %v2003_v46  ;;  %v2954_v44 = vpop.f32.mrb[44].mxu1 }
 0x423   : > { %3401 = vrcp.f32 %v1722_v40  ;;  %v1663_v62 = vadd.f32 %v2954_v44, %v4623_v45  ;;  %v1654_v29 = vpop.f32.mrb[45].mxu1 }
 0x424   : > { %v3384_v38 = vpop.eup %3383  ;;  %3403 = vrcp.f32 %v2006_v41  ;;  %v1655_v21 = vadd.f32 %v4623_v45, %v1654_v29  ;;  %v2955_v55 = vpop.f32.mrb[46].mxu1 }
 0x425   : > { %v3386_v5 = vpop.eup %3385  ;;  %3405 = vrcp.f32 %v2004_v26  ;;  %v2146_v61 = vmul.f32 %v3384_v38, %v2130_v43  ;;  %v4671_v46 = vmul.f32 %v3384_v38, %v2354_v13  ;;  %v4674_v6 = vadd.f32 %v2955_v55, %v4623_v45  ;;  %v1657_v23 = vpop.f32.mrb[47].mxu1 }
 0x426   : > { %v3388_v40 = vpop.eup %3387  ;;  %v1683_v60 = vsub.f32 0.0, %v1663_v62  ;;  %v4677_v41 = vadd.f32 %v4623_v45, %v1657_v23  ;;  %v1681_v44 = vsub.f32 0.0, %v1655_v21  ;;  %v2129_v43 = vadd.f32 5e-11, %v4653_v63 }
 0x427   : > { %v3390_v19 = vpop.eup %3389  ;;  %v2131_v13 = vadd.f32 5e-11, %v4648_v15  ;;  %v4685_v11 = vmul.f32 %v3388_v40, %v3388_v40  ;;  %v1727_v29 = vadd.f32 1.0, %v3386_v5  ;;  %3407 = vpow2.f32 %v1701_v53 }
 0x428   : > { %v4679_v26 = vpop.eup %3391  ;;  %v4688_v3 = vmul.f32 %v2146_v61, %v4379_v0  ;;  %v4690_v45 = vmul.f32 %v3390_v19, %v3390_v19  ;;  %3409 = vpow2.f32 %v1707_v48  ;;  %v4694_v21 = vmul.f32 %v2146_v61, %v4383_v1 }
 0x429   : > { %v4683_v38 = vpop.eup %3393  ;;  %3411 = vpow2.f32 %v1703_v27  ;;  %v1713_v55 = vmul.f32 1.442695, %v1683_v60  ;;  %v4699_v53 = vmul.f32 %v4679_v26, %v2131_v13  ;;  %v1709_v23 = vmul.f32 1.442695, %v1681_v44 }
 0x42a   : > { %v3396_v62 = vpop.eup %3395  ;;  %v2145_v47 = vmul.f32 %v4683_v38, %v2129_v43  ;;  %v2982_v40 = vpop.f32.mrb[48].mxu1  ;;  %3413 = vrcp.f32 %v1727_v29  ;;  %v1684_v44 = vsub.f32 0.0, %v4674_v6 }
 0x42b   : > { %v3398_v63 = vpop.eup %3397  ;;  %v4696_v15 = vmul.f32 %v3396_v62, %v3396_v62  ;;  %v1929_v19 = vadd.f32 %v2982_v40, %v4625_v4  ;;  %v1920_v7 = vpop.f32.mrb[49].mxu1  ;;  %3415 = vrcp.f32 %v2080_v42 }
 0x42c   : > { %v3400_v5 = vpop.eup %3399  ;;  %v4703_v48 = vmul.f32 %v2145_v47, %v4371_v12  ;;  %v4707_v62 = vmul.f32 %v3398_v63, %v3398_v63  ;;  %v2983_v60 = vpop.f32.mrb[50].mxu1  ;;  %3417 = vpow2.f32 %v1713_v55  ;;  %v1682_v63 = vsub.f32 0.0, %v4677_v41 }
 0x42d   : > { %v3402_v43 = vpop.eup %3401  ;;  %v2070_v61 = vadd.f32 %v4696_v15, %v4685_v11  ;;  %v4709_v27 = vmul.f32 %v3400_v5, %v3400_v5  ;;  %v1961_v40 = vsub.f32 0.0, %v1929_v19  ;;  %v1923_v10 = vpop.f32.mrb[51].mxu1  ;;  %3419 = vpow2.f32 %v1709_v23 }
 0x42e   : > { %v3404_v13 = vpop.eup %3403  ;;  %v4711_v16 = vmul.f32 %v3402_v43, %v3402_v43  ;;  %v1921_v42 = vadd.f32 %v4625_v4, %v1920_v7  ;;  %v1932_v19 = vadd.f32 %v2983_v60, %v4625_v4  ;;  %v2128_v55 = vadd.f32 5e-11, %v4646_v59 }
 0x42f   : > { %v3406_v30 = vpop.eup %3405  ;;  %v2068_v28 = vadd.f32 %v4709_v27, %v4690_v45  ;;  %v4716_v20 = vmul.f32 %v3404_v13, %v3404_v13  ;;  %v2086_v5 = vadd.f32 1e-10, %v2070_v61  ;;  %v1987_v43 = vmul.f32 1.442695, %v1961_v40 }
 0x430   : > { %v4719_v29 = vmul.f32 %v3406_v30, %v3406_v30  ;;  %v1715_v61 = vmul.f32 1.442695, %v1684_v44  ;;  %v1924_v23 = vadd.f32 %v4625_v4, %v1923_v10  ;;  %v1711_v34 = vmul.f32 1.442695, %v1682_v63 }
 0x431   : > { %v2084_v58 = vadd.f32 1e-10, %v2068_v28  ;;  %v2071_v6 = vadd.f32 %v4716_v20, %v4707_v62  ;;  %3421 = vpow2.f32 %v1987_v43  ;;  %v3408_v41 = vpop.eup %3407  ;;  %v1959_v60 = vsub.f32 0.0, %v1921_v42 }
 0x432   : > { %v2069_v13 = vadd.f32 %v4719_v29, %v4711_v16  ;;  %v2986_v28 = vpop.f32.mrb[52].mxu1  ;;  %v3410_v40 = vpop.eup %3409  ;;  %v1962_v51 = vsub.f32 0.0, %v1932_v19  ;;  %v4730_v32 = vmul.f32 %v2145_v47, %v4375_v14  ;;  %v2352_v10 = vadd.f32 5e-11, %v4651_v33 }
 0x433   : > { %3423 = vrcp.f32 %v2084_v58  ;;  %v2087_v30 = vadd.f32 1e-10, %v2071_v6  ;;  %v1936_v7 = vpop.f32.mrb[53].mxu1  ;;  %v3412_v57 = vpop.eup %3411  ;;  %v1725_v58 = vadd.f32 1.0, %v3408_v41  ;;  %v1945_v44 = vadd.f32 %v2986_v28, %v4625_v4 }
 0x434   : > { %3425 = vrcp.f32 %v2086_v5  ;;  %v2085_v2 = vadd.f32 1e-10, %v2069_v13  ;;  %v2987_v59 = vpop.f32.mrb[54].mxu1  ;;  %v4734_v6 = vpop.eup %3413  ;;  %v1728_v5 = vadd.f32 1.0, %v3410_v40  ;;  %v1960_v63 = vsub.f32 0.0, %v1924_v23 }
 0x435   : > { %3427 = vrcp.f32 %v2087_v30  ;;  %v1939_v43 = vpop.f32.mrb[55].mxu1  ;;  %v1937_v13 = vadd.f32 %v4625_v4, %v1936_v7  ;;  %v3416_v42 = vpop.eup %3415  ;;  %v1726_v19 = vadd.f32 1.0, %v3412_v57  ;;  %v1965_v47 = vsub.f32 0.0, %v1945_v44 }
 0x436   : > { %3429 = vrcp.f32 %v2085_v2  ;;  %v4739_v2 = vmul.f32 %v4699_v53, %v4387_v25  ;;  %v3418_v41 = vpop.eup %3417  ;;  %v2144_v30 = vmul.f32 %v3416_v42, %v2128_v55  ;;  %v1983_v28 = vmul.f32 1.442695, %v1959_v60 }
 0x437   : > { %3431 = vpow2.f32 %v1715_v61  ;;  %v1989_v22 = vmul.f32 1.442695, %v1962_v51  ;;  %v1948_v33 = vadd.f32 %v2987_v59, %v4625_v4  ;;  %v3420_v56 = vpop.eup %3419  ;;  %v1963_v61 = vsub.f32 0.0, %v1937_v13 }
 0x438   : > { %3433 = vpow2.f32 %v1711_v34  ;;  %v1940_v23 = vadd.f32 %v4625_v4, %v1939_v43  ;;  %v4745_v57 = vmul.f32 %v4699_v53, %v4391_v24  ;;  %v2176_v34 = vmul.f32 %v2144_v30, %v4363_v18 }
 0x439   : > { %3435 = vrcp.f32 %v1725_v58  ;;  %v2256_v40 = vmul.f32 %v2144_v30, %v4367_v9  ;;  %v1985_v7 = vmul.f32 1.442695, %v1960_v63  ;;  %v1995_v51 = vmul.f32 1.442695, %v1965_v47 }
 0x43a   : > { %3437 = vrcp.f32 %v1728_v5  ;;  %v1966_v60 = vsub.f32 0.0, %v1948_v33  ;;  %v1964_v59 = vsub.f32 0.0, %v1940_v23  ;;  %2192 = vxpose.xlu0.b32.start [1/16] %v2176_v34, 128  ;;  %v2132_v53 = vadd.f32 5e-11, %v4690_v45 }
 0x43b   : > { %v3422_v55 = vpop.eup %3421  ;;  %3439 = vrcp.f32 %v1726_v19  ;;  %v2272_v58 = vsub.f32 0.0, %v2256_v40  ;;  %v2273_v5 = vsub.f32 0.0, %v4730_v32  ;;  %v1991_v13 = vmul.f32 1.442695, %v1963_v61 }
 0x43c   : > { %v2009_v4 = vadd.f32 1.0, %v3422_v55  ;;  %3441 = vpow2.f32 %v1983_v28  ;;  %v1997_v63 = vmul.f32 1.442695, %v1966_v60  ;;  %v1993_v19 = vmul.f32 1.442695, %v1964_v59 }
 0x43d   : > { %v4749_v44 = vpop.eup %3423  ;;  %3443 = vpow2.f32 %v1989_v22  ;;  %2288 = vxpose.xlu1.b32.start [1/16] %v2272_v58, 128  ;;  %v2133_v33 = vadd.f32 5e-11, %v4711_v16  ;;  %v2134_v45 = vadd.f32 5e-11, %v4685_v11  ;;  %v2135_v22 = vadd.f32 5e-11, %v4707_v62 }
 0x43e   : > { %v4752_v43 = vpop.eup %3425  ;;  %3445 = vrcp.f32 %v2009_v4  ;;  %v2148_v47 = vmul.f32 %v4749_v44, %v2132_v53  ;;  %v2368_v28 = vmul.f32 %v3416_v42, %v2352_v10  ;;  %2193 = vxpose.xlu0.b32.cont [2/16] %v4703_v48, 128  ;;  %v1731_v55 = vadd.f32 1.0, %v3418_v41 }
 0x43f   : > { %v4755_v30 = vpop.eup %3427  ;;  %3447 = vpow2.f32 %v1985_v7  ;;  %v2150_v7 = vmul.f32 %v4752_v43, %v2134_v45  ;;  %v1729_v62 = vadd.f32 1.0, %v3420_v56  ;;  %v2274_v10 = vsub.f32 0.0, %v4694_v21 }
 0x440   : > { %v4759_v23 = vpop.eup %3429  ;;  %3449 = vpow2.f32 %v1995_v51  ;;  %v2180_v61 = vmul.f32 %v2148_v47, %v4395_v31  ;;  %v4766_v34 = vmul.f32 %v2148_v47, %v4399_v35  ;;  %v2151_v11 = vmul.f32 %v4755_v30, %v2135_v22 }
 0x441   : > { %v3432_v32 = vpop.eup %3431  ;;  %v2149_v40 = vmul.f32 %v4759_v23, %v2133_v33  ;;  %3451 = vpow2.f32 %v1991_v13  ;;  %2289 = vxpose.xlu1.b32.cont [2/16] %v2273_v5, 128  ;;  %v4781_v41 = vmul.f32 %v2150_v7, %v4416_v50  ;;  %v4787_v21 = vmul.f32 %v2150_v7, %v4421_v8 }
 0x442   : > { %v3434_v16 = vpop.eup %3433  ;;  %3453 = vpow2.f32 %v1997_v63  ;;  %v1732_v51 = vadd.f32 1.0, %v3432_v32  ;;  %2194 = vxpose.xlu0.b32.cont [3/16] %v4688_v3, 128  ;;  %v4790_v58 = vmul.f32 %v2151_v11, %v4425_v52  ;;  %v4793_v4 = vmul.f32 %v2151_v11, %v4431_v54 }
 0x443   : > { %v4773_v48 = vmul.f32 %v2149_v40, %v4403_v37  ;;  %v4775_v42 = vpop.eup %3435  ;;  %3455 = vpow2.f32 %v1993_v19  ;;  %v4778_v60 = vmul.f32 %v2149_v40, %v4407_v39  ;;  %v1730_v56 = vadd.f32 1.0, %v3434_v16 }
 0x444   : > { %v4783_v59 = vpop.eup %3437  ;;  %3457 = vrcp.f32 %v1731_v55  ;;  %v2353_v13 = vadd.f32 5e-11, %v4659_v17  ;;  %v2355_v63 = vadd.f32 5e-11, %v4655_v36  ;;  %v4801_v19 = vmul.f32 %v4734_v6, %v4734_v6 }
 0x445   : > { %v4795_v53 = vpop.eup %3439  ;;  %3459 = vrcp.f32 %v1729_v62  ;;  %2290 = vxpose.xlu1.b32.cont [3/16] %v2274_v10, 128  ;;  %v4804_v33 = vmul.f32 %v2368_v28, %v4363_v18  ;;  %v2275_v32 = vsub.f32 0.0, %v4745_v57  ;;  %v4809_v17 = vmul.f32 %v2368_v28, %v4367_v9 }
 0x446   : > { %v3442_v5 = vpop.eup %3441  ;;  %3461 = vrcp.f32 %v1732_v51  ;;  %2195 = vxpose.xlu0.b32.cont [4/16] %v4739_v2, 128  ;;  %v2369_v6 = vmul.f32 %v4683_v38, %v2353_v13  ;;  %v4816_v18 = vmul.f32 %v4671_v46, %v4379_v0  ;;  %v2276_v2 = vsub.f32 0.0, %v4766_v34 }
 0x447   : > { %v3444_v3 = vpop.eup %3443  ;;  %v2007_v47 = vadd.f32 1.0, %v3442_v5  ;;  %3463 = vrcp.f32 %v1730_v56  ;;  %v4821_v9 = vmul.f32 %v4671_v46, %v4383_v1  ;;  %v2371_v34 = vmul.f32 %v4679_v26, %v2355_v63 }
 0x448   : > { %v3446_v45 = vpop.eup %3445  ;;  %v2010_v22 = vadd.f32 1.0, %v3444_v3  ;;  %v4826_v38 = vmul.f32 %v2369_v6, %v4371_v12  ;;  %v4829_v0 = vmul.f32 %v2369_v6, %v4375_v14  ;;  %v2356_v5 = vadd.f32 5e-11, %v4709_v27 }
 0x449   : > { %v3448_v36 = vpop.eup %3447  ;;  %v4811_v40 = vmul.f32 %v3446_v45, %v3446_v45  ;;  %3465 = vrcp.f32 %v2007_v47  ;;  %2291 = vxpose.xlu1.b32.cont [4/16] %v2275_v32, 128  ;;  %v4833_v56 = vmul.f32 %v2371_v34, %v4387_v25  ;;  %v4836_v12 = vmul.f32 %v2371_v34, %v4391_v24 }
 0x44a   : > { %v3450_v16 = vpop.eup %3449  ;;  %3467 = vrcp.f32 %v2010_v22  ;;  %v2008_v55 = vadd.f32 1.0, %v3448_v36  ;;  %2196 = vxpose.xlu0.b32.cont [5/16] %v2180_v61, 128  ;;  %v2357_v61 = vadd.f32 5e-11, %v4719_v29  ;;  %v2358_v26 = vadd.f32 5e-11, %v4696_v15 }
 0x44b   : > { %v3452_v57 = vpop.eup %3451  ;;  %v2074_v28 = vadd.f32 %v4811_v40, %v4801_v19  ;;  %v2013_v7 = vadd.f32 1.0, %v3450_v16  ;;  %v2277_v63 = vsub.f32 0.0, %v4778_v60  ;;  %v2359_v25 = vadd.f32 5e-11, %v4716_v20 }
 0x44c   : > { %v3454_v11 = vpop.eup %3453  ;;  %3469 = vrcp.f32 %v2008_v55  ;;  %v2011_v62 = vadd.f32 1.0, %v3452_v57  ;;  %v2372_v24 = vmul.f32 %v4749_v44, %v2356_v5  ;;  %v2373_v47 = vmul.f32 %v4759_v23, %v2357_v61 }
 0x44d   : > { %v3456_v10 = vpop.eup %3455  ;;  %v2090_v1 = vadd.f32 1e-10, %v2074_v28  ;;  %3471 = vrcp.f32 %v2013_v7  ;;  %v2014_v46 = vadd.f32 1.0, %v3454_v11  ;;  %2292 = vxpose.xlu1.b32.cont [5/16] %v2276_v2, 128  ;;  %v2374_v27 = vmul.f32 %v4752_v43, %v2358_v26 }
 0x44e   : > { %3473 = vrcp.f32 %v2011_v62  ;;  %v2012_v51 = vadd.f32 1.0, %v3456_v10  ;;  %v3458_v14 = vpop.eup %3457  ;;  %2197 = vxpose.xlu0.b32.cont [6/16] %v4773_v48, 128  ;;  %v4849_v15 = vmul.f32 %v4775_v42, %v4775_v42  ;;  %v2278_v29 = vsub.f32 0.0, %v4787_v21 }
 0x44f   : > { %3475 = vrcp.f32 %v2090_v1  ;;  %v3460_v13 = vpop.eup %3459  ;;  %v2375_v48 = vmul.f32 %v4755_v30, %v2359_v25  ;;  %v4854_v20 = vmul.f32 %v2372_v24, %v4395_v31  ;;  %v4857_v44 = vmul.f32 %v2372_v24, %v4399_v35 }
 0x450   : > { %3477 = vrcp.f32 %v2014_v46  ;;  %v3462_v3 = vpop.eup %3461  ;;  %v4860_v23 = vmul.f32 %v2373_v47, %v4403_v37  ;;  %v4863_v43 = vmul.f32 %v2373_v47, %v4407_v39  ;;  %v4867_v21 = vmul.f32 %v2374_v27, %v4416_v50 }
 0x451   : > { %3479 = vrcp.f32 %v2012_v51  ;;  %v3464_v45 = vpop.eup %3463  ;;  %2293 = vxpose.xlu1.b32.cont [6/16] %v2277_v63, 128  ;;  %v4870_v30 = vmul.f32 %v2374_v27, %v4421_v8  ;;  %v4873_v31 = vmul.f32 %v2375_v48, %v4425_v52  ;;  %v1760_v35 = vmul.f32 %v4783_v59, %v4783_v59 }
 0x452   : > { %2198 = vxpose.xlu0.b32.cont [7/16] %v4781_v41, 128  ;;  %v4878_v39 = vmul.f32 %v2375_v48, %v4431_v54  ;;  %v1758_v41 = vmul.f32 %v4795_v53, %v4795_v53  ;;  %v1763_v36 = vmul.f32 %v3458_v14, %v3458_v14  ;;  %v2138_v8 = vadd.f32 5e-11, %v4801_v19 }
 0x453   : > { %v3466_v60 = vpop.eup %3465  ;;  %v1761_v52 = vmul.f32 %v3460_v13, %v3460_v13  ;;  %v4884_v16 = vmul.f32 %v3462_v3, %v3462_v3  ;;  %v2279_v53 = vsub.f32 0.0, %v4793_v4  ;;  %v2362_v28 = vadd.f32 5e-11, %v4811_v40  ;;  %v5245_v13 = vld [vmem:[#allocation28_spill] sm:$0xff] }
 0x454   : > { %v3468_v42 = vpop.eup %3467  ;;  %v2039_v22 = vmul.f32 %v3466_v60, %v3466_v60  ;;  %v1762_v11 = vmul.f32 %v3464_v45, %v3464_v45  ;;  %v2136_v48 = vadd.f32 5e-11, %v4849_v15 }
 0x455   : > { %v2042_v37 = vmul.f32 %v3468_v42, %v3468_v42  ;;  %2294 = vxpose.xlu1.b32.cont [7/16] %v2278_v29, 128 }
 0x456   : > { %v3470_v32 = vpop.eup %3469  ;;  %v2072_v50 = vadd.f32 %v2039_v22, %v4849_v15  ;;  %2199 = vxpose.xlu0.b32.cont [8/16] %v4790_v58, 128  ;;  %v2360_v60 = vadd.f32 5e-11, %v2039_v22 }
 0x457   : > { %v3472_v6 = vpop.eup %3471  ;;  %v2075_v55 = vadd.f32 %v2042_v37, %v1760_v35  ;;  %v2040_v59 = vmul.f32 %v3470_v32, %v3470_v32  ;;  %v2139_v32 = vadd.f32 5e-11, %v1760_v35 }
 0x458   : > { %v3474_v2 = vpop.eup %3473  ;;  %v2088_v57 = vadd.f32 1e-10, %v2072_v50  ;;  %v4886_v54 = vmul.f32 %v3472_v6, %v3472_v6  ;;  %v2363_v50 = vadd.f32 5e-11, %v2042_v37  ;;  %v2137_v6 = vadd.f32 5e-11, %v1758_v41 }
 0x459   : > { %v3476_v7 = vpop.eup %3475  ;;  %v2091_v62 = vadd.f32 1e-10, %v2075_v55  ;;  %v2073_v19 = vadd.f32 %v2040_v59, %v1758_v41  ;;  %v4891_v34 = vmul.f32 %v3474_v2, %v3474_v2  ;;  %2295 = vxpose.xlu1.b32.cont [8/16] %v2279_v53, 128  ;;  %v2140_v55 = vadd.f32 5e-11, %v1761_v52  ;;  %v5248_v41 = vld [vmem:[#allocation29_spill] sm:$0xff] }
 0x45a   : > { %v3478_v10 = vpop.eup %3477  ;;  %3481 = vrcp.f32 %v2088_v57  ;;  %v2078_v1 = vadd.f32 %v4886_v54, %v1763_v36  ;;  %v2154_v46 = vmul.f32 %v3476_v7, %v2138_v8  ;;  %v2378_v51 = vmul.f32 %v3476_v7, %v2362_v28 }
 0x45b   : > { %v3480_v14 = vpop.eup %3479  ;;  %3483 = vrcp.f32 %v2091_v62  ;;  %v2089_v58 = vadd.f32 1e-10, %v2073_v19  ;;  %v2076_v4 = vadd.f32 %v4891_v34, %v1761_v52  ;;  %v4895_v5 = vmul.f32 %v3478_v10, %v3478_v10  ;;  %v5246_v19 = vld [vmem:[#allocation24_spill] sm:$0xff] }
 0x45c   : > { %v2094_v40 = vadd.f32 1e-10, %v2078_v1  ;;  %v4897_v61 = vmul.f32 %v3480_v14, %v3480_v14  ;;  %v4900_v26 = vmul.f32 %v2154_v46, %v4473_v49  ;;  %v4903_v63 = vmul.f32 %v2154_v46, %v5245_v13  ;;  %v5247_v1 = vld [vmem:[#allocation25_spill] sm:$0xff] }
 0x45d   : > { %3485 = vrcp.f32 %v2089_v58  ;;  %v2092_v25 = vadd.f32 1e-10, %v2076_v4  ;;  %v2079_v3 = vadd.f32 %v4895_v5, %v4884_v16  ;;  %v4908_v24 = vmul.f32 %v2378_v51, %v4473_v49 }
 0x45e   : > { %3487 = vrcp.f32 %v2094_v40  ;;  %v2077_v47 = vadd.f32 %v4897_v61, %v1762_v11  ;;  %v4912_v27 = vmul.f32 %v2378_v51, %v5245_v13  ;;  %v2142_v53 = vadd.f32 5e-11, %v1763_v36  ;;  %v5249_v51 = vld [vmem:[#allocation30_spill] sm:$0xff] }
 0x45f   : > { %3489 = vrcp.f32 %v2092_v25  ;;  %v2095_v45 = vadd.f32 1e-10, %v2079_v3  ;;  %v2361_v28 = vadd.f32 5e-11, %v2040_v59  ;;  %v2141_v4 = vadd.f32 5e-11, %v1762_v11 }
 0x460   : > { %v2093_v29 = vadd.f32 1e-10, %v2077_v47  ;;  %v5250_v25 = vld [vmem:[#allocation26_spill] sm:$0xff]  ;;  %v5251_v47 = vld [vmem:[#allocation27_spill] sm:$0xff] }
 0x461   : > { %3491 = vrcp.f32 %v2095_v45 }
 0x462   : > { %3493 = vrcp.f32 %v2093_v29 }
 0x464   : > { %v3482_v42 = vpop.eup %3481 }
 0x465   : > { %v3484_v8 = vpop.eup %3483  ;;  %v2152_v49 = vmul.f32 %v3482_v42, %v2136_v48  ;;  %v2376_v2 = vmul.f32 %v3482_v42, %v2360_v60  ;;  %v2143_v48 = vadd.f32 5e-11, %v4884_v16  ;;  %v5252_v42 = vld [vmem:[#allocation35_spill] sm:$0xff]  ;;  %v2364_v16 = vadd.f32 5e-11, %v4891_v34 }
 0x466   : > { %v2155_v57 = vmul.f32 %v3484_v8, %v2139_v32  ;;  %v2379_v7 = vmul.f32 %v3484_v8, %v2363_v50  ;;  %v5253_v50 = vld [vmem:[#allocation36_spill] sm:$0xff] }
 0x467   : > { %v3486_v62 = vpop.eup %3485  ;;  %v2184_v10 = vmul.f32 %v2152_v49, %v5246_v19  ;;  %v2264_v46 = vmul.f32 %v2152_v49, %v5247_v1  ;;  %v4918_v15 = vmul.f32 %v2376_v2, %v5246_v19  ;;  %v4921_v22 = vmul.f32 %v2376_v2, %v5247_v1  ;;  %v5254_v2 = vld [vmem:[#allocation31_spill] sm:$0xff] }
 0x468   : > { %v3488_v35 = vpop.eup %3487  ;;  %v2153_v37 = vmul.f32 %v3486_v62, %v2137_v6  ;;  %v2187_v52 = vmul.f32 %v2155_v57, %v5248_v41  ;;  %v2267_v14 = vmul.f32 %v2155_v57, %v5249_v51  ;;  %v2377_v36 = vmul.f32 %v3486_v62, %v2361_v28 }
 0x469   : > { %v3490_v59 = vpop.eup %3489  ;;  %2200 = vxpose.xlu0.b32.cont [9/16] %v2184_v10, 128  ;;  %v2280_v58 = vsub.f32 0.0, %v2264_v46  ;;  %v2158_v40 = vmul.f32 %v3488_v35, %v2142_v53  ;;  %v4926_v13 = vmul.f32 %v2379_v7, %v5248_v41  ;;  %v5255_v53 = vld [vmem:[#allocation32_spill] sm:$0xff]  ;;  %v4943_v10 = vmul.f32 %v2379_v7, %v5249_v51  ;;  %v5256_v46 = vld [vmem:[#allocation37_spill] sm:$0xff]  ;;  %v5257_v41 = vld [vmem:[#allocation38_spill] sm:$0xff] }
 0x46a   : > { %v2185_v3 = vmul.f32 %v2153_v37, %v5250_v25  ;;  %v2265_v45 = vmul.f32 %v2153_v37, %v5251_v47  ;;  %v2156_v29 = vmul.f32 %v3490_v59, %v2140_v55  ;;  %v4934_v49 = vmul.f32 %v2377_v36, %v5250_v25  ;;  %v5258_v25 = vld [vmem:[#allocation33_spill] sm:$0xff] }
 0x46b   : > { %v3492_v60 = vpop.eup %3491  ;;  %2296 = vxpose.xlu1.b32.cont [9/16] %v2280_v58, 128  ;;  %v2190_v32 = vmul.f32 %v2158_v40, %v5252_v42  ;;  %v2270_v8 = vmul.f32 %v2158_v40, %v5253_v50  ;;  %v4937_v11 = vmul.f32 %v2377_v36, %v5251_v47  ;;  %v2365_v1 = vadd.f32 5e-11, %v4897_v61 }
 0x46c   : > { %v3494_v6 = vpop.eup %3493  ;;  %v2188_v57 = vmul.f32 %v2156_v29, %v5254_v2  ;;  %v2268_v28 = vmul.f32 %v2156_v29, %v5255_v53  ;;  %v2159_v55 = vmul.f32 %v3492_v60, %v2143_v48  ;;  %v2281_v62 = vsub.f32 0.0, %v2265_v45  ;;  %v5259_v29 = vld [vmem:[#allocation34_spill] sm:$0xff] }
 0x46d   : > { %2201 = vxpose.xlu0.b32.cont [10/16] %v2185_v3, 128  ;;  %v2157_v19 = vmul.f32 %v3494_v6, %v2141_v4  ;;  %v2380_v58 = vmul.f32 %v3490_v59, %v2364_v16  ;;  %v2366_v40 = vadd.f32 5e-11, %v4886_v54  ;;  %v2381_v3 = vmul.f32 %v3494_v6, %v2365_v1 }
 0x46e   : > { %v2191_v37 = vmul.f32 %v2159_v55, %v5256_v46  ;;  %v2271_v36 = vmul.f32 %v2159_v55, %v5257_v41  ;;  %v2367_v4 = vadd.f32 5e-11, %v4895_v5  ;;  %v2282_v59 = vsub.f32 0.0, %v4903_v63 }
 0x46f   : > { %2297 = vxpose.xlu1.b32.cont [10/16] %v2281_v62, 128  ;;  %v2189_v47 = vmul.f32 %v2157_v19, %v5258_v25  ;;  %v2269_v34 = vmul.f32 %v2157_v19, %v5259_v29  ;;  %v4953_v7 = vmul.f32 %v2380_v58, %v5254_v2  ;;  %v4956_v61 = vmul.f32 %v2380_v58, %v5255_v53 }
 0x470   : > { %v2382_v51 = vmul.f32 %v3488_v35, %v2366_v40  ;;  %v2413_v54 = vmul.f32 %v2381_v3, %v5258_v25  ;;  %v4962_v45 = vmul.f32 %v2381_v3, %v5259_v29  ;;  %v2383_v48 = vmul.f32 %v3492_v60, %v2367_v4 }
 0x471   : > { %2202 = vxpose.xlu0.b32.cont [11/16] %v4900_v26, 128  ;;  %v2283_v26 = vsub.f32 0.0, %v2267_v14  ;;  %v2284_v63 = vsub.f32 0.0, %v2268_v28  ;;  %v2285_v53 = vsub.f32 0.0, %v2269_v34  ;;  %v2286_v60 = vsub.f32 0.0, %v2270_v8 }
 0x472   : > { %v2414_v6 = vmul.f32 %v2382_v51, %v5252_v42  ;;  %v4966_v5 = vmul.f32 %v2382_v51, %v5253_v50  ;;  %v2415_v2 = vmul.f32 %v2383_v48, %v5256_v46  ;;  %v4970_v35 = vmul.f32 %v2383_v48, %v5257_v41 }
 0x473   : > { %2298 = vxpose.xlu1.b32.cont [11/16] %v2282_v59, 128  ;;  %v2287_v42 = vsub.f32 0.0, %v2271_v36  ;;  %v2497_v50 = vsub.f32 0.0, %v4809_v17  ;;  %v2499_v14 = vsub.f32 0.0, %v4821_v9  ;;  %v2502_v17 = vsub.f32 0.0, %v4863_v43 }
 0x474   : > { %v2504_v9 = vsub.f32 0.0, %v4878_v39  ;;  %v2512_v43 = vsub.f32 0.0, %v4970_v35 }
 0x475   : > { %2203 = vxpose.xlu0.b32.cont [12/16] %v2187_v52, 128  ;;  %v2498_v52 = vsub.f32 0.0, %v4829_v0  ;;  %v2506_v0 = vsub.f32 0.0, %v4937_v11 }
 0x477   : > { %2299 = vxpose.xlu1.b32.cont [12/16] %v2283_v26, 128 }
 0x479   : > { %2204 = vxpose.xlu0.b32.cont [13/16] %v2188_v57, 128 }
 0x47b   : > { %2300 = vxpose.xlu1.b32.cont [13/16] %v2284_v63, 128 }
 0x47d   : > { %2205 = vxpose.xlu0.b32.cont [14/16] %v2189_v47, 128 }
 0x47f   : > { %2301 = vxpose.xlu1.b32.cont [14/16] %v2285_v53, 128 }
 0x481   : > { %2206 = vxpose.xlu0.b32.cont [15/16] %v2190_v32, 128  ;;  %v2500_v32 = vsub.f32 0.0, %v4836_v12  ;;  %v2508_v12 = vsub.f32 0.0, %v4943_v10 }
 0x483   : > { %2302 = vxpose.xlu1.b32.cont [15/16] %v2286_v60, 128 }
 0x485   : > { %2207 = vxpose.xlu0.b32.end [16/16] %v2191_v37, 128 }
 0x487   : > { %2303 = vxpose.xlu1.b32.end [16/16] %v2287_v42, 128 }
 0x489   : > { %2416 = vxpose.xlu0.b32.start [1/16] %v4804_v33, 128  ;;  %v2501_v33 = vsub.f32 0.0, %v4857_v44  ;;  %v2510_v44 = vsub.f32 0.0, %v4962_v45 }
 0x48b   : > { %2513 = vxpose.xlu1.b32.start [1/16] %v2497_v50, 128 }
 0x48d   : > { %2417 = vxpose.xlu0.b32.cont [2/16] %v4826_v38, 128  ;;  %v2505_v38 = vsub.f32 0.0, %v4921_v22 }
 0x48f   : > { %2514 = vxpose.xlu1.b32.cont [2/16] %v2498_v52, 128 }
 0x491   : > { %2418 = vxpose.xlu0.b32.cont [3/16] %v4816_v18, 128  ;;  %v2503_v18 = vsub.f32 0.0, %v4870_v30 }
 0x493   : > { %2515 = vxpose.xlu1.b32.cont [3/16] %v2499_v14, 128 }
 0x495   : > { %2419 = vxpose.xlu0.b32.cont [4/16] %v4833_v56, 128  ;;  %v2507_v56 = vsub.f32 0.0, %v4912_v27 }
 0x497   : > { %2516 = vxpose.xlu1.b32.cont [4/16] %v2500_v32, 128 }
 0x499   : > { %2420 = vxpose.xlu0.b32.cont [5/16] %v4854_v20, 128  ;;  %v2509_v20 = vsub.f32 0.0, %v4956_v61 }
 0x49b   : > { %2517 = vxpose.xlu1.b32.cont [5/16] %v2501_v33, 128 }
 0x49d   : > { %2421 = vxpose.xlu0.b32.cont [6/16] %v4860_v23, 128  ;;  %v2511_v23 = vsub.f32 0.0, %v4966_v5 }
 0x49f   : > { %2518 = vxpose.xlu1.b32.cont [6/16] %v2502_v17, 128 }
 0x4a1   : > { %2422 = vxpose.xlu0.b32.cont [7/16] %v4867_v21, 128 }
 0x4a3   : > { %2519 = vxpose.xlu1.b32.cont [7/16] %v2503_v18, 128 }
 0x4a5   : > { %2423 = vxpose.xlu0.b32.cont [8/16] %v4873_v31, 128 }
 0x4a7   : > { %2520 = vxpose.xlu1.b32.cont [8/16] %v2504_v9, 128 }
 0x4a9   : > { %2424 = vxpose.xlu0.b32.cont [9/16] %v4918_v15, 128 }
 0x4ab   : > { %2521 = vxpose.xlu1.b32.cont [9/16] %v2505_v38, 128 }
 0x4ad   : > { %2425 = vxpose.xlu0.b32.cont [10/16] %v4934_v49, 128 }
 0x4af   : > { %2522 = vxpose.xlu1.b32.cont [10/16] %v2506_v0, 128 }
 0x4b1   : > { %2426 = vxpose.xlu0.b32.cont [11/16] %v4908_v24, 128 }
 0x4b3   : > { %2523 = vxpose.xlu1.b32.cont [11/16] %v2507_v56, 128 }
 0x4b5   : > { %2427 = vxpose.xlu0.b32.cont [12/16] %v4926_v13, 128 }
 0x4b7   : > { %2524 = vxpose.xlu1.b32.cont [12/16] %v2508_v12, 128 }
 0x4b9   : > { %2428 = vxpose.xlu0.b32.cont [13/16] %v4953_v7, 128 }
 0x4bb   : > { %2525 = vxpose.xlu1.b32.cont [13/16] %v2509_v20, 128 }
 0x4bd   : > { %2429 = vxpose.xlu0.b32.cont [14/16] %v2413_v54, 128 }
 0x4bf   : > { %2526 = vxpose.xlu1.b32.cont [14/16] %v2510_v44, 128 }
 0x4c1   : > { %2430 = vxpose.xlu0.b32.cont [15/16] %v2414_v6, 128 }
 0x4c3   : > { %2527 = vxpose.xlu1.b32.cont [15/16] %v2511_v23, 128 }
 0x4c5   : > { %2431 = vxpose.xlu0.b32.end [16/16] %v2415_v2, 128 }
 0x4c7   : > { %2528 = vxpose.xlu1.b32.end [16/16] %v2512_v43, 128 }
 0x4c9   : > { %v2208_v21 = vpop.trf.xlu0 }
 0x4ca   : > { %2224 = vst [vmem:[%s5002_s20] sm:$0xff] %v2208_v21 }
 0x4cb   : > { %v2304_v30 = vpop.trf.xlu1 }
 0x4cc   : > { %2320 = vst [vmem:[%s5005_s22] sm:$0xff] %v2304_v30 }
 0x4cd   : > { %v2209_v31 = vpop.trf.xlu0 }
 0x4ce   : > { %2225 = vst [vmem:[%s5002_s20 + $0x8] sm:$0xff] %v2209_v31 }
 0x4cf   : > { %v2305_v39 = vpop.trf.xlu1 }
 0x4d0   : > { %2321 = vst [vmem:[%s5005_s22 + $0x8] sm:$0xff] %v2305_v39 }
 0x4d1   : > { %v2210_v24 = vpop.trf.xlu0 }
 0x4d2   : > { %2226 = vst [vmem:[%s5002_s20 + $0x10] sm:$0xff] %v2210_v24 }
 0x4d3   : > { %v2306_v27 = vpop.trf.xlu1 }
 0x4d4   : > { %2322 = vst [vmem:[%s5005_s22 + $0x10] sm:$0xff] %v2306_v27 }
 0x4d5   : > { %v2211_v15 = vpop.trf.xlu0 }
 0x4d6   : > { %2227 = vst [vmem:[%s5002_s20 + $0x18] sm:$0xff] %v2211_v15 }
 0x4d7   : > { %v2307_v22 = vpop.trf.xlu1 }
 0x4d8   : > { %2323 = vst [vmem:[%s5005_s22 + $0x18] sm:$0xff] %v2307_v22 }
 0x4d9   : > { %v2212_v13 = vpop.trf.xlu0 }
 0x4da   : > { %2228 = vst [vmem:[%s5002_s20 + $0x20] sm:$0xff] %v2212_v13 }
 0x4db   : > { %v2308_v8 = vpop.trf.xlu1 }
 0x4dc   : > { %2324 = vst [vmem:[%s5005_s22 + $0x20] sm:$0xff] %v2308_v8 }
 0x4dd   : > { %v2213_v49 = vpop.trf.xlu0 }
 0x4de   : > { %2229 = vst [vmem:[%s5002_s20 + $0x28] sm:$0xff] %v2213_v49 }
 0x4df   : > { %v2309_v11 = vpop.trf.xlu1 }
 0x4e0   : > { %2325 = vst [vmem:[%s5005_s22 + $0x28] sm:$0xff] %v2309_v11 }
 0x4e1   : > { %v2214_v57 = vpop.trf.xlu0 }
 0x4e2   : > { %2230 = vst [vmem:[%s5002_s20 + $0x30] sm:$0xff] %v2214_v57 }
 0x4e3   : > { %v2310_v28 = vpop.trf.xlu1 }
 0x4e4   : > { %2326 = vst [vmem:[%s5005_s22 + $0x30] sm:$0xff] %v2310_v28 }
 0x4e5   : > { %v2215_v55 = vpop.trf.xlu0 }
 0x4e6   : > { %2231 = vst [vmem:[%s5002_s20 + $0x38] sm:$0xff] %v2215_v55 }
 0x4e7   : > { %v2311_v16 = vpop.trf.xlu1 }
 0x4e8   : > { %2327 = vst [vmem:[%s5005_s22 + $0x38] sm:$0xff] %v2311_v16 }
 0x4e9   : > { %v2216_v62 = vpop.trf.xlu0 }
 0x4ea   : > { %2232 = vst [vmem:[%s5002_s20 + $0x40] sm:$0xff] %v2216_v62 }
 0x4eb   : > { %v2312_v19 = vpop.trf.xlu1 }
 0x4ec   : > { %2328 = vst [vmem:[%s5005_s22 + $0x40] sm:$0xff] %v2312_v19 }
 0x4ed   : > { %v2217_v10 = vpop.trf.xlu0 }
 0x4ee   : > { %2233 = vst [vmem:[%s5002_s20 + $0x48] sm:$0xff] %v2217_v10 }
 0x4ef   : > { %v2313_v1 = vpop.trf.xlu1 }
 0x4f0   : > { %2329 = vst [vmem:[%s5005_s22 + $0x48] sm:$0xff] %v2313_v1 }
 0x4f1   : > { %v2218_v46 = vpop.trf.xlu0 }
 0x4f2   : > { %2234 = vst [vmem:[%s5002_s20 + $0x50] sm:$0xff] %v2218_v46 }
 0x4f3   : > { %v2314_v37 = vpop.trf.xlu1 }
 0x4f4   : > { %2330 = vst [vmem:[%s5005_s22 + $0x50] sm:$0xff] %v2314_v37 }
 0x4f5   : > { %v2219_v41 = vpop.trf.xlu0 }
 0x4f6   : > { %2235 = vst [vmem:[%s5002_s20 + $0x58] sm:$0xff] %v2219_v41 }
 0x4f7   : > { %v2315_v36 = vpop.trf.xlu1 }
 0x4f8   : > { %2331 = vst [vmem:[%s5005_s22 + $0x58] sm:$0xff] %v2315_v36 }
 0x4f9   : > { %v2220_v58 = vpop.trf.xlu0 }
 0x4fa   : > { %2236 = vst [vmem:[%s5002_s20 + $0x60] sm:$0xff] %v2220_v58 }
 0x4fb   : > { %v2316_v40 = vpop.trf.xlu1 }
 0x4fc   : > { %2332 = vst [vmem:[%s5005_s22 + $0x60] sm:$0xff] %v2316_v40 }
 0x4fd   : > { %v2221_v25 = vpop.trf.xlu0 }
 0x4fe   : > { %2237 = vst [vmem:[%s5002_s20 + $0x68] sm:$0xff] %v2221_v25 }
 0x4ff   : > { %v2317_v47 = vpop.trf.xlu1 }
 0x500   : > { %2333 = vst [vmem:[%s5005_s22 + $0x68] sm:$0xff] %v2317_v47 }
 0x501   : > { %v2222_v29 = vpop.trf.xlu0 }
 0x502   : > { %2238 = vst [vmem:[%s5002_s20 + $0x70] sm:$0xff] %v2222_v29 }
 0x503   : > { %v2318_v34 = vpop.trf.xlu1 }
 0x504   : > { %2334 = vst [vmem:[%s5005_s22 + $0x70] sm:$0xff] %v2318_v34 }
 0x505   : > { %v2223_v3 = vpop.trf.xlu0 }
 0x506   : > { %2239 = vst [vmem:[%s5002_s20 + $0x78] sm:$0xff] %v2223_v3 }
 0x507   : > { %v2319_v4 = vpop.trf.xlu1 }
 0x508   : > { %2335 = vst [vmem:[%s5005_s22 + $0x78] sm:$0xff] %v2319_v4 }
 0x509   : > { %v2432_v7 = vpop.trf.xlu0 }
 0x50a   : > { %2850 = vst [vmem:[%s5002_s20 + $0x80] sm:$0xff] %v2432_v7 }
 0x50b   : > { %v2529_v61 = vpop.trf.xlu1 }
 0x50c   : > { %2866 = vst [vmem:[%s5005_s22 + $0x80] sm:$0xff] %v2529_v61 }
 0x50d   : > { %v2433_v51 = vpop.trf.xlu0 }
 0x50e   : > { %2851 = vst [vmem:[%s5002_s20 + $0x88] sm:$0xff] %v2433_v51 }
 0x50f   : > { %v2530_v59 = vpop.trf.xlu1 }
 0x510   : > { %2867 = vst [vmem:[%s5005_s22 + $0x88] sm:$0xff] %v2530_v59 }
 0x511   : > { %v2434_v54 = vpop.trf.xlu0 }
 0x512   : > { %2852 = vst [vmem:[%s5002_s20 + $0x90] sm:$0xff] %v2434_v54 }
 0x513   : > { %v2531_v45 = vpop.trf.xlu1 }
 0x514   : > { %2868 = vst [vmem:[%s5005_s22 + $0x90] sm:$0xff] %v2531_v45 }
 0x515   : > { %v2435_v48 = vpop.trf.xlu0 }
 0x516   : > { %2853 = vst [vmem:[%s5002_s20 + $0x98] sm:$0xff] %v2435_v48 }
 0x517   : > { %v2532_v6 = vpop.trf.xlu1 }
 0x518   : > { %2869 = vst [vmem:[%s5005_s22 + $0x98] sm:$0xff] %v2532_v6 }
 0x519   : > { %v2436_v5 = vpop.trf.xlu0 }
 0x51a   : > { %2854 = vst [vmem:[%s5002_s20 + $0xa0] sm:$0xff] %v2436_v5 }
 0x51b   : > { %v2533_v2 = vpop.trf.xlu1 }
 0x51c   : > { %2870 = vst [vmem:[%s5005_s22 + $0xa0] sm:$0xff] %v2533_v2 }
 0x51d   : > { %v2437_v35 = vpop.trf.xlu0 }
 0x51e   : > { %2855 = vst [vmem:[%s5002_s20 + $0xa8] sm:$0xff] %v2437_v35 }
 0x51f   : > { %v2534_v26 = vpop.trf.xlu1 }
 0x520   : > { %2871 = vst [vmem:[%s5005_s22 + $0xa8] sm:$0xff] %v2534_v26 }
 0x521   : > { %v2438_v63 = vpop.trf.xlu0 }
 0x522   : > { %2856 = vst [vmem:[%s5002_s20 + $0xb0] sm:$0xff] %v2438_v63 }
 0x523   : > { %v2535_v53 = vpop.trf.xlu1 }
 0x524   : > { %2872 = vst [vmem:[%s5005_s22 + $0xb0] sm:$0xff] %v2535_v53 }
 0x525   : > { %v2439_v60 = vpop.trf.xlu0 }
 0x526   : > { %2857 = vst [vmem:[%s5002_s20 + $0xb8] sm:$0xff] %v2439_v60 }
 0x527   : > { %v2536_v42 = vpop.trf.xlu1 }
 0x528   : > { %2873 = vst [vmem:[%s5005_s22 + $0xb8] sm:$0xff] %v2536_v42 }
 0x529   : > { %v2440_v50 = vpop.trf.xlu0 }
 0x52a   : > { %2858 = vst [vmem:[%s5002_s20 + $0xc0] sm:$0xff] %v2440_v50 }
 0x52b   : > { %v2537_v52 = vpop.trf.xlu1 }
 0x52c   : > { %2874 = vst [vmem:[%s5005_s22 + $0xc0] sm:$0xff] %v2537_v52 }
 0x52d   : > { %v2441_v14 = vpop.trf.xlu0 }
 0x52e   : > { %2859 = vst [vmem:[%s5002_s20 + $0xc8] sm:$0xff] %v2441_v14 }
 0x52f   : > { %v2538_v32 = vpop.trf.xlu1 }
 0x530   : > { %2875 = vst [vmem:[%s5005_s22 + $0xc8] sm:$0xff] %v2538_v32 }
 0x531   : > { %v2442_v33 = vpop.trf.xlu0 }
 0x532   : > { %2860 = vst [vmem:[%s5002_s20 + $0xd0] sm:$0xff] %v2442_v33 }
 0x533   : > { %v2539_v17 = vpop.trf.xlu1 }
 0x534   : > { %2876 = vst [vmem:[%s5005_s22 + $0xd0] sm:$0xff] %v2539_v17 }
 0x535   : > { %v2443_v18 = vpop.trf.xlu0 }
 0x536   : > { %2861 = vst [vmem:[%s5002_s20 + $0xd8] sm:$0xff] %v2443_v18 }
 0x537   : > { %v2540_v9 = vpop.trf.xlu1 }
 0x538   : > { %2877 = vst [vmem:[%s5005_s22 + $0xd8] sm:$0xff] %v2540_v9 }
 0x539   : > { %v2444_v38 = vpop.trf.xlu0 }
 0x53a   : > { %2862 = vst [vmem:[%s5002_s20 + $0xe0] sm:$0xff] %v2444_v38 }
 0x53b   : > { %v2541_v0 = vpop.trf.xlu1 }
 0x53c   : > { %2878 = vst [vmem:[%s5005_s22 + $0xe0] sm:$0xff] %v2541_v0 }
 0x53d   : > { %v2445_v56 = vpop.trf.xlu0 }
 0x53e   : > { %2863 = vst [vmem:[%s5002_s20 + $0xe8] sm:$0xff] %v2445_v56 }
 0x53f   : > { %v2542_v12 = vpop.trf.xlu1 }
 0x540   : > { %2879 = vst [vmem:[%s5005_s22 + $0xe8] sm:$0xff] %v2542_v12 }
 0x541   : > { %v2446_v20 = vpop.trf.xlu0 }
 0x542   : > { %2864 = vst [vmem:[%s5002_s20 + $0xf0] sm:$0xff] %v2446_v20 }
 0x543   : > { %v2543_v44 = vpop.trf.xlu1 }
 0x544   : > { %2880 = vst [vmem:[%s5005_s22 + $0xf0] sm:$0xff] %v2543_v44 }
 0x545   : > { %v2447_v23 = vpop.trf.xlu0 }
 0x546   : > { %2865 = vst [vmem:[%s5002_s20 + $0xf8] sm:$0xff] %v2447_v23 }
 0x547   : > { %v2544_v43 = vpop.trf.xlu1 }
 0x548   : > { %3678 = shalt.err (!%p3675_p8)
}
 0x549   : > { %s3679_s20 = scalar_lea.hbm %s5072_s19, 4096  ;;  %s3683_s27 = scalar_lea.hbm %s5170_s6, 8192 }
 0x54a   : > { %p3680_p3 = scmp.ne.s32.totalorder %s5072_s19, %s3679_s20  ;;  %p3684_p0 = scmp.lt.u32.totalorder %s5072_s19, %s5170_s6 }
 0x54b   : > { %p3685_p1 = scmp.lt.u32.totalorder %s3683_s27, %s3679_s20  ;;  %p3687_p6 = scmp.lt.u32.totalorder %s3679_s20, %s5072_s19 }
 0x54c   : > { %p3681_p12 = pnand %p3680_p3, %p5261_p5 }
 0x54d   : > { %p3686_p7 = por %p3685_p1, %p3684_p0 }
 0x54e   : > { %p3682_p13 = pneg %p3681_p12 }
 0x54f   : > { %p3688_p10 = por %p3687_p6, %p3686_p7 }
 0x551   : > { %p3689_p11 = pnand %p3688_p10, %p3682_p13 }
 0x553   : > { %3692 = shalt.err (!%p3689_p11)
}
 0x554   : > { %s3808_s16 = smov 128   ;;  %s3809_s9 = smov 8   ;;  %2881 = vst [vmem:[%s5005_s22 + $0xf8] sm:$0xff] %v2544_v43 }
 0x555   : > { %3029 = dma.vmem_to_hbm [thread:$0]  (%p5261_p5), %s5074_s21, 4096, %s5072_s19, %s2563_s17, %s3808_s16, %s3808_s16, %s3809_s9  }
 0x556   : > { %s2568_s12 = scalar_lea.sflag [#allocation17], %s4107_s14  ;;  %s3693_s20 = scalar_lea.vmem %s5084_s1, 4096 }
 0x557   : > { %p3694_p2 = scmp.ne.s32.totalorder %s5084_s1, %s3693_s20  ;;  %s3810_s7 = smov [#allocation16]  }
 0x558   : > { %s3697_s18 = sshll.u32 %s3810_s7, 4  ;;  %s3698_s18 = int_to_ptr.vmem [resolvable:$false] %s3697_s18 }
 0x559   : > { %p3695_p4 = pnand %p3694_p2, %p5261_p5  ;;  %s3699_s27 = scalar_lea.vmem %s3698_s18, 8192 }
 0x55a   : > { %p3700_p8 = scmp.lt.s32.totalorder %s5084_s1, %s3698_s18  ;;  %p3701_p3 = scmp.lt.s32.totalorder %s3699_s27, %s3693_s20 }
 0x55b   : > { %p3696_p9 = pneg %p3695_p4 }
 0x55c   : > { %p3702_p12 = por %p3701_p3, %p3700_p8 }
 0x55e   : > { %p3703_p13 = pnand %p3702_p12, %p3696_p9 }
 0x560   : > { %3706 = shalt.err (!%p3703_p13)
}
 0x561   : > { %s3707_s22 = scalar_lea.hbm %s5082_s15, 4096  ;;  %s3711_s17 = scalar_lea.hbm %s5260_s23, 8192 }
 0x562   : > { %p3708_p0 = scmp.ne.s32.totalorder %s5082_s15, %s3707_s22  ;;  %p3712_p6 = scmp.lt.u32.totalorder %s5082_s15, %s5260_s23 }
 0x563   : > { %p3713_p10 = scmp.lt.u32.totalorder %s3711_s17, %s3707_s22  ;;  %p3715_p2 = scmp.lt.u32.totalorder %s3707_s22, %s5082_s15 }
 0x564   : > { %p3709_p1 = pnand %p3708_p0, %p5261_p5 }
 0x565   : > { %p3714_p11 = por %p3713_p10, %p3712_p6 }
 0x566   : > { %p3710_p7 = pneg %p3709_p1 }
 0x567   : > { %p3716_p4 = por %p3715_p2, %p3714_p11 }
 0x569   : > { %p3717_p9 = pnand %p3716_p4, %p3710_p7 }
 0x56b   : > { %3720 = shalt.err (!%p3717_p9)
}
 0x56c   : > { %3030 = dma.vmem_to_hbm [thread:$0]  (%p5261_p5), %s5084_s1, 4096, %s5082_s15, %s2568_s12, %s3808_s16, %s3808_s16, %s3809_s9  }
 0x56d PF: > { %s2614_s20 = sand.u32 1, %s3771_s24   ;;  %p5262_p8 = scmp.ne.s32.totalorder %s5224_s11, 0 }
 0x56e   : > { %p5263_p3 = scmp.ge.s32.totalorder %s3791_s29, 2  ;;  %s2615_s7 = scalar_lea.sflag [#allocation6], %s2614_s20 }
 0x570   : > { %p3054_p12 = pnand %p5263_p3, %p5262_p8 }
 0x572   : > { %3762 = dma.done.wait (!%p3054_p12), %s2615_s7, 4096  }
 0x573   : > { %3764 = vsyncadd (!%p3054_p12), %s2615_s7, 4294963200  ;;  %s2624_s10 = scalar_lea.sflag [#allocation17], %s2614_s20 }
 0x574   : > { %3766 = dma.done.wait (!%p3054_p12), %s2624_s10, 4096  }
 0x575   : > { %3768 = vsyncadd (!%p3054_p12), %s2624_s10, 4294963200  ;;  %s30_s29 = sadd.s32 1, %s3791_s29   ;;  %s5264_s24 = smov %s3775_s25 }
 0x576   : > { %p27_p13 = scmp.ge.s32.totalorder %s30_s29, 4   ;;  %s5265_s25 = smov %s3779_s26 }
 0x577   : > { %s5266_s26 = smov %s4052_s13  ;;  %s5267_s27 = smov %s3787_s28 }
 0x578   : > { %s5268_s28 = smov %s5270_s30  ;;  %29 = sbr.rel (!%p27_p13) target bundleno = 15 (0xf), region = 132 }
 0x57f   :  { %2629 = vsyncpa [#allocation5], 1 }
 0x580   :  { %2631 = vsyncpa [#allocation5 + $0x1], 1 }
 0x581   :  { %2632 = vsyncpa [#allocation8], 1 }
 0x582   :  { %2633 = vsyncpa [#allocation11], 1 }
 0x583   :  { %2634 = vsyncpa [#allocation14], 1 }
 0x584   :  { %2635 = vsyncpa [#allocation6], 1 }
 0x585   :  { %2637 = vsyncpa [#allocation6 + $0x1], 1 }
 0x586   :  { %2638 = vsyncpa [#allocation17], 1 }
 0x587   :  { %2640 = vsyncpa [#allocation17 + $0x1], 1 }

</bundles_post_ra>
